<compile_context>
chip_gen: v6e
topology: v6e:2x2x1
jax: 0.10.0
libtpu: 0.0.40
codegen_flags: <defaults>
</compile_context>

<pallas_src>
import functools
import math

import jax
import jax.numpy as jnp
from jax.experimental import pallas as pl
from jax.experimental.pallas import tpu as pltpu

_LANE = 128  # packed actor|critic head / output-slab width (one full lane group)


def _layer_norm(x, w, b, eps=1e-5):
    mu = jnp.mean(x, axis=-1, keepdims=True)
    var = jnp.mean((x - mu) ** 2, axis=-1, keepdims=True)
    return (x - mu) * jax.lax.rsqrt(var + eps) * w + b


def _decoder_kernel(aux_ref, h0_ref, c0_ref, emb_ref, norms_ref, w_ref,
                    bias_ref, wac_ref, bac_ref, out_ref,
                    *, hid, odim, nlayers, dec_len, bsz, teacher):
    f32, bf16 = jnp.float32, jnp.bfloat16

    # ---- resident loads: once per kernel call, never per step ----
    emb = emb_ref[...]                # (128, H)  bf16, rows >= odim are zero
    w = w_ref[...]                    # (L, 2H, 4H) bf16, [W_ih; W_hh] on K
    bias = bias_ref[...]              # (L, 4H) f32 (b_ih + b_hh)
    norms = norms_ref[...]            # (4, H) f32 LayerNorm params
    wac = wac_ref[...]                # (H, 128) bf16 fused actor|critic head
    bac = bac_ref[...]                # (1, 128) f32
    aux = aux_ref[...]                # (T, B, 128) f32: gumbel noise | teacher one-hot
    h = [h0_ref[l] for l in range(nlayers)]       # (B, H) f32 carries
    c = [c0_ref[l] for l in range(nlayers)]

    emb_w, emb_b = norms[0:1, :], norms[1:2, :]
    lstm_w, lstm_b = norms[2:3, :], norms[3:4, :]

    # hoisted once out of the unrolled loop (item 6 of the perf review)
    lane = jax.lax.broadcasted_iota(jnp.int32, (bsz, _LANE), 1)
    lane_f = lane.astype(f32)
    valid = lane < odim

    if teacher:
        # Decoder inputs are known ahead of time: [token0, a_0, ..., a_{T-2}].
        # Hoist embedding gather + embedding LayerNorm + layer-0 x@W_ih off the
        # serial recurrence as batched (T*B, .) matmuls.
        start = (lane == 0).astype(f32)[None]                         # (1,B,128)
        in_oh = jnp.concatenate([start, aux[:dec_len - 1]], axis=0)   # (T,B,128)
        in_oh = in_oh.reshape(dec_len * bsz, _LANE)
        x_all = _layer_norm(
            jnp.dot(in_oh.astype(bf16), emb, preferred_element_type=f32),
            emb_w, emb_b)                                              # (T*B, H)
        gx_all = jnp.dot(x_all.astype(bf16), w[0, :hid, :],
                         preferred_element_type=f32)                   # (T*B, 4H)
    else:
        onehot = (lane == 0).astype(f32)          # decoder_input = token 0

    outs, acts = [], []
    for t in range(dec_len):                      # static unroll (T is small)
        if teacher:
            x = x_all[t * bsz:(t + 1) * bsz]
        else:
            x = _layer_norm(jnp.dot(onehot.astype(bf16), emb,
                                    preferred_element_type=f32), emb_w, emb_b)

        # ---- stacked LSTM cells (PyTorch gate order i|f|g|o) ----
        for l in range(nlayers):
            if teacher and l == 0:
                gates = (gx_all[t * bsz:(t + 1) * bsz]
                         + jnp.dot(h[0].astype(bf16), w[0, hid:, :],
                                   preferred_element_type=f32)
                         + bias[0:1, :])
            else:
                xh = jnp.concatenate([x, h[l]], axis=-1)               # (B, 2H)
                gates = (jnp.dot(xh.astype(bf16), w[l],
                                 preferred_element_type=f32)
                         + bias[l:l + 1, :])                           # (B, 4H)
            sig = jax.nn.sigmoid(gates)           # full-width transcendentals,
            tah = jnp.tanh(gates)                 # then cheap lane slices
            i_g = sig[:, 0 * hid:1 * hid]
            f_g = sig[:, 1 * hid:2 * hid]
            g_g = tah[:, 2 * hid:3 * hid]
            o_g = sig[:, 3 * hid:4 * hid]
            c[l] = f_g * c[l] + i_g * g_g
            h[l] = o_g * jnp.tanh(c[l])
            x = h[l]

        out = _layer_norm(x, lstm_w, lstm_b)
        outs.append(out)

        if teacher:
            # given action index (one-hot dot lane index); never fed back here
            acts.append(jnp.sum(aux[t] * lane_f, axis=-1, keepdims=True))
        else:
            # per-step head is needed only because the sampled action feeds t+1
            z = jnp.dot(out.astype(bf16), wac, preferred_element_type=f32) + bac
            # Gumbel-max == Categorical(probs=softmax(z)).sample(); noise pre-drawn
            score = jnp.where(valid, z + aux[t], -1e30)
            smax = jnp.max(score, axis=-1, keepdims=True)
            action = jnp.min(jnp.where(score >= smax, lane_f, 2.0 * _LANE),
                             axis=-1, keepdims=True)                   # (B, 1)
            acts.append(action)
            onehot = (lane_f == action).astype(f32)                    # (B, 128)

    # ---- deferred actor|critic head + softmax + lane-dense packing ----
    out_all = jnp.stack(outs, axis=1).reshape(bsz * dec_len, hid)      # row = b*T+t
    act_all = jnp.stack(acts, axis=1).reshape(bsz * dec_len, 1)
    z_all = jnp.dot(out_all.astype(bf16), wac, preferred_element_type=f32) + bac
    lane_tb = jax.lax.broadcasted_iota(jnp.int32, (bsz * dec_len, _LANE), 1)
    valid_tb = lane_tb < odim
    mx = jnp.max(jnp.where(valid_tb, z_all, -1e30), axis=-1, keepdims=True)
    p = jnp.where(valid_tb, jnp.exp(jnp.where(valid_tb, z_all, mx) - mx), 0.0)
    s = jnp.sum(p, axis=-1, keepdims=True)
    inv = pl.reciprocal(s, approx=True)          # EUP seed (off the VPU path)
    inv = inv * (2.0 - s * inv)                  # one Newton step -> ~f32 accuracy
    pi = p * inv                                 # softmax over the odim lanes
    value = z_all[:, odim:odim + 1]              # critic output
    packed = jnp.where(lane_tb == odim, value, pi)
    packed = jnp.where(lane_tb == odim + 1, act_all, packed)
    out_ref[...] = packed.reshape(bsz, dec_len, _LANE)                 # (B, T, 128)


def decoder_network_forward(params, encoder_outputs, encoder_hidden,
                            actions=None, rng=None):
    """Mirrors DecoderNetwork.forward (is_attention=False)."""
    bsz, dec_len, hid = encoder_outputs.shape
    odim = params["embedding"].shape[0]
    nlayers = params["wih"].shape[0]
    assert odim + 2 <= _LANE, "output_dim must fit the packed 128-lane head"
    h0, c0 = encoder_hidden
    h0 = h0.astype(jnp.float32)
    c0 = c0.astype(jnp.float32)

    teacher = actions is not None
    if teacher:
        onehot = jax.nn.one_hot(jnp.transpose(actions).astype(jnp.int32), odim,
                                dtype=jnp.float32)                     # (T, B, odim)
        aux = jnp.pad(onehot, ((0, 0), (0, 0), (0, _LANE - odim)))
    else:
        aux = jax.random.gumbel(rng, (dec_len, bsz, _LANE), jnp.float32)

    norms = jnp.stack([params["emb_norm_w"], params["emb_norm_b"],
                       params["lstm_norm_w"], params["lstm_norm_b"]], axis=0)
    # lane-aligned bf16 embedding table (extra rows are zero and never selected)
    emb_pad = jnp.zeros((_LANE, hid), jnp.float32)
    emb_pad = emb_pad.at[:odim].set(params["embedding"]).astype(jnp.bfloat16)
    # fused gate weights [W_ih; W_hh] -> (L, 2H, 4H), bf16 for the MXU
    w_fused = jnp.concatenate([params["wih"], params["whh"]],
                              axis=1).astype(jnp.bfloat16)
    bias = params["b_ih"] + params["b_hh"]        # nn.LSTM has two bias vectors
    # fused zero-padded actor|critic head -> one lane-dense (H, 128) matmul
    wac = jnp.zeros((hid, _LANE), jnp.float32)
    wac = wac.at[:, :odim].set(params["actor_w"])
    wac = wac.at[:, odim:odim + 1].set(params["critic_w"]).astype(jnp.bfloat16)
    bac = jnp.zeros((1, _LANE), jnp.float32)
    bac = bac.at[0, :odim].set(params["actor_b"])
    bac = bac.at[0, odim].set(params["critic_b"][0])

    operands = (aux, h0, c0, emb_pad, norms, w_fused, bias, wac, bac)
    # Everything is resident in VMEM in this single-block design.  v7x has only
    # 64 MiB of VMEM (128 MiB on v5e/v6e); at toy sizes this is ~100 KiB, but
    # guard it and raise the scoped limit explicitly if the model grows.  For
    # large H, tile the stacked gate weights over a layer/K grid axis instead.
    resident = sum(int(a.size) * a.dtype.itemsize for a in operands)
    resident += bsz * dec_len * _LANE * 4
    assert resident < (32 << 20), "working set too large for the resident design"
    cparams = None
    if resident > (8 << 20):
        cparams = pltpu.CompilerParams(vmem_limit_bytes=min(2 * resident, 48 << 20))

    kernel = functools.partial(_decoder_kernel, hid=hid, odim=odim,
                               nlayers=nlayers, dec_len=dec_len, bsz=bsz,
                               teacher=teacher)
    # Single kernel invocation (no grid): the T-step decode loop runs inside.
    packed = pl.pallas_call(
        kernel,
        out_shape=jax.ShapeDtypeStruct((bsz, dec_len, _LANE), jnp.float32),
        compiler_params=cparams,
    )(*operands)

    logits = packed[:, :, :odim]        # pi (post-softmax), as in the PyTorch module
    values = packed[:, :, odim]
    decoder_action = packed[:, :, odim + 1]
    return decoder_action, logits, values


# ------------------------------ parameters ----------------------------------

def _xavier_uniform(key, shape, gain=1.0):
    fan_in, fan_out = shape
    bound = gain * math.sqrt(6.0 / (fan_in + fan_out))
    return jax.random.uniform(key, shape, jnp.float32, -bound, bound)


def init_params(key, output_dim, hidden_dim, num_layers):
    ks = iter(jax.random.split(key, 4 * num_layers + 8))
    orth = jax.nn.initializers.orthogonal()
    wih, whh = [], []
    for _ in range(num_layers):
        wih.append(_xavier_uniform(next(ks), (hidden_dim, 4 * hidden_dim)))
        whh.append(jnp.asarray(orth(next(ks), (4 * hidden_dim, hidden_dim)),
                               jnp.float32).T)
    return {
        "embedding": jax.random.uniform(next(ks), (output_dim, hidden_dim),
                                        jnp.float32, -1.0, 1.0),
        "emb_norm_w": jnp.ones((hidden_dim,), jnp.float32),
        "emb_norm_b": jnp.zeros((hidden_dim,), jnp.float32),
        "wih": jnp.stack(wih),                    # (L, H, 4H), transposed vs torch
        "whh": jnp.stack(whh),                    # (L, H, 4H)
        "b_ih": jnp.zeros((num_layers, 4 * hidden_dim), jnp.float32),
        "b_hh": jnp.zeros((num_layers, 4 * hidden_dim), jnp.float32),
        "lstm_norm_w": jnp.ones((hidden_dim,), jnp.float32),
        "lstm_norm_b": jnp.zeros((hidden_dim,), jnp.float32),
        "actor_w": _xavier_uniform(next(ks), (hidden_dim, output_dim)),
        "actor_b": jnp.zeros((output_dim,), jnp.float32),
        "critic_w": _xavier_uniform(next(ks), (hidden_dim, 1)),
        "critic_b": jnp.zeros((1,), jnp.float32),
    }


# --------------------------------- main --------------------------------------

if __name__ == "__main__":
    B, T, HIDDEN, NUM_LAYERS, OUTPUT_DIM = 2, 8, 32, 2, 10
    root = jax.random.PRNGKey(0)
    k_param, k_enc, k_h, k_c, k_sample = jax.random.split(root, 5)

    params = init_params(k_param, OUTPUT_DIM, HIDDEN, NUM_LAYERS)
    encoder_outputs = jax.random.normal(k_enc, (B, T, HIDDEN), jnp.float32)
    encoder_hidden = (0.1 * jax.random.normal(k_h, (NUM_LAYERS, B, HIDDEN), jnp.float32),
                      0.1 * jax.random.normal(k_c, (NUM_LAYERS, B, HIDDEN), jnp.float32))

    # sampling path (actions=None -> Categorical sample via in-kernel Gumbel-max)
    actions, logits, values = decoder_network_forward(
        params, encoder_outputs, encoder_hidden, actions=None, rng=k_sample)
    jax.block_until_ready((actions, logits, values))

    assert actions.shape == (B, T)
    assert logits.shape == (B, T, OUTPUT_DIM)
    assert values.shape == (B, T)
    assert bool(jnp.all(jnp.isfinite(logits))) and bool(jnp.all(jnp.isfinite(values)))
    assert bool(jnp.all((actions >= 0) & (actions < OUTPUT_DIM)))
    assert bool(jnp.all(jnp.abs(jnp.sum(logits, axis=-1) - 1.0) < 1e-3))

    # teacher-forcing with the sampled actions sees the identical input sequence,
    # so it must reproduce the same logits/values (fused-kernel cross-check).
    a2, l2, v2 = decoder_network_forward(
        params, encoder_outputs, encoder_hidden, actions=actions, rng=None)
    jax.block_until_ready((a2, l2, v2))
    assert bool(jnp.all(a2 == actions))
    assert bool(jnp.all(jnp.abs(l2 - logits) < 1e-4))
    assert bool(jnp.all(jnp.abs(v2 - values) < 1e-4))

    print("KERNEL_OK")
</pallas_src>

<mosaic_0001>
module attributes {stable_mosaic.version = 11 : i64} {
  func.func @_decoder_kernel(%arg0: memref<8x2x128xf32, #tpu.memory_space<vmem>>, %arg1: memref<2x2x32xf32, #tpu.memory_space<vmem>>, %arg2: memref<2x2x32xf32, #tpu.memory_space<vmem>>, %arg3: memref<128x32xbf16, #tpu.memory_space<vmem>>, %arg4: memref<4x32xf32, #tpu.memory_space<vmem>>, %arg5: memref<2x64x128xbf16, #tpu.memory_space<vmem>>, %arg6: memref<2x128xf32, #tpu.memory_space<vmem>>, %arg7: memref<32x128xbf16, #tpu.memory_space<vmem>>, %arg8: memref<1x128xf32, #tpu.memory_space<vmem>>, %arg9: memref<2x8x128xf32, #tpu.memory_space<vmem>>) attributes {dimension_semantics = [], scalar_prefetch = 0 : i64, scratch_operands = 0 : i64, tpu.core_type = #tpu.core_type<tc>} {
    %c0 = arith.constant 0 : index
    %c0_0 = arith.constant 0 : index
    %0 = vector.load %arg3[%c0, %c0_0] : memref<128x32xbf16, #tpu.memory_space<vmem>>, vector<128x32xbf16>
    %c0_1 = arith.constant 0 : index
    %c0_2 = arith.constant 0 : index
    %c0_3 = arith.constant 0 : index
    %1 = vector.load %arg5[%c0_1, %c0_2, %c0_3] : memref<2x64x128xbf16, #tpu.memory_space<vmem>>, vector<2x64x128xbf16>
    %c0_4 = arith.constant 0 : index
    %c0_5 = arith.constant 0 : index
    %2 = vector.load %arg6[%c0_4, %c0_5] : memref<2x128xf32, #tpu.memory_space<vmem>>, vector<2x128xf32>
    %c0_6 = arith.constant 0 : index
    %c0_7 = arith.constant 0 : index
    %3 = vector.load %arg4[%c0_6, %c0_7] : memref<4x32xf32, #tpu.memory_space<vmem>>, vector<4x32xf32>
    %c0_8 = arith.constant 0 : index
    %c0_9 = arith.constant 0 : index
    %4 = vector.load %arg7[%c0_8, %c0_9] : memref<32x128xbf16, #tpu.memory_space<vmem>>, vector<32x128xbf16>
    %c0_10 = arith.constant 0 : index
    %c0_11 = arith.constant 0 : index
    %5 = vector.load %arg8[%c0_10, %c0_11] : memref<1x128xf32, #tpu.memory_space<vmem>>, vector<1x128xf32>
    %c0_12 = arith.constant 0 : index
    %c0_13 = arith.constant 0 : index
    %c0_14 = arith.constant 0 : index
    %6 = vector.load %arg0[%c0_12, %c0_13, %c0_14] : memref<8x2x128xf32, #tpu.memory_space<vmem>>, vector<8x2x128xf32>
    %c0_15 = arith.constant 0 : index
    %c0_16 = arith.constant 0 : index
    %c0_17 = arith.constant 0 : index
    %7 = vector.load %arg1[%c0_15, %c0_16, %c0_17] : memref<2x2x32xf32, #tpu.memory_space<vmem>>, vector<1x2x32xf32>
    %8 = vector.shape_cast %7 : vector<1x2x32xf32> to vector<2x32xf32>
    %c1 = arith.constant 1 : index
    %c0_18 = arith.constant 0 : index
    %c0_19 = arith.constant 0 : index
    %9 = vector.load %arg1[%c1, %c0_18, %c0_19] : memref<2x2x32xf32, #tpu.memory_space<vmem>>, vector<1x2x32xf32>
    %10 = vector.shape_cast %9 : vector<1x2x32xf32> to vector<2x32xf32>
    %c0_20 = arith.constant 0 : index
    %c0_21 = arith.constant 0 : index
    %c0_22 = arith.constant 0 : index
    %11 = vector.load %arg2[%c0_20, %c0_21, %c0_22] : memref<2x2x32xf32, #tpu.memory_space<vmem>>, vector<1x2x32xf32>
    %12 = vector.shape_cast %11 : vector<1x2x32xf32> to vector<2x32xf32>
    %c1_23 = arith.constant 1 : index
    %c0_24 = arith.constant 0 : index
    %c0_25 = arith.constant 0 : index
    %13 = vector.load %arg2[%c1_23, %c0_24, %c0_25] : memref<2x2x32xf32, #tpu.memory_space<vmem>>, vector<1x2x32xf32>
    %14 = vector.shape_cast %13 : vector<1x2x32xf32> to vector<2x32xf32>
    %15 = vector.extract_strided_slice %3 {offsets = [0, 0], sizes = [1, 32], strides = [1, 1]} : vector<4x32xf32> to vector<1x32xf32>
    %16 = vector.extract_strided_slice %3 {offsets = [1, 0], sizes = [1, 32], strides = [1, 1]} : vector<4x32xf32> to vector<1x32xf32>
    %17 = vector.extract_strided_slice %3 {offsets = [2, 0], sizes = [1, 32], strides = [1, 1]} : vector<4x32xf32> to vector<1x32xf32>
    %18 = vector.extract_strided_slice %3 {offsets = [3, 0], sizes = [1, 32], strides = [1, 1]} : vector<4x32xf32> to vector<1x32xf32>
    %19 = tpu.iota {dimensions = array<i32: 1>} : vector<2x128xi32>
    %20 = arith.sitofp %19 : vector<2x128xi32> to vector<2x128xf32>
    %c10_i32 = arith.constant 10 : i32
    %21 = vector.broadcast %c10_i32 : i32 to vector<2x128xi32>
    %22 = arith.cmpi slt, %19, %21 : vector<2x128xi32>
    %c0_i32 = arith.constant 0 : i32
    %23 = vector.broadcast %c0_i32 : i32 to vector<2x128xi32>
    %24 = arith.cmpi eq, %19, %23 : vector<2x128xi32>
    %25 = arith.extui %24 : vector<2x128xi1> to vector<2x128xi32>
    %26 = arith.sitofp %25 : vector<2x128xi32> to vector<2x128xf32>
    %27 = arith.truncf %26 : vector<2x128xf32> to vector<2x128xbf16>
    %cst = arith.constant dense<0.000000e+00> : vector<2x32xf32>
    %28 = tpu.matmul %27, %0, %cst {dimension_numbers = #tpu.dot_dimension_numbers<[1], [0], [0], [1], [0, 0, 1, 1], [], []>} : vector<2x128xbf16>, vector<128x32xbf16>, vector<2x32xf32> -> vector<2x32xf32>
    %cst_26 = arith.constant dense<0.000000e+00> : vector<2xf32>
    %29 = vector.multi_reduction <add>, %28, %cst_26 [1] : vector<2x32xf32> to vector<2xf32>
    %30 = vector.shape_cast %29 : vector<2xf32> to vector<2x1xf32>
    %cst_27 = arith.constant 3.200000e+01 : f32
    %31 = vector.broadcast %cst_27 : f32 to vector<2x1xf32>
    %32 = arith.divf %30, %31 : vector<2x1xf32>
    %33 = vector.broadcast %32 : vector<2x1xf32> to vector<2x32xf32>
    %34 = arith.subf %28, %33 : vector<2x32xf32>
    %35 = arith.mulf %34, %34 : vector<2x32xf32>
    %cst_28 = arith.constant dense<0.000000e+00> : vector<2xf32>
    %36 = vector.multi_reduction <add>, %35, %cst_28 [1] : vector<2x32xf32> to vector<2xf32>
    %37 = vector.shape_cast %36 : vector<2xf32> to vector<2x1xf32>
    %cst_29 = arith.constant 3.200000e+01 : f32
    %38 = vector.broadcast %cst_29 : f32 to vector<2x1xf32>
    %39 = arith.divf %37, %38 : vector<2x1xf32>
    %40 = vector.broadcast %32 : vector<2x1xf32> to vector<2x32xf32>
    %41 = arith.subf %28, %40 : vector<2x32xf32>
    %cst_30 = arith.constant 9.99999974E-6 : f32
    %42 = vector.broadcast %cst_30 : f32 to vector<2x1xf32>
    %43 = arith.addf %39, %42 : vector<2x1xf32>
    %44 = math.rsqrt %43 : vector<2x1xf32>
    %45 = vector.broadcast %44 : vector<2x1xf32> to vector<2x32xf32>
    %46 = arith.mulf %41, %45 : vector<2x32xf32>
    %47 = vector.broadcast %15 : vector<1x32xf32> to vector<2x32xf32>
    %48 = arith.mulf %46, %47 : vector<2x32xf32>
    %49 = vector.broadcast %16 : vector<1x32xf32> to vector<2x32xf32>
    %50 = arith.addf %48, %49 : vector<2x32xf32>
    %51 = tpu.concatenate %50, %8 in 1 : vector<2x32xf32>, vector<2x32xf32> -> vector<2x64xf32>
    %52 = arith.truncf %51 : vector<2x64xf32> to vector<2x64xbf16>
    %53 = vector.extract_strided_slice %1 {offsets = [0, 0, 0], sizes = [1, 64, 128], strides = [1, 1, 1]} : vector<2x64x128xbf16> to vector<1x64x128xbf16>
    %54 = vector.shape_cast %53 : vector<1x64x128xbf16> to vector<64x128xbf16>
    %cst_31 = arith.constant dense<0.000000e+00> : vector<2x128xf32>
    %55 = tpu.matmul %52, %54, %cst_31 {dimension_numbers = #tpu.dot_dimension_numbers<[1], [0], [0], [1], [0, 0, 1, 1], [], []>} : vector<2x64xbf16>, vector<64x128xbf16>, vector<2x128xf32> -> vector<2x128xf32>
    %56 = vector.extract_strided_slice %2 {offsets = [0, 0], sizes = [1, 128], strides = [1, 1]} : vector<2x128xf32> to vector<1x128xf32>
    %57 = vector.broadcast %56 : vector<1x128xf32> to vector<2x128xf32>
    %58 = arith.addf %55, %57 : vector<2x128xf32>
    %59 = arith.negf %58 : vector<2x128xf32>
    %60 = math.exp %59 : vector<2x128xf32>
    %cst_32 = arith.constant 1.000000e+00 : f32
    %61 = vector.broadcast %cst_32 : f32 to vector<2x128xf32>
    %62 = arith.addf %61, %60 : vector<2x128xf32>
    %63 = arith.divf %61, %62 : vector<2x128xf32>
    %64 = math.tanh %58 : vector<2x128xf32>
    %65 = vector.extract_strided_slice %63 {offsets = [0, 0], sizes = [2, 32], strides = [1, 1]} : vector<2x128xf32> to vector<2x32xf32>
    %66 = vector.extract_strided_slice %63 {offsets = [0, 32], sizes = [2, 32], strides = [1, 1]} : vector<2x128xf32> to vector<2x32xf32>
    %67 = vector.extract_strided_slice %64 {offsets = [0, 64], sizes = [2, 32], strides = [1, 1]} : vector<2x128xf32> to vector<2x32xf32>
    %68 = vector.extract_strided_slice %63 {offsets = [0, 96], sizes = [2, 32], strides = [1, 1]} : vector<2x128xf32> to vector<2x32xf32>
    %69 = arith.mulf %66, %12 : vector<2x32xf32>
    %70 = arith.mulf %65, %67 : vector<2x32xf32>
    %71 = arith.addf %69, %70 : vector<2x32xf32>
    %72 = math.tanh %71 : vector<2x32xf32>
    %73 = arith.mulf %68, %72 : vector<2x32xf32>
    %74 = tpu.concatenate %73, %10 in 1 : vector<2x32xf32>, vector<2x32xf32> -> vector<2x64xf32>
    %75 = arith.truncf %74 : vector<2x64xf32> to vector<2x64xbf16>
    %76 = vector.extract_strided_slice %1 {offsets = [1, 0, 0], sizes = [1, 64, 128], strides = [1, 1, 1]} : vector<2x64x128xbf16> to vector<1x64x128xbf16>
    %77 = vector.shape_cast %76 : vector<1x64x128xbf16> to vector<64x128xbf16>
    %cst_33 = arith.constant dense<0.000000e+00> : vector<2x128xf32>
    %78 = tpu.matmul %75, %77, %cst_33 {dimension_numbers = #tpu.dot_dimension_numbers<[1], [0], [0], [1], [0, 0, 1, 1], [], []>} : vector<2x64xbf16>, vector<64x128xbf16>, vector<2x128xf32> -> vector<2x128xf32>
    %79 = vector.extract_strided_slice %2 {offsets = [1, 0], sizes = [1, 128], strides = [1, 1]} : vector<2x128xf32> to vector<1x128xf32>
    %80 = vector.broadcast %79 : vector<1x128xf32> to vector<2x128xf32>
    %81 = arith.addf %78, %80 : vector<2x128xf32>
    %82 = arith.negf %81 : vector<2x128xf32>
    %83 = math.exp %82 : vector<2x128xf32>
    %cst_34 = arith.constant 1.000000e+00 : f32
    %84 = vector.broadcast %cst_34 : f32 to vector<2x128xf32>
    %85 = arith.addf %84, %83 : vector<2x128xf32>
    %86 = arith.divf %84, %85 : vector<2x128xf32>
    %87 = math.tanh %81 : vector<2x128xf32>
    %88 = vector.extract_strided_slice %86 {offsets = [0, 0], sizes = [2, 32], strides = [1, 1]} : vector<2x128xf32> to vector<2x32xf32>
    %89 = vector.extract_strided_slice %86 {offsets = [0, 32], sizes = [2, 32], strides = [1, 1]} : vector<2x128xf32> to vector<2x32xf32>
    %90 = vector.extract_strided_slice %87 {offsets = [0, 64], sizes = [2, 32], strides = [1, 1]} : vector<2x128xf32> to vector<2x32xf32>
    %91 = vector.extract_strided_slice %86 {offsets = [0, 96], sizes = [2, 32], strides = [1, 1]} : vector<2x128xf32> to vector<2x32xf32>
    %92 = arith.mulf %89, %14 : vector<2x32xf32>
    %93 = arith.mulf %88, %90 : vector<2x32xf32>
    %94 = arith.addf %92, %93 : vector<2x32xf32>
    %95 = math.tanh %94 : vector<2x32xf32>
    %96 = arith.mulf %91, %95 : vector<2x32xf32>
    %cst_35 = arith.constant dense<0.000000e+00> : vector<2xf32>
    %97 = vector.multi_reduction <add>, %96, %cst_35 [1] : vector<2x32xf32> to vector<2xf32>
    %98 = vector.shape_cast %97 : vector<2xf32> to vector<2x1xf32>
    %cst_36 = arith.constant 3.200000e+01 : f32
    %99 = vector.broadcast %cst_36 : f32 to vector<2x1xf32>
    %100 = arith.divf %98, %99 : vector<2x1xf32>
    %101 = vector.broadcast %100 : vector<2x1xf32> to vector<2x32xf32>
    %102 = arith.subf %96, %101 : vector<2x32xf32>
    %103 = arith.mulf %102, %102 : vector<2x32xf32>
    %cst_37 = arith.constant dense<0.000000e+00> : vector<2xf32>
    %104 = vector.multi_reduction <add>, %103, %cst_37 [1] : vector<2x32xf32> to vector<2xf32>
    %105 = vector.shape_cast %104 : vector<2xf32> to vector<2x1xf32>
    %cst_38 = arith.constant 3.200000e+01 : f32
    %106 = vector.broadcast %cst_38 : f32 to vector<2x1xf32>
    %107 = arith.divf %105, %106 : vector<2x1xf32>
    %108 = vector.broadcast %100 : vector<2x1xf32> to vector<2x32xf32>
    %109 = arith.subf %96, %108 : vector<2x32xf32>
    %cst_39 = arith.constant 9.99999974E-6 : f32
    %110 = vector.broadcast %cst_39 : f32 to vector<2x1xf32>
    %111 = arith.addf %107, %110 : vector<2x1xf32>
    %112 = math.rsqrt %111 : vector<2x1xf32>
    %113 = vector.broadcast %112 : vector<2x1xf32> to vector<2x32xf32>
    %114 = arith.mulf %109, %113 : vector<2x32xf32>
    %115 = vector.broadcast %17 : vector<1x32xf32> to vector<2x32xf32>
    %116 = arith.mulf %114, %115 : vector<2x32xf32>
    %117 = vector.broadcast %18 : vector<1x32xf32> to vector<2x32xf32>
    %118 = arith.addf %116, %117 : vector<2x32xf32>
    %119 = arith.truncf %118 : vector<2x32xf32> to vector<2x32xbf16>
    %cst_40 = arith.constant dense<0.000000e+00> : vector<2x128xf32>
    %120 = tpu.matmul %119, %4, %cst_40 {dimension_numbers = #tpu.dot_dimension_numbers<[1], [0], [0], [1], [0, 0, 1, 1], [], []>} : vector<2x32xbf16>, vector<32x128xbf16>, vector<2x128xf32> -> vector<2x128xf32>
    %121 = vector.broadcast %5 : vector<1x128xf32> to vector<2x128xf32>
    %122 = arith.addf %120, %121 : vector<2x128xf32>
    %123 = vector.extract_strided_slice %6 {offsets = [0, 0, 0], sizes = [1, 2, 128], strides = [1, 1, 1]} : vector<8x2x128xf32> to vector<1x2x128xf32>
    %124 = vector.shape_cast %123 : vector<1x2x128xf32> to vector<2x128xf32>
    %125 = arith.addf %122, %124 : vector<2x128xf32>
    %cst_41 = arith.constant -1.000000e+30 : f32
    %126 = vector.broadcast %cst_41 : f32 to vector<2x128xf32>
    %127 = arith.select %22, %125, %126 : vector<2x128xi1>, vector<2x128xf32>
    %cst_42 = arith.constant dense<0xFF800000> : vector<2xf32>
    %128 = vector.multi_reduction <maximumf>, %127, %cst_42 [1] : vector<2x128xf32> to vector<2xf32>
    %129 = vector.shape_cast %128 : vector<2xf32> to vector<2x1xf32>
    %130 = vector.broadcast %129 : vector<2x1xf32> to vector<2x128xf32>
    %131 = arith.cmpf oge, %127, %130 : vector<2x128xf32>
    %cst_43 = arith.constant 2.560000e+02 : f32
    %132 = vector.broadcast %cst_43 : f32 to vector<2x128xf32>
    %133 = arith.select %131, %20, %132 : vector<2x128xi1>, vector<2x128xf32>
    %cst_44 = arith.constant dense<0x7F800000> : vector<2xf32>
    %134 = vector.multi_reduction <minimumf>, %133, %cst_44 [1] : vector<2x128xf32> to vector<2xf32>
    %135 = vector.shape_cast %134 : vector<2xf32> to vector<2x1xf32>
    %136 = vector.broadcast %135 : vector<2x1xf32> to vector<2x128xf32>
    %137 = arith.cmpf oeq, %20, %136 : vector<2x128xf32>
    %138 = arith.extui %137 : vector<2x128xi1> to vector<2x128xi32>
    %139 = arith.sitofp %138 : vector<2x128xi32> to vector<2x128xf32>
    %140 = arith.truncf %139 : vector<2x128xf32> to vector<2x128xbf16>
    %cst_45 = arith.constant dense<0.000000e+00> : vector<2x32xf32>
    %141 = tpu.matmul %140, %0, %cst_45 {dimension_numbers = #tpu.dot_dimension_numbers<[1], [0], [0], [1], [0, 0, 1, 1], [], []>} : vector<2x128xbf16>, vector<128x32xbf16>, vector<2x32xf32> -> vector<2x32xf32>
    %cst_46 = arith.constant dense<0.000000e+00> : vector<2xf32>
    %142 = vector.multi_reduction <add>, %141, %cst_46 [1] : vector<2x32xf32> to vector<2xf32>
    %143 = vector.shape_cast %142 : vector<2xf32> to vector<2x1xf32>
    %cst_47 = arith.constant 3.200000e+01 : f32
    %144 = vector.broadcast %cst_47 : f32 to vector<2x1xf32>
    %145 = arith.divf %143, %144 : vector<2x1xf32>
    %146 = vector.broadcast %145 : vector<2x1xf32> to vector<2x32xf32>
    %147 = arith.subf %141, %146 : vector<2x32xf32>
    %148 = arith.mulf %147, %147 : vector<2x32xf32>
    %cst_48 = arith.constant dense<0.000000e+00> : vector<2xf32>
    %149 = vector.multi_reduction <add>, %148, %cst_48 [1] : vector<2x32xf32> to vector<2xf32>
    %150 = vector.shape_cast %149 : vector<2xf32> to vector<2x1xf32>
    %cst_49 = arith.constant 3.200000e+01 : f32
    %151 = vector.broadcast %cst_49 : f32 to vector<2x1xf32>
    %152 = arith.divf %150, %151 : vector<2x1xf32>
    %153 = vector.broadcast %145 : vector<2x1xf32> to vector<2x32xf32>
    %154 = arith.subf %141, %153 : vector<2x32xf32>
    %cst_50 = arith.constant 9.99999974E-6 : f32
    %155 = vector.broadcast %cst_50 : f32 to vector<2x1xf32>
    %156 = arith.addf %152, %155 : vector<2x1xf32>
    %157 = math.rsqrt %156 : vector<2x1xf32>
    %158 = vector.broadcast %157 : vector<2x1xf32> to vector<2x32xf32>
    %159 = arith.mulf %154, %158 : vector<2x32xf32>
    %160 = vector.broadcast %15 : vector<1x32xf32> to vector<2x32xf32>
    %161 = arith.mulf %159, %160 : vector<2x32xf32>
    %162 = vector.broadcast %16 : vector<1x32xf32> to vector<2x32xf32>
    %163 = arith.addf %161, %162 : vector<2x32xf32>
    %164 = tpu.concatenate %163, %73 in 1 : vector<2x32xf32>, vector<2x32xf32> -> vector<2x64xf32>
    %165 = arith.truncf %164 : vector<2x64xf32> to vector<2x64xbf16>
    %166 = vector.extract_strided_slice %1 {offsets = [0, 0, 0], sizes = [1, 64, 128], strides = [1, 1, 1]} : vector<2x64x128xbf16> to vector<1x64x128xbf16>
    %167 = vector.shape_cast %166 : vector<1x64x128xbf16> to vector<64x128xbf16>
    %cst_51 = arith.constant dense<0.000000e+00> : vector<2x128xf32>
    %168 = tpu.matmul %165, %167, %cst_51 {dimension_numbers = #tpu.dot_dimension_numbers<[1], [0], [0], [1], [0, 0, 1, 1], [], []>} : vector<2x64xbf16>, vector<64x128xbf16>, vector<2x128xf32> -> vector<2x128xf32>
    %169 = vector.extract_strided_slice %2 {offsets = [0, 0], sizes = [1, 128], strides = [1, 1]} : vector<2x128xf32> to vector<1x128xf32>
    %170 = vector.broadcast %169 : vector<1x128xf32> to vector<2x128xf32>
    %171 = arith.addf %168, %170 : vector<2x128xf32>
    %172 = arith.negf %171 : vector<2x128xf32>
    %173 = math.exp %172 : vector<2x128xf32>
    %cst_52 = arith.constant 1.000000e+00 : f32
    %174 = vector.broadcast %cst_52 : f32 to vector<2x128xf32>
    %175 = arith.addf %174, %173 : vector<2x128xf32>
    %176 = arith.divf %174, %175 : vector<2x128xf32>
    %177 = math.tanh %171 : vector<2x128xf32>
    %178 = vector.extract_strided_slice %176 {offsets = [0, 0], sizes = [2, 32], strides = [1, 1]} : vector<2x128xf32> to vector<2x32xf32>
    %179 = vector.extract_strided_slice %176 {offsets = [0, 32], sizes = [2, 32], strides = [1, 1]} : vector<2x128xf32> to vector<2x32xf32>
    %180 = vector.extract_strided_slice %177 {offsets = [0, 64], sizes = [2, 32], strides = [1, 1]} : vector<2x128xf32> to vector<2x32xf32>
    %181 = vector.extract_strided_slice %176 {offsets = [0, 96], sizes = [2, 32], strides = [1, 1]} : vector<2x128xf32> to vector<2x32xf32>
    %182 = arith.mulf %179, %71 : vector<2x32xf32>
    %183 = arith.mulf %178, %180 : vector<2x32xf32>
    %184 = arith.addf %182, %183 : vector<2x32xf32>
    %185 = math.tanh %184 : vector<2x32xf32>
    %186 = arith.mulf %181, %185 : vector<2x32xf32>
    %187 = tpu.concatenate %186, %96 in 1 : vector<2x32xf32>, vector<2x32xf32> -> vector<2x64xf32>
    %188 = arith.truncf %187 : vector<2x64xf32> to vector<2x64xbf16>
    %189 = vector.extract_strided_slice %1 {offsets = [1, 0, 0], sizes = [1, 64, 128], strides = [1, 1, 1]} : vector<2x64x128xbf16> to vector<1x64x128xbf16>
    %190 = vector.shape_cast %189 : vector<1x64x128xbf16> to vector<64x128xbf16>
    %cst_53 = arith.constant dense<0.000000e+00> : vector<2x128xf32>
    %191 = tpu.matmul %188, %190, %cst_53 {dimension_numbers = #tpu.dot_dimension_numbers<[1], [0], [0], [1], [0, 0, 1, 1], [], []>} : vector<2x64xbf16>, vector<64x128xbf16>, vector<2x128xf32> -> vector<2x128xf32>
    %192 = vector.extract_strided_slice %2 {offsets = [1, 0], sizes = [1, 128], strides = [1, 1]} : vector<2x128xf32> to vector<1x128xf32>
    %193 = vector.broadcast %192 : vector<1x128xf32> to vector<2x128xf32>
    %194 = arith.addf %191, %193 : vector<2x128xf32>
    %195 = arith.negf %194 : vector<2x128xf32>
    %196 = math.exp %195 : vector<2x128xf32>
    %cst_54 = arith.constant 1.000000e+00 : f32
    %197 = vector.broadcast %cst_54 : f32 to vector<2x128xf32>
    %198 = arith.addf %197, %196 : vector<2x128xf32>
    %199 = arith.divf %197, %198 : vector<2x128xf32>
    %200 = math.tanh %194 : vector<2x128xf32>
    %201 = vector.extract_strided_slice %199 {offsets = [0, 0], sizes = [2, 32], strides = [1, 1]} : vector<2x128xf32> to vector<2x32xf32>
    %202 = vector.extract_strided_slice %199 {offsets = [0, 32], sizes = [2, 32], strides = [1, 1]} : vector<2x128xf32> to vector<2x32xf32>
    %203 = vector.extract_strided_slice %200 {offsets = [0, 64], sizes = [2, 32], strides = [1, 1]} : vector<2x128xf32> to vector<2x32xf32>
    %204 = vector.extract_strided_slice %199 {offsets = [0, 96], sizes = [2, 32], strides = [1, 1]} : vector<2x128xf32> to vector<2x32xf32>
    %205 = arith.mulf %202, %94 : vector<2x32xf32>
    %206 = arith.mulf %201, %203 : vector<2x32xf32>
    %207 = arith.addf %205, %206 : vector<2x32xf32>
    %208 = math.tanh %207 : vector<2x32xf32>
    %209 = arith.mulf %204, %208 : vector<2x32xf32>
    %cst_55 = arith.constant dense<0.000000e+00> : vector<2xf32>
    %210 = vector.multi_reduction <add>, %209, %cst_55 [1] : vector<2x32xf32> to vector<2xf32>
    %211 = vector.shape_cast %210 : vector<2xf32> to vector<2x1xf32>
    %cst_56 = arith.constant 3.200000e+01 : f32
    %212 = vector.broadcast %cst_56 : f32 to vector<2x1xf32>
    %213 = arith.divf %211, %212 : vector<2x1xf32>
    %214 = vector.broadcast %213 : vector<2x1xf32> to vector<2x32xf32>
    %215 = arith.subf %209, %214 : vector<2x32xf32>
    %216 = arith.mulf %215, %215 : vector<2x32xf32>
    %cst_57 = arith.constant dense<0.000000e+00> : vector<2xf32>
    %217 = vector.multi_reduction <add>, %216, %cst_57 [1] : vector<2x32xf32> to vector<2xf32>
    %218 = vector.shape_cast %217 : vector<2xf32> to vector<2x1xf32>
    %cst_58 = arith.constant 3.200000e+01 : f32
    %219 = vector.broadcast %cst_58 : f32 to vector<2x1xf32>
    %220 = arith.divf %218, %219 : vector<2x1xf32>
    %221 = vector.broadcast %213 : vector<2x1xf32> to vector<2x32xf32>
    %222 = arith.subf %209, %221 : vector<2x32xf32>
    %cst_59 = arith.constant 9.99999974E-6 : f32
    %223 = vector.broadcast %cst_59 : f32 to vector<2x1xf32>
    %224 = arith.addf %220, %223 : vector<2x1xf32>
    %225 = math.rsqrt %224 : vector<2x1xf32>
    %226 = vector.broadcast %225 : vector<2x1xf32> to vector<2x32xf32>
    %227 = arith.mulf %222, %226 : vector<2x32xf32>
    %228 = vector.broadcast %17 : vector<1x32xf32> to vector<2x32xf32>
    %229 = arith.mulf %227, %228 : vector<2x32xf32>
    %230 = vector.broadcast %18 : vector<1x32xf32> to vector<2x32xf32>
    %231 = arith.addf %229, %230 : vector<2x32xf32>
    %232 = arith.truncf %231 : vector<2x32xf32> to vector<2x32xbf16>
    %cst_60 = arith.constant dense<0.000000e+00> : vector<2x128xf32>
    %233 = tpu.matmul %232, %4, %cst_60 {dimension_numbers = #tpu.dot_dimension_numbers<[1], [0], [0], [1], [0, 0, 1, 1], [], []>} : vector<2x32xbf16>, vector<32x128xbf16>, vector<2x128xf32> -> vector<2x128xf32>
    %234 = vector.broadcast %5 : vector<1x128xf32> to vector<2x128xf32>
    %235 = arith.addf %233, %234 : vector<2x128xf32>
    %236 = vector.extract_strided_slice %6 {offsets = [1, 0, 0], sizes = [1, 2, 128], strides = [1, 1, 1]} : vector<8x2x128xf32> to vector<1x2x128xf32>
    %237 = vector.shape_cast %236 : vector<1x2x128xf32> to vector<2x128xf32>
    %238 = arith.addf %235, %237 : vector<2x128xf32>
    %cst_61 = arith.constant -1.000000e+30 : f32
    %239 = vector.broadcast %cst_61 : f32 to vector<2x128xf32>
    %240 = arith.select %22, %238, %239 : vector<2x128xi1>, vector<2x128xf32>
    %cst_62 = arith.constant dense<0xFF800000> : vector<2xf32>
    %241 = vector.multi_reduction <maximumf>, %240, %cst_62 [1] : vector<2x128xf32> to vector<2xf32>
    %242 = vector.shape_cast %241 : vector<2xf32> to vector<2x1xf32>
    %243 = vector.broadcast %242 : vector<2x1xf32> to vector<2x128xf32>
    %244 = arith.cmpf oge, %240, %243 : vector<2x128xf32>
    %cst_63 = arith.constant 2.560000e+02 : f32
    %245 = vector.broadcast %cst_63 : f32 to vector<2x128xf32>
    %246 = arith.select %244, %20, %245 : vector<2x128xi1>, vector<2x128xf32>
    %cst_64 = arith.constant dense<0x7F800000> : vector<2xf32>
    %247 = vector.multi_reduction <minimumf>, %246, %cst_64 [1] : vector<2x128xf32> to vector<2xf32>
    %248 = vector.shape_cast %247 : vector<2xf32> to vector<2x1xf32>
    %249 = vector.broadcast %248 : vector<2x1xf32> to vector<2x128xf32>
    %250 = arith.cmpf oeq, %20, %249 : vector<2x128xf32>
    %251 = arith.extui %250 : vector<2x128xi1> to vector<2x128xi32>
    %252 = arith.sitofp %251 : vector<2x128xi32> to vector<2x128xf32>
    %253 = arith.truncf %252 : vector<2x128xf32> to vector<2x128xbf16>
    %cst_65 = arith.constant dense<0.000000e+00> : vector<2x32xf32>
    %254 = tpu.matmul %253, %0, %cst_65 {dimension_numbers = #tpu.dot_dimension_numbers<[1], [0], [0], [1], [0, 0, 1, 1], [], []>} : vector<2x128xbf16>, vector<128x32xbf16>, vector<2x32xf32> -> vector<2x32xf32>
    %cst_66 = arith.constant dense<0.000000e+00> : vector<2xf32>
    %255 = vector.multi_reduction <add>, %254, %cst_66 [1] : vector<2x32xf32> to vector<2xf32>
    %256 = vector.shape_cast %255 : vector<2xf32> to vector<2x1xf32>
    %cst_67 = arith.constant 3.200000e+01 : f32
    %257 = vector.broadcast %cst_67 : f32 to vector<2x1xf32>
    %258 = arith.divf %256, %257 : vector<2x1xf32>
    %259 = vector.broadcast %258 : vector<2x1xf32> to vector<2x32xf32>
    %260 = arith.subf %254, %259 : vector<2x32xf32>
    %261 = arith.mulf %260, %260 : vector<2x32xf32>
    %cst_68 = arith.constant dense<0.000000e+00> : vector<2xf32>
    %262 = vector.multi_reduction <add>, %261, %cst_68 [1] : vector<2x32xf32> to vector<2xf32>
    %263 = vector.shape_cast %262 : vector<2xf32> to vector<2x1xf32>
    %cst_69 = arith.constant 3.200000e+01 : f32
    %264 = vector.broadcast %cst_69 : f32 to vector<2x1xf32>
    %265 = arith.divf %263, %264 : vector<2x1xf32>
    %266 = vector.broadcast %258 : vector<2x1xf32> to vector<2x32xf32>
    %267 = arith.subf %254, %266 : vector<2x32xf32>
    %cst_70 = arith.constant 9.99999974E-6 : f32
    %268 = vector.broadcast %cst_70 : f32 to vector<2x1xf32>
    %269 = arith.addf %265, %268 : vector<2x1xf32>
    %270 = math.rsqrt %269 : vector<2x1xf32>
    %271 = vector.broadcast %270 : vector<2x1xf32> to vector<2x32xf32>
    %272 = arith.mulf %267, %271 : vector<2x32xf32>
    %273 = vector.broadcast %15 : vector<1x32xf32> to vector<2x32xf32>
    %274 = arith.mulf %272, %273 : vector<2x32xf32>
    %275 = vector.broadcast %16 : vector<1x32xf32> to vector<2x32xf32>
    %276 = arith.addf %274, %275 : vector<2x32xf32>
    %277 = tpu.concatenate %276, %186 in 1 : vector<2x32xf32>, vector<2x32xf32> -> vector<2x64xf32>
    %278 = arith.truncf %277 : vector<2x64xf32> to vector<2x64xbf16>
    %279 = vector.extract_strided_slice %1 {offsets = [0, 0, 0], sizes = [1, 64, 128], strides = [1, 1, 1]} : vector<2x64x128xbf16> to vector<1x64x128xbf16>
    %280 = vector.shape_cast %279 : vector<1x64x128xbf16> to vector<64x128xbf16>
    %cst_71 = arith.constant dense<0.000000e+00> : vector<2x128xf32>
    %281 = tpu.matmul %278, %280, %cst_71 {dimension_numbers = #tpu.dot_dimension_numbers<[1], [0], [0], [1], [0, 0, 1, 1], [], []>} : vector<2x64xbf16>, vector<64x128xbf16>, vector<2x128xf32> -> vector<2x128xf32>
    %282 = vector.extract_strided_slice %2 {offsets = [0, 0], sizes = [1, 128], strides = [1, 1]} : vector<2x128xf32> to vector<1x128xf32>
    %283 = vector.broadcast %282 : vector<1x128xf32> to vector<2x128xf32>
    %284 = arith.addf %281, %283 : vector<2x128xf32>
    %285 = arith.negf %284 : vector<2x128xf32>
    %286 = math.exp %285 : vector<2x128xf32>
    %cst_72 = arith.constant 1.000000e+00 : f32
    %287 = vector.broadcast %cst_72 : f32 to vector<2x128xf32>
    %288 = arith.addf %287, %286 : vector<2x128xf32>
    %289 = arith.divf %287, %288 : vector<2x128xf32>
    %290 = math.tanh %284 : vector<2x128xf32>
    %291 = vector.extract_strided_slice %289 {offsets = [0, 0], sizes = [2, 32], strides = [1, 1]} : vector<2x128xf32> to vector<2x32xf32>
    %292 = vector.extract_strided_slice %289 {offsets = [0, 32], sizes = [2, 32], strides = [1, 1]} : vector<2x128xf32> to vector<2x32xf32>
    %293 = vector.extract_strided_slice %290 {offsets = [0, 64], sizes = [2, 32], strides = [1, 1]} : vector<2x128xf32> to vector<2x32xf32>
    %294 = vector.extract_strided_slice %289 {offsets = [0, 96], sizes = [2, 32], strides = [1, 1]} : vector<2x128xf32> to vector<2x32xf32>
    %295 = arith.mulf %292, %184 : vector<2x32xf32>
    %296 = arith.mulf %291, %293 : vector<2x32xf32>
    %297 = arith.addf %295, %296 : vector<2x32xf32>
    %298 = math.tanh %297 : vector<2x32xf32>
    %299 = arith.mulf %294, %298 : vector<2x32xf32>
    %300 = tpu.concatenate %299, %209 in 1 : vector<2x32xf32>, vector<2x32xf32> -> vector<2x64xf32>
    %301 = arith.truncf %300 : vector<2x64xf32> to vector<2x64xbf16>
    %302 = vector.extract_strided_slice %1 {offsets = [1, 0, 0], sizes = [1, 64, 128], strides = [1, 1, 1]} : vector<2x64x128xbf16> to vector<1x64x128xbf16>
    %303 = vector.shape_cast %302 : vector<1x64x128xbf16> to vector<64x128xbf16>
    %cst_73 = arith.constant dense<0.000000e+00> : vector<2x128xf32>
    %304 = tpu.matmul %301, %303, %cst_73 {dimension_numbers = #tpu.dot_dimension_numbers<[1], [0], [0], [1], [0, 0, 1, 1], [], []>} : vector<2x64xbf16>, vector<64x128xbf16>, vector<2x128xf32> -> vector<2x128xf32>
    %305 = vector.extract_strided_slice %2 {offsets = [1, 0], sizes = [1, 128], strides = [1, 1]} : vector<2x128xf32> to vector<1x128xf32>
    %306 = vector.broadcast %305 : vector<1x128xf32> to vector<2x128xf32>
    %307 = arith.addf %304, %306 : vector<2x128xf32>
    %308 = arith.negf %307 : vector<2x128xf32>
    %309 = math.exp %308 : vector<2x128xf32>
    %cst_74 = arith.constant 1.000000e+00 : f32
    %310 = vector.broadcast %cst_74 : f32 to vector<2x128xf32>
    %311 = arith.addf %310, %309 : vector<2x128xf32>
    %312 = arith.divf %310, %311 : vector<2x128xf32>
    %313 = math.tanh %307 : vector<2x128xf32>
    %314 = vector.extract_strided_slice %312 {offsets = [0, 0], sizes = [2, 32], strides = [1, 1]} : vector<2x128xf32> to vector<2x32xf32>
    %315 = vector.extract_strided_slice %312 {offsets = [0, 32], sizes = [2, 32], strides = [1, 1]} : vector<2x128xf32> to vector<2x32xf32>
    %316 = vector.extract_strided_slice %313 {offsets = [0, 64], sizes = [2, 32], strides = [1, 1]} : vector<2x128xf32> to vector<2x32xf32>
    %317 = vector.extract_strided_slice %312 {offsets = [0, 96], sizes = [2, 32], strides = [1, 1]} : vector<2x128xf32> to vector<2x32xf32>
    %318 = arith.mulf %315, %207 : vector<2x32xf32>
    %319 = arith.mulf %314, %316 : vector<2x32xf32>
    %320 = arith.addf %318, %319 : vector<2x32xf32>
    %321 = math.tanh %320 : vector<2x32xf32>
    %322 = arith.mulf %317, %321 : vector<2x32xf32>
    %cst_75 = arith.constant dense<0.000000e+00> : vector<2xf32>
    %323 = vector.multi_reduction <add>, %322, %cst_75 [1] : vector<2x32xf32> to vector<2xf32>
    %324 = vector.shape_cast %323 : vector<2xf32> to vector<2x1xf32>
    %cst_76 = arith.constant 3.200000e+01 : f32
    %325 = vector.broadcast %cst_76 : f32 to vector<2x1xf32>
    %326 = arith.divf %324, %325 : vector<2x1xf32>
    %327 = vector.broadcast %326 : vector<2x1xf32> to vector<2x32xf32>
    %328 = arith.subf %322, %327 : vector<2x32xf32>
    %329 = arith.mulf %328, %328 : vector<2x32xf32>
    %cst_77 = arith.constant dense<0.000000e+00> : vector<2xf32>
    %330 = vector.multi_reduction <add>, %329, %cst_77 [1] : vector<2x32xf32> to vector<2xf32>
    %331 = vector.shape_cast %330 : vector<2xf32> to vector<2x1xf32>
    %cst_78 = arith.constant 3.200000e+01 : f32
    %332 = vector.broadcast %cst_78 : f32 to vector<2x1xf32>
    %333 = arith.divf %331, %332 : vector<2x1xf32>
    %334 = vector.broadcast %326 : vector<2x1xf32> to vector<2x32xf32>
    %335 = arith.subf %322, %334 : vector<2x32xf32>
    %cst_79 = arith.constant 9.99999974E-6 : f32
    %336 = vector.broadcast %cst_79 : f32 to vector<2x1xf32>
    %337 = arith.addf %333, %336 : vector<2x1xf32>
    %338 = math.rsqrt %337 : vector<2x1xf32>
    %339 = vector.broadcast %338 : vector<2x1xf32> to vector<2x32xf32>
    %340 = arith.mulf %335, %339 : vector<2x32xf32>
    %341 = vector.broadcast %17 : vector<1x32xf32> to vector<2x32xf32>
    %342 = arith.mulf %340, %341 : vector<2x32xf32>
    %343 = vector.broadcast %18 : vector<1x32xf32> to vector<2x32xf32>
    %344 = arith.addf %342, %343 : vector<2x32xf32>
    %345 = arith.truncf %344 : vector<2x32xf32> to vector<2x32xbf16>
    %cst_80 = arith.constant dense<0.000000e+00> : vector<2x128xf32>
    %346 = tpu.matmul %345, %4, %cst_80 {dimension_numbers = #tpu.dot_dimension_numbers<[1], [0], [0], [1], [0, 0, 1, 1], [], []>} : vector<2x32xbf16>, vector<32x128xbf16>, vector<2x128xf32> -> vector<2x128xf32>
    %347 = vector.broadcast %5 : vector<1x128xf32> to vector<2x128xf32>
    %348 = arith.addf %346, %347 : vector<2x128xf32>
    %349 = vector.extract_strided_slice %6 {offsets = [2, 0, 0], sizes = [1, 2, 128], strides = [1, 1, 1]} : vector<8x2x128xf32> to vector<1x2x128xf32>
    %350 = vector.shape_cast %349 : vector<1x2x128xf32> to vector<2x128xf32>
    %351 = arith.addf %348, %350 : vector<2x128xf32>
    %cst_81 = arith.constant -1.000000e+30 : f32
    %352 = vector.broadcast %cst_81 : f32 to vector<2x128xf32>
    %353 = arith.select %22, %351, %352 : vector<2x128xi1>, vector<2x128xf32>
    %cst_82 = arith.constant dense<0xFF800000> : vector<2xf32>
    %354 = vector.multi_reduction <maximumf>, %353, %cst_82 [1] : vector<2x128xf32> to vector<2xf32>
    %355 = vector.shape_cast %354 : vector<2xf32> to vector<2x1xf32>
    %356 = vector.broadcast %355 : vector<2x1xf32> to vector<2x128xf32>
    %357 = arith.cmpf oge, %353, %356 : vector<2x128xf32>
    %cst_83 = arith.constant 2.560000e+02 : f32
    %358 = vector.broadcast %cst_83 : f32 to vector<2x128xf32>
    %359 = arith.select %357, %20, %358 : vector<2x128xi1>, vector<2x128xf32>
    %cst_84 = arith.constant dense<0x7F800000> : vector<2xf32>
    %360 = vector.multi_reduction <minimumf>, %359, %cst_84 [1] : vector<2x128xf32> to vector<2xf32>
    %361 = vector.shape_cast %360 : vector<2xf32> to vector<2x1xf32>
    %362 = vector.broadcast %361 : vector<2x1xf32> to vector<2x128xf32>
    %363 = arith.cmpf oeq, %20, %362 : vector<2x128xf32>
    %364 = arith.extui %363 : vector<2x128xi1> to vector<2x128xi32>
    %365 = arith.sitofp %364 : vector<2x128xi32> to vector<2x128xf32>
    %366 = arith.truncf %365 : vector<2x128xf32> to vector<2x128xbf16>
    %cst_85 = arith.constant dense<0.000000e+00> : vector<2x32xf32>
    %367 = tpu.matmul %366, %0, %cst_85 {dimension_numbers = #tpu.dot_dimension_numbers<[1], [0], [0], [1], [0, 0, 1, 1], [], []>} : vector<2x128xbf16>, vector<128x32xbf16>, vector<2x32xf32> -> vector<2x32xf32>
    %cst_86 = arith.constant dense<0.000000e+00> : vector<2xf32>
    %368 = vector.multi_reduction <add>, %367, %cst_86 [1] : vector<2x32xf32> to vector<2xf32>
    %369 = vector.shape_cast %368 : vector<2xf32> to vector<2x1xf32>
    %cst_87 = arith.constant 3.200000e+01 : f32
    %370 = vector.broadcast %cst_87 : f32 to vector<2x1xf32>
    %371 = arith.divf %369, %370 : vector<2x1xf32>
    %372 = vector.broadcast %371 : vector<2x1xf32> to vector<2x32xf32>
    %373 = arith.subf %367, %372 : vector<2x32xf32>
    %374 = arith.mulf %373, %373 : vector<2x32xf32>
    %cst_88 = arith.constant dense<0.000000e+00> : vector<2xf32>
    %375 = vector.multi_reduction <add>, %374, %cst_88 [1] : vector<2x32xf32> to vector<2xf32>
    %376 = vector.shape_cast %375 : vector<2xf32> to vector<2x1xf32>
    %cst_89 = arith.constant 3.200000e+01 : f32
    %377 = vector.broadcast %cst_89 : f32 to vector<2x1xf32>
    %378 = arith.divf %376, %377 : vector<2x1xf32>
    %379 = vector.broadcast %371 : vector<2x1xf32> to vector<2x32xf32>
    %380 = arith.subf %367, %379 : vector<2x32xf32>
    %cst_90 = arith.constant 9.99999974E-6 : f32
    %381 = vector.broadcast %cst_90 : f32 to vector<2x1xf32>
    %382 = arith.addf %378, %381 : vector<2x1xf32>
    %383 = math.rsqrt %382 : vector<2x1xf32>
    %384 = vector.broadcast %383 : vector<2x1xf32> to vector<2x32xf32>
    %385 = arith.mulf %380, %384 : vector<2x32xf32>
    %386 = vector.broadcast %15 : vector<1x32xf32> to vector<2x32xf32>
    %387 = arith.mulf %385, %386 : vector<2x32xf32>
    %388 = vector.broadcast %16 : vector<1x32xf32> to vector<2x32xf32>
    %389 = arith.addf %387, %388 : vector<2x32xf32>
    %390 = tpu.concatenate %389, %299 in 1 : vector<2x32xf32>, vector<2x32xf32> -> vector<2x64xf32>
    %391 = arith.truncf %390 : vector<2x64xf32> to vector<2x64xbf16>
    %392 = vector.extract_strided_slice %1 {offsets = [0, 0, 0], sizes = [1, 64, 128], strides = [1, 1, 1]} : vector<2x64x128xbf16> to vector<1x64x128xbf16>
    %393 = vector.shape_cast %392 : vector<1x64x128xbf16> to vector<64x128xbf16>
    %cst_91 = arith.constant dense<0.000000e+00> : vector<2x128xf32>
    %394 = tpu.matmul %391, %393, %cst_91 {dimension_numbers = #tpu.dot_dimension_numbers<[1], [0], [0], [1], [0, 0, 1, 1], [], []>} : vector<2x64xbf16>, vector<64x128xbf16>, vector<2x128xf32> -> vector<2x128xf32>
    %395 = vector.extract_strided_slice %2 {offsets = [0, 0], sizes = [1, 128], strides = [1, 1]} : vector<2x128xf32> to vector<1x128xf32>
    %396 = vector.broadcast %395 : vector<1x128xf32> to vector<2x128xf32>
    %397 = arith.addf %394, %396 : vector<2x128xf32>
    %398 = arith.negf %397 : vector<2x128xf32>
    %399 = math.exp %398 : vector<2x128xf32>
    %cst_92 = arith.constant 1.000000e+00 : f32
    %400 = vector.broadcast %cst_92 : f32 to vector<2x128xf32>
    %401 = arith.addf %400, %399 : vector<2x128xf32>
    %402 = arith.divf %400, %401 : vector<2x128xf32>
    %403 = math.tanh %397 : vector<2x128xf32>
    %404 = vector.extract_strided_slice %402 {offsets = [0, 0], sizes = [2, 32], strides = [1, 1]} : vector<2x128xf32> to vector<2x32xf32>
    %405 = vector.extract_strided_slice %402 {offsets = [0, 32], sizes = [2, 32], strides = [1, 1]} : vector<2x128xf32> to vector<2x32xf32>
    %406 = vector.extract_strided_slice %403 {offsets = [0, 64], sizes = [2, 32], strides = [1, 1]} : vector<2x128xf32> to vector<2x32xf32>
    %407 = vector.extract_strided_slice %402 {offsets = [0, 96], sizes = [2, 32], strides = [1, 1]} : vector<2x128xf32> to vector<2x32xf32>
    %408 = arith.mulf %405, %297 : vector<2x32xf32>
    %409 = arith.mulf %404, %406 : vector<2x32xf32>
    %410 = arith.addf %408, %409 : vector<2x32xf32>
    %411 = math.tanh %410 : vector<2x32xf32>
    %412 = arith.mulf %407, %411 : vector<2x32xf32>
    %413 = tpu.concatenate %412, %322 in 1 : vector<2x32xf32>, vector<2x32xf32> -> vector<2x64xf32>
    %414 = arith.truncf %413 : vector<2x64xf32> to vector<2x64xbf16>
    %415 = vector.extract_strided_slice %1 {offsets = [1, 0, 0], sizes = [1, 64, 128], strides = [1, 1, 1]} : vector<2x64x128xbf16> to vector<1x64x128xbf16>
    %416 = vector.shape_cast %415 : vector<1x64x128xbf16> to vector<64x128xbf16>
    %cst_93 = arith.constant dense<0.000000e+00> : vector<2x128xf32>
    %417 = tpu.matmul %414, %416, %cst_93 {dimension_numbers = #tpu.dot_dimension_numbers<[1], [0], [0], [1], [0, 0, 1, 1], [], []>} : vector<2x64xbf16>, vector<64x128xbf16>, vector<2x128xf32> -> vector<2x128xf32>
    %418 = vector.extract_strided_slice %2 {offsets = [1, 0], sizes = [1, 128], strides = [1, 1]} : vector<2x128xf32> to vector<1x128xf32>
    %419 = vector.broadcast %418 : vector<1x128xf32> to vector<2x128xf32>
    %420 = arith.addf %417, %419 : vector<2x128xf32>
    %421 = arith.negf %420 : vector<2x128xf32>
    %422 = math.exp %421 : vector<2x128xf32>
    %cst_94 = arith.constant 1.000000e+00 : f32
    %423 = vector.broadcast %cst_94 : f32 to vector<2x128xf32>
    %424 = arith.addf %423, %422 : vector<2x128xf32>
    %425 = arith.divf %423, %424 : vector<2x128xf32>
    %426 = math.tanh %420 : vector<2x128xf32>
    %427 = vector.extract_strided_slice %425 {offsets = [0, 0], sizes = [2, 32], strides = [1, 1]} : vector<2x128xf32> to vector<2x32xf32>
    %428 = vector.extract_strided_slice %425 {offsets = [0, 32], sizes = [2, 32], strides = [1, 1]} : vector<2x128xf32> to vector<2x32xf32>
    %429 = vector.extract_strided_slice %426 {offsets = [0, 64], sizes = [2, 32], strides = [1, 1]} : vector<2x128xf32> to vector<2x32xf32>
    %430 = vector.extract_strided_slice %425 {offsets = [0, 96], sizes = [2, 32], strides = [1, 1]} : vector<2x128xf32> to vector<2x32xf32>
    %431 = arith.mulf %428, %320 : vector<2x32xf32>
    %432 = arith.mulf %427, %429 : vector<2x32xf32>
    %433 = arith.addf %431, %432 : vector<2x32xf32>
    %434 = math.tanh %433 : vector<2x32xf32>
    %435 = arith.mulf %430, %434 : vector<2x32xf32>
    %cst_95 = arith.constant dense<0.000000e+00> : vector<2xf32>
    %436 = vector.multi_reduction <add>, %435, %cst_95 [1] : vector<2x32xf32> to vector<2xf32>
    %437 = vector.shape_cast %436 : vector<2xf32> to vector<2x1xf32>
    %cst_96 = arith.constant 3.200000e+01 : f32
    %438 = vector.broadcast %cst_96 : f32 to vector<2x1xf32>
    %439 = arith.divf %437, %438 : vector<2x1xf32>
    %440 = vector.broadcast %439 : vector<2x1xf32> to vector<2x32xf32>
    %441 = arith.subf %435, %440 : vector<2x32xf32>
    %442 = arith.mulf %441, %441 : vector<2x32xf32>
    %cst_97 = arith.constant dense<0.000000e+00> : vector<2xf32>
    %443 = vector.multi_reduction <add>, %442, %cst_97 [1] : vector<2x32xf32> to vector<2xf32>
    %444 = vector.shape_cast %443 : vector<2xf32> to vector<2x1xf32>
    %cst_98 = arith.constant 3.200000e+01 : f32
    %445 = vector.broadcast %cst_98 : f32 to vector<2x1xf32>
    %446 = arith.divf %444, %445 : vector<2x1xf32>
    %447 = vector.broadcast %439 : vector<2x1xf32> to vector<2x32xf32>
    %448 = arith.subf %435, %447 : vector<2x32xf32>
    %cst_99 = arith.constant 9.99999974E-6 : f32
    %449 = vector.broadcast %cst_99 : f32 to vector<2x1xf32>
    %450 = arith.addf %446, %449 : vector<2x1xf32>
    %451 = math.rsqrt %450 : vector<2x1xf32>
    %452 = vector.broadcast %451 : vector<2x1xf32> to vector<2x32xf32>
    %453 = arith.mulf %448, %452 : vector<2x32xf32>
    %454 = vector.broadcast %17 : vector<1x32xf32> to vector<2x32xf32>
    %455 = arith.mulf %453, %454 : vector<2x32xf32>
    %456 = vector.broadcast %18 : vector<1x32xf32> to vector<2x32xf32>
    %457 = arith.addf %455, %456 : vector<2x32xf32>
    %458 = arith.truncf %457 : vector<2x32xf32> to vector<2x32xbf16>
    %cst_100 = arith.constant dense<0.000000e+00> : vector<2x128xf32>
    %459 = tpu.matmul %458, %4, %cst_100 {dimension_numbers = #tpu.dot_dimension_numbers<[1], [0], [0], [1], [0, 0, 1, 1], [], []>} : vector<2x32xbf16>, vector<32x128xbf16>, vector<2x128xf32> -> vector<2x128xf32>
    %460 = vector.broadcast %5 : vector<1x128xf32> to vector<2x128xf32>
    %461 = arith.addf %459, %460 : vector<2x128xf32>
    %462 = vector.extract_strided_slice %6 {offsets = [3, 0, 0], sizes = [1, 2, 128], strides = [1, 1, 1]} : vector<8x2x128xf32> to vector<1x2x128xf32>
    %463 = vector.shape_cast %462 : vector<1x2x128xf32> to vector<2x128xf32>
    %464 = arith.addf %461, %463 : vector<2x128xf32>
    %cst_101 = arith.constant -1.000000e+30 : f32
    %465 = vector.broadcast %cst_101 : f32 to vector<2x128xf32>
    %466 = arith.select %22, %464, %465 : vector<2x128xi1>, vector<2x128xf32>
    %cst_102 = arith.constant dense<0xFF800000> : vector<2xf32>
    %467 = vector.multi_reduction <maximumf>, %466, %cst_102 [1] : vector<2x128xf32> to vector<2xf32>
    %468 = vector.shape_cast %467 : vector<2xf32> to vector<2x1xf32>
    %469 = vector.broadcast %468 : vector<2x1xf32> to vector<2x128xf32>
    %470 = arith.cmpf oge, %466, %469 : vector<2x128xf32>
    %cst_103 = arith.constant 2.560000e+02 : f32
    %471 = vector.broadcast %cst_103 : f32 to vector<2x128xf32>
    %472 = arith.select %470, %20, %471 : vector<2x128xi1>, vector<2x128xf32>
    %cst_104 = arith.constant dense<0x7F800000> : vector<2xf32>
    %473 = vector.multi_reduction <minimumf>, %472, %cst_104 [1] : vector<2x128xf32> to vector<2xf32>
    %474 = vector.shape_cast %473 : vector<2xf32> to vector<2x1xf32>
    %475 = vector.broadcast %474 : vector<2x1xf32> to vector<2x128xf32>
    %476 = arith.cmpf oeq, %20, %475 : vector<2x128xf32>
    %477 = arith.extui %476 : vector<2x128xi1> to vector<2x128xi32>
    %478 = arith.sitofp %477 : vector<2x128xi32> to vector<2x128xf32>
    %479 = arith.truncf %478 : vector<2x128xf32> to vector<2x128xbf16>
    %cst_105 = arith.constant dense<0.000000e+00> : vector<2x32xf32>
    %480 = tpu.matmul %479, %0, %cst_105 {dimension_numbers = #tpu.dot_dimension_numbers<[1], [0], [0], [1], [0, 0, 1, 1], [], []>} : vector<2x128xbf16>, vector<128x32xbf16>, vector<2x32xf32> -> vector<2x32xf32>
    %cst_106 = arith.constant dense<0.000000e+00> : vector<2xf32>
    %481 = vector.multi_reduction <add>, %480, %cst_106 [1] : vector<2x32xf32> to vector<2xf32>
    %482 = vector.shape_cast %481 : vector<2xf32> to vector<2x1xf32>
    %cst_107 = arith.constant 3.200000e+01 : f32
    %483 = vector.broadcast %cst_107 : f32 to vector<2x1xf32>
    %484 = arith.divf %482, %483 : vector<2x1xf32>
    %485 = vector.broadcast %484 : vector<2x1xf32> to vector<2x32xf32>
    %486 = arith.subf %480, %485 : vector<2x32xf32>
    %487 = arith.mulf %486, %486 : vector<2x32xf32>
    %cst_108 = arith.constant dense<0.000000e+00> : vector<2xf32>
    %488 = vector.multi_reduction <add>, %487, %cst_108 [1] : vector<2x32xf32> to vector<2xf32>
    %489 = vector.shape_cast %488 : vector<2xf32> to vector<2x1xf32>
    %cst_109 = arith.constant 3.200000e+01 : f32
    %490 = vector.broadcast %cst_109 : f32 to vector<2x1xf32>
    %491 = arith.divf %489, %490 : vector<2x1xf32>
    %492 = vector.broadcast %484 : vector<2x1xf32> to vector<2x32xf32>
    %493 = arith.subf %480, %492 : vector<2x32xf32>
    %cst_110 = arith.constant 9.99999974E-6 : f32
    %494 = vector.broadcast %cst_110 : f32 to vector<2x1xf32>
    %495 = arith.addf %491, %494 : vector<2x1xf32>
    %496 = math.rsqrt %495 : vector<2x1xf32>
    %497 = vector.broadcast %496 : vector<2x1xf32> to vector<2x32xf32>
    %498 = arith.mulf %493, %497 : vector<2x32xf32>
    %499 = vector.broadcast %15 : vector<1x32xf32> to vector<2x32xf32>
    %500 = arith.mulf %498, %499 : vector<2x32xf32>
    %501 = vector.broadcast %16 : vector<1x32xf32> to vector<2x32xf32>
    %502 = arith.addf %500, %501 : vector<2x32xf32>
    %503 = tpu.concatenate %502, %412 in 1 : vector<2x32xf32>, vector<2x32xf32> -> vector<2x64xf32>
    %504 = arith.truncf %503 : vector<2x64xf32> to vector<2x64xbf16>
    %505 = vector.extract_strided_slice %1 {offsets = [0, 0, 0], sizes = [1, 64, 128], strides = [1, 1, 1]} : vector<2x64x128xbf16> to vector<1x64x128xbf16>
    %506 = vector.shape_cast %505 : vector<1x64x128xbf16> to vector<64x128xbf16>
    %cst_111 = arith.constant dense<0.000000e+00> : vector<2x128xf32>
    %507 = tpu.matmul %504, %506, %cst_111 {dimension_numbers = #tpu.dot_dimension_numbers<[1], [0], [0], [1], [0, 0, 1, 1], [], []>} : vector<2x64xbf16>, vector<64x128xbf16>, vector<2x128xf32> -> vector<2x128xf32>
    %508 = vector.extract_strided_slice %2 {offsets = [0, 0], sizes = [1, 128], strides = [1, 1]} : vector<2x128xf32> to vector<1x128xf32>
    %509 = vector.broadcast %508 : vector<1x128xf32> to vector<2x128xf32>
    %510 = arith.addf %507, %509 : vector<2x128xf32>
    %511 = arith.negf %510 : vector<2x128xf32>
    %512 = math.exp %511 : vector<2x128xf32>
    %cst_112 = arith.constant 1.000000e+00 : f32
    %513 = vector.broadcast %cst_112 : f32 to vector<2x128xf32>
    %514 = arith.addf %513, %512 : vector<2x128xf32>
    %515 = arith.divf %513, %514 : vector<2x128xf32>
    %516 = math.tanh %510 : vector<2x128xf32>
    %517 = vector.extract_strided_slice %515 {offsets = [0, 0], sizes = [2, 32], strides = [1, 1]} : vector<2x128xf32> to vector<2x32xf32>
    %518 = vector.extract_strided_slice %515 {offsets = [0, 32], sizes = [2, 32], strides = [1, 1]} : vector<2x128xf32> to vector<2x32xf32>
    %519 = vector.extract_strided_slice %516 {offsets = [0, 64], sizes = [2, 32], strides = [1, 1]} : vector<2x128xf32> to vector<2x32xf32>
    %520 = vector.extract_strided_slice %515 {offsets = [0, 96], sizes = [2, 32], strides = [1, 1]} : vector<2x128xf32> to vector<2x32xf32>
    %521 = arith.mulf %518, %410 : vector<2x32xf32>
    %522 = arith.mulf %517, %519 : vector<2x32xf32>
    %523 = arith.addf %521, %522 : vector<2x32xf32>
    %524 = math.tanh %523 : vector<2x32xf32>
    %525 = arith.mulf %520, %524 : vector<2x32xf32>
    %526 = tpu.concatenate %525, %435 in 1 : vector<2x32xf32>, vector<2x32xf32> -> vector<2x64xf32>
    %527 = arith.truncf %526 : vector<2x64xf32> to vector<2x64xbf16>
    %528 = vector.extract_strided_slice %1 {offsets = [1, 0, 0], sizes = [1, 64, 128], strides = [1, 1, 1]} : vector<2x64x128xbf16> to vector<1x64x128xbf16>
    %529 = vector.shape_cast %528 : vector<1x64x128xbf16> to vector<64x128xbf16>
    %cst_113 = arith.constant dense<0.000000e+00> : vector<2x128xf32>
    %530 = tpu.matmul %527, %529, %cst_113 {dimension_numbers = #tpu.dot_dimension_numbers<[1], [0], [0], [1], [0, 0, 1, 1], [], []>} : vector<2x64xbf16>, vector<64x128xbf16>, vector<2x128xf32> -> vector<2x128xf32>
    %531 = vector.extract_strided_slice %2 {offsets = [1, 0], sizes = [1, 128], strides = [1, 1]} : vector<2x128xf32> to vector<1x128xf32>
    %532 = vector.broadcast %531 : vector<1x128xf32> to vector<2x128xf32>
    %533 = arith.addf %530, %532 : vector<2x128xf32>
    %534 = arith.negf %533 : vector<2x128xf32>
    %535 = math.exp %534 : vector<2x128xf32>
    %cst_114 = arith.constant 1.000000e+00 : f32
    %536 = vector.broadcast %cst_114 : f32 to vector<2x128xf32>
    %537 = arith.addf %536, %535 : vector<2x128xf32>
    %538 = arith.divf %536, %537 : vector<2x128xf32>
    %539 = math.tanh %533 : vector<2x128xf32>
    %540 = vector.extract_strided_slice %538 {offsets = [0, 0], sizes = [2, 32], strides = [1, 1]} : vector<2x128xf32> to vector<2x32xf32>
    %541 = vector.extract_strided_slice %538 {offsets = [0, 32], sizes = [2, 32], strides = [1, 1]} : vector<2x128xf32> to vector<2x32xf32>
    %542 = vector.extract_strided_slice %539 {offsets = [0, 64], sizes = [2, 32], strides = [1, 1]} : vector<2x128xf32> to vector<2x32xf32>
    %543 = vector.extract_strided_slice %538 {offsets = [0, 96], sizes = [2, 32], strides = [1, 1]} : vector<2x128xf32> to vector<2x32xf32>
    %544 = arith.mulf %541, %433 : vector<2x32xf32>
    %545 = arith.mulf %540, %542 : vector<2x32xf32>
    %546 = arith.addf %544, %545 : vector<2x32xf32>
    %547 = math.tanh %546 : vector<2x32xf32>
    %548 = arith.mulf %543, %547 : vector<2x32xf32>
    %cst_115 = arith.constant dense<0.000000e+00> : vector<2xf32>
    %549 = vector.multi_reduction <add>, %548, %cst_115 [1] : vector<2x32xf32> to vector<2xf32>
    %550 = vector.shape_cast %549 : vector<2xf32> to vector<2x1xf32>
    %cst_116 = arith.constant 3.200000e+01 : f32
    %551 = vector.broadcast %cst_116 : f32 to vector<2x1xf32>
    %552 = arith.divf %550, %551 : vector<2x1xf32>
    %553 = vector.broadcast %552 : vector<2x1xf32> to vector<2x32xf32>
    %554 = arith.subf %548, %553 : vector<2x32xf32>
    %555 = arith.mulf %554, %554 : vector<2x32xf32>
    %cst_117 = arith.constant dense<0.000000e+00> : vector<2xf32>
    %556 = vector.multi_reduction <add>, %555, %cst_117 [1] : vector<2x32xf32> to vector<2xf32>
    %557 = vector.shape_cast %556 : vector<2xf32> to vector<2x1xf32>
    %cst_118 = arith.constant 3.200000e+01 : f32
    %558 = vector.broadcast %cst_118 : f32 to vector<2x1xf32>
    %559 = arith.divf %557, %558 : vector<2x1xf32>
    %560 = vector.broadcast %552 : vector<2x1xf32> to vector<2x32xf32>
    %561 = arith.subf %548, %560 : vector<2x32xf32>
    %cst_119 = arith.constant 9.99999974E-6 : f32
    %562 = vector.broadcast %cst_119 : f32 to vector<2x1xf32>
    %563 = arith.addf %559, %562 : vector<2x1xf32>
    %564 = math.rsqrt %563 : vector<2x1xf32>
    %565 = vector.broadcast %564 : vector<2x1xf32> to vector<2x32xf32>
    %566 = arith.mulf %561, %565 : vector<2x32xf32>
    %567 = vector.broadcast %17 : vector<1x32xf32> to vector<2x32xf32>
    %568 = arith.mulf %566, %567 : vector<2x32xf32>
    %569 = vector.broadcast %18 : vector<1x32xf32> to vector<2x32xf32>
    %570 = arith.addf %568, %569 : vector<2x32xf32>
    %571 = arith.truncf %570 : vector<2x32xf32> to vector<2x32xbf16>
    %cst_120 = arith.constant dense<0.000000e+00> : vector<2x128xf32>
    %572 = tpu.matmul %571, %4, %cst_120 {dimension_numbers = #tpu.dot_dimension_numbers<[1], [0], [0], [1], [0, 0, 1, 1], [], []>} : vector<2x32xbf16>, vector<32x128xbf16>, vector<2x128xf32> -> vector<2x128xf32>
    %573 = vector.broadcast %5 : vector<1x128xf32> to vector<2x128xf32>
    %574 = arith.addf %572, %573 : vector<2x128xf32>
    %575 = vector.extract_strided_slice %6 {offsets = [4, 0, 0], sizes = [1, 2, 128], strides = [1, 1, 1]} : vector<8x2x128xf32> to vector<1x2x128xf32>
    %576 = vector.shape_cast %575 : vector<1x2x128xf32> to vector<2x128xf32>
    %577 = arith.addf %574, %576 : vector<2x128xf32>
    %cst_121 = arith.constant -1.000000e+30 : f32
    %578 = vector.broadcast %cst_121 : f32 to vector<2x128xf32>
    %579 = arith.select %22, %577, %578 : vector<2x128xi1>, vector<2x128xf32>
    %cst_122 = arith.constant dense<0xFF800000> : vector<2xf32>
    %580 = vector.multi_reduction <maximumf>, %579, %cst_122 [1] : vector<2x128xf32> to vector<2xf32>
    %581 = vector.shape_cast %580 : vector<2xf32> to vector<2x1xf32>
    %582 = vector.broadcast %581 : vector<2x1xf32> to vector<2x128xf32>
    %583 = arith.cmpf oge, %579, %582 : vector<2x128xf32>
    %cst_123 = arith.constant 2.560000e+02 : f32
    %584 = vector.broadcast %cst_123 : f32 to vector<2x128xf32>
    %585 = arith.select %583, %20, %584 : vector<2x128xi1>, vector<2x128xf32>
    %cst_124 = arith.constant dense<0x7F800000> : vector<2xf32>
    %586 = vector.multi_reduction <minimumf>, %585, %cst_124 [1] : vector<2x128xf32> to vector<2xf32>
    %587 = vector.shape_cast %586 : vector<2xf32> to vector<2x1xf32>
    %588 = vector.broadcast %587 : vector<2x1xf32> to vector<2x128xf32>
    %589 = arith.cmpf oeq, %20, %588 : vector<2x128xf32>
    %590 = arith.extui %589 : vector<2x128xi1> to vector<2x128xi32>
    %591 = arith.sitofp %590 : vector<2x128xi32> to vector<2x128xf32>
    %592 = arith.truncf %591 : vector<2x128xf32> to vector<2x128xbf16>
    %cst_125 = arith.constant dense<0.000000e+00> : vector<2x32xf32>
    %593 = tpu.matmul %592, %0, %cst_125 {dimension_numbers = #tpu.dot_dimension_numbers<[1], [0], [0], [1], [0, 0, 1, 1], [], []>} : vector<2x128xbf16>, vector<128x32xbf16>, vector<2x32xf32> -> vector<2x32xf32>
    %cst_126 = arith.constant dense<0.000000e+00> : vector<2xf32>
    %594 = vector.multi_reduction <add>, %593, %cst_126 [1] : vector<2x32xf32> to vector<2xf32>
    %595 = vector.shape_cast %594 : vector<2xf32> to vector<2x1xf32>
    %cst_127 = arith.constant 3.200000e+01 : f32
    %596 = vector.broadcast %cst_127 : f32 to vector<2x1xf32>
    %597 = arith.divf %595, %596 : vector<2x1xf32>
    %598 = vector.broadcast %597 : vector<2x1xf32> to vector<2x32xf32>
    %599 = arith.subf %593, %598 : vector<2x32xf32>
    %600 = arith.mulf %599, %599 : vector<2x32xf32>
    %cst_128 = arith.constant dense<0.000000e+00> : vector<2xf32>
    %601 = vector.multi_reduction <add>, %600, %cst_128 [1] : vector<2x32xf32> to vector<2xf32>
    %602 = vector.shape_cast %601 : vector<2xf32> to vector<2x1xf32>
    %cst_129 = arith.constant 3.200000e+01 : f32
    %603 = vector.broadcast %cst_129 : f32 to vector<2x1xf32>
    %604 = arith.divf %602, %603 : vector<2x1xf32>
    %605 = vector.broadcast %597 : vector<2x1xf32> to vector<2x32xf32>
    %606 = arith.subf %593, %605 : vector<2x32xf32>
    %cst_130 = arith.constant 9.99999974E-6 : f32
    %607 = vector.broadcast %cst_130 : f32 to vector<2x1xf32>
    %608 = arith.addf %604, %607 : vector<2x1xf32>
    %609 = math.rsqrt %608 : vector<2x1xf32>
    %610 = vector.broadcast %609 : vector<2x1xf32> to vector<2x32xf32>
    %611 = arith.mulf %606, %610 : vector<2x32xf32>
    %612 = vector.broadcast %15 : vector<1x32xf32> to vector<2x32xf32>
    %613 = arith.mulf %611, %612 : vector<2x32xf32>
    %614 = vector.broadcast %16 : vector<1x32xf32> to vector<2x32xf32>
    %615 = arith.addf %613, %614 : vector<2x32xf32>
    %616 = tpu.concatenate %615, %525 in 1 : vector<2x32xf32>, vector<2x32xf32> -> vector<2x64xf32>
    %617 = arith.truncf %616 : vector<2x64xf32> to vector<2x64xbf16>
    %618 = vector.extract_strided_slice %1 {offsets = [0, 0, 0], sizes = [1, 64, 128], strides = [1, 1, 1]} : vector<2x64x128xbf16> to vector<1x64x128xbf16>
    %619 = vector.shape_cast %618 : vector<1x64x128xbf16> to vector<64x128xbf16>
    %cst_131 = arith.constant dense<0.000000e+00> : vector<2x128xf32>
    %620 = tpu.matmul %617, %619, %cst_131 {dimension_numbers = #tpu.dot_dimension_numbers<[1], [0], [0], [1], [0, 0, 1, 1], [], []>} : vector<2x64xbf16>, vector<64x128xbf16>, vector<2x128xf32> -> vector<2x128xf32>
    %621 = vector.extract_strided_slice %2 {offsets = [0, 0], sizes = [1, 128], strides = [1, 1]} : vector<2x128xf32> to vector<1x128xf32>
    %622 = vector.broadcast %621 : vector<1x128xf32> to vector<2x128xf32>
    %623 = arith.addf %620, %622 : vector<2x128xf32>
    %624 = arith.negf %623 : vector<2x128xf32>
    %625 = math.exp %624 : vector<2x128xf32>
    %cst_132 = arith.constant 1.000000e+00 : f32
    %626 = vector.broadcast %cst_132 : f32 to vector<2x128xf32>
    %627 = arith.addf %626, %625 : vector<2x128xf32>
    %628 = arith.divf %626, %627 : vector<2x128xf32>
    %629 = math.tanh %623 : vector<2x128xf32>
    %630 = vector.extract_strided_slice %628 {offsets = [0, 0], sizes = [2, 32], strides = [1, 1]} : vector<2x128xf32> to vector<2x32xf32>
    %631 = vector.extract_strided_slice %628 {offsets = [0, 32], sizes = [2, 32], strides = [1, 1]} : vector<2x128xf32> to vector<2x32xf32>
    %632 = vector.extract_strided_slice %629 {offsets = [0, 64], sizes = [2, 32], strides = [1, 1]} : vector<2x128xf32> to vector<2x32xf32>
    %633 = vector.extract_strided_slice %628 {offsets = [0, 96], sizes = [2, 32], strides = [1, 1]} : vector<2x128xf32> to vector<2x32xf32>
    %634 = arith.mulf %631, %523 : vector<2x32xf32>
    %635 = arith.mulf %630, %632 : vector<2x32xf32>
    %636 = arith.addf %634, %635 : vector<2x32xf32>
    %637 = math.tanh %636 : vector<2x32xf32>
    %638 = arith.mulf %633, %637 : vector<2x32xf32>
    %639 = tpu.concatenate %638, %548 in 1 : vector<2x32xf32>, vector<2x32xf32> -> vector<2x64xf32>
    %640 = arith.truncf %639 : vector<2x64xf32> to vector<2x64xbf16>
    %641 = vector.extract_strided_slice %1 {offsets = [1, 0, 0], sizes = [1, 64, 128], strides = [1, 1, 1]} : vector<2x64x128xbf16> to vector<1x64x128xbf16>
    %642 = vector.shape_cast %641 : vector<1x64x128xbf16> to vector<64x128xbf16>
    %cst_133 = arith.constant dense<0.000000e+00> : vector<2x128xf32>
    %643 = tpu.matmul %640, %642, %cst_133 {dimension_numbers = #tpu.dot_dimension_numbers<[1], [0], [0], [1], [0, 0, 1, 1], [], []>} : vector<2x64xbf16>, vector<64x128xbf16>, vector<2x128xf32> -> vector<2x128xf32>
    %644 = vector.extract_strided_slice %2 {offsets = [1, 0], sizes = [1, 128], strides = [1, 1]} : vector<2x128xf32> to vector<1x128xf32>
    %645 = vector.broadcast %644 : vector<1x128xf32> to vector<2x128xf32>
    %646 = arith.addf %643, %645 : vector<2x128xf32>
    %647 = arith.negf %646 : vector<2x128xf32>
    %648 = math.exp %647 : vector<2x128xf32>
    %cst_134 = arith.constant 1.000000e+00 : f32
    %649 = vector.broadcast %cst_134 : f32 to vector<2x128xf32>
    %650 = arith.addf %649, %648 : vector<2x128xf32>
    %651 = arith.divf %649, %650 : vector<2x128xf32>
    %652 = math.tanh %646 : vector<2x128xf32>
    %653 = vector.extract_strided_slice %651 {offsets = [0, 0], sizes = [2, 32], strides = [1, 1]} : vector<2x128xf32> to vector<2x32xf32>
    %654 = vector.extract_strided_slice %651 {offsets = [0, 32], sizes = [2, 32], strides = [1, 1]} : vector<2x128xf32> to vector<2x32xf32>
    %655 = vector.extract_strided_slice %652 {offsets = [0, 64], sizes = [2, 32], strides = [1, 1]} : vector<2x128xf32> to vector<2x32xf32>
    %656 = vector.extract_strided_slice %651 {offsets = [0, 96], sizes = [2, 32], strides = [1, 1]} : vector<2x128xf32> to vector<2x32xf32>
    %657 = arith.mulf %654, %546 : vector<2x32xf32>
    %658 = arith.mulf %653, %655 : vector<2x32xf32>
    %659 = arith.addf %657, %658 : vector<2x32xf32>
    %660 = math.tanh %659 : vector<2x32xf32>
    %661 = arith.mulf %656, %660 : vector<2x32xf32>
    %cst_135 = arith.constant dense<0.000000e+00> : vector<2xf32>
    %662 = vector.multi_reduction <add>, %661, %cst_135 [1] : vector<2x32xf32> to vector<2xf32>
    %663 = vector.shape_cast %662 : vector<2xf32> to vector<2x1xf32>
    %cst_136 = arith.constant 3.200000e+01 : f32
    %664 = vector.broadcast %cst_136 : f32 to vector<2x1xf32>
    %665 = arith.divf %663, %664 : vector<2x1xf32>
    %666 = vector.broadcast %665 : vector<2x1xf32> to vector<2x32xf32>
    %667 = arith.subf %661, %666 : vector<2x32xf32>
    %668 = arith.mulf %667, %667 : vector<2x32xf32>
    %cst_137 = arith.constant dense<0.000000e+00> : vector<2xf32>
    %669 = vector.multi_reduction <add>, %668, %cst_137 [1] : vector<2x32xf32> to vector<2xf32>
    %670 = vector.shape_cast %669 : vector<2xf32> to vector<2x1xf32>
    %cst_138 = arith.constant 3.200000e+01 : f32
    %671 = vector.broadcast %cst_138 : f32 to vector<2x1xf32>
    %672 = arith.divf %670, %671 : vector<2x1xf32>
    %673 = vector.broadcast %665 : vector<2x1xf32> to vector<2x32xf32>
    %674 = arith.subf %661, %673 : vector<2x32xf32>
    %cst_139 = arith.constant 9.99999974E-6 : f32
    %675 = vector.broadcast %cst_139 : f32 to vector<2x1xf32>
    %676 = arith.addf %672, %675 : vector<2x1xf32>
    %677 = math.rsqrt %676 : vector<2x1xf32>
    %678 = vector.broadcast %677 : vector<2x1xf32> to vector<2x32xf32>
    %679 = arith.mulf %674, %678 : vector<2x32xf32>
    %680 = vector.broadcast %17 : vector<1x32xf32> to vector<2x32xf32>
    %681 = arith.mulf %679, %680 : vector<2x32xf32>
    %682 = vector.broadcast %18 : vector<1x32xf32> to vector<2x32xf32>
    %683 = arith.addf %681, %682 : vector<2x32xf32>
    %684 = arith.truncf %683 : vector<2x32xf32> to vector<2x32xbf16>
    %cst_140 = arith.constant dense<0.000000e+00> : vector<2x128xf32>
    %685 = tpu.matmul %684, %4, %cst_140 {dimension_numbers = #tpu.dot_dimension_numbers<[1], [0], [0], [1], [0, 0, 1, 1], [], []>} : vector<2x32xbf16>, vector<32x128xbf16>, vector<2x128xf32> -> vector<2x128xf32>
    %686 = vector.broadcast %5 : vector<1x128xf32> to vector<2x128xf32>
    %687 = arith.addf %685, %686 : vector<2x128xf32>
    %688 = vector.extract_strided_slice %6 {offsets = [5, 0, 0], sizes = [1, 2, 128], strides = [1, 1, 1]} : vector<8x2x128xf32> to vector<1x2x128xf32>
    %689 = vector.shape_cast %688 : vector<1x2x128xf32> to vector<2x128xf32>
    %690 = arith.addf %687, %689 : vector<2x128xf32>
    %cst_141 = arith.constant -1.000000e+30 : f32
    %691 = vector.broadcast %cst_141 : f32 to vector<2x128xf32>
    %692 = arith.select %22, %690, %691 : vector<2x128xi1>, vector<2x128xf32>
    %cst_142 = arith.constant dense<0xFF800000> : vector<2xf32>
    %693 = vector.multi_reduction <maximumf>, %692, %cst_142 [1] : vector<2x128xf32> to vector<2xf32>
    %694 = vector.shape_cast %693 : vector<2xf32> to vector<2x1xf32>
    %695 = vector.broadcast %694 : vector<2x1xf32> to vector<2x128xf32>
    %696 = arith.cmpf oge, %692, %695 : vector<2x128xf32>
    %cst_143 = arith.constant 2.560000e+02 : f32
    %697 = vector.broadcast %cst_143 : f32 to vector<2x128xf32>
    %698 = arith.select %696, %20, %697 : vector<2x128xi1>, vector<2x128xf32>
    %cst_144 = arith.constant dense<0x7F800000> : vector<2xf32>
    %699 = vector.multi_reduction <minimumf>, %698, %cst_144 [1] : vector<2x128xf32> to vector<2xf32>
    %700 = vector.shape_cast %699 : vector<2xf32> to vector<2x1xf32>
    %701 = vector.broadcast %700 : vector<2x1xf32> to vector<2x128xf32>
    %702 = arith.cmpf oeq, %20, %701 : vector<2x128xf32>
    %703 = arith.extui %702 : vector<2x128xi1> to vector<2x128xi32>
    %704 = arith.sitofp %703 : vector<2x128xi32> to vector<2x128xf32>
    %705 = arith.truncf %704 : vector<2x128xf32> to vector<2x128xbf16>
    %cst_145 = arith.constant dense<0.000000e+00> : vector<2x32xf32>
    %706 = tpu.matmul %705, %0, %cst_145 {dimension_numbers = #tpu.dot_dimension_numbers<[1], [0], [0], [1], [0, 0, 1, 1], [], []>} : vector<2x128xbf16>, vector<128x32xbf16>, vector<2x32xf32> -> vector<2x32xf32>
    %cst_146 = arith.constant dense<0.000000e+00> : vector<2xf32>
    %707 = vector.multi_reduction <add>, %706, %cst_146 [1] : vector<2x32xf32> to vector<2xf32>
    %708 = vector.shape_cast %707 : vector<2xf32> to vector<2x1xf32>
    %cst_147 = arith.constant 3.200000e+01 : f32
    %709 = vector.broadcast %cst_147 : f32 to vector<2x1xf32>
    %710 = arith.divf %708, %709 : vector<2x1xf32>
    %711 = vector.broadcast %710 : vector<2x1xf32> to vector<2x32xf32>
    %712 = arith.subf %706, %711 : vector<2x32xf32>
    %713 = arith.mulf %712, %712 : vector<2x32xf32>
    %cst_148 = arith.constant dense<0.000000e+00> : vector<2xf32>
    %714 = vector.multi_reduction <add>, %713, %cst_148 [1] : vector<2x32xf32> to vector<2xf32>
    %715 = vector.shape_cast %714 : vector<2xf32> to vector<2x1xf32>
    %cst_149 = arith.constant 3.200000e+01 : f32
    %716 = vector.broadcast %cst_149 : f32 to vector<2x1xf32>
    %717 = arith.divf %715, %716 : vector<2x1xf32>
    %718 = vector.broadcast %710 : vector<2x1xf32> to vector<2x32xf32>
    %719 = arith.subf %706, %718 : vector<2x32xf32>
    %cst_150 = arith.constant 9.99999974E-6 : f32
    %720 = vector.broadcast %cst_150 : f32 to vector<2x1xf32>
    %721 = arith.addf %717, %720 : vector<2x1xf32>
    %722 = math.rsqrt %721 : vector<2x1xf32>
    %723 = vector.broadcast %722 : vector<2x1xf32> to vector<2x32xf32>
    %724 = arith.mulf %719, %723 : vector<2x32xf32>
    %725 = vector.broadcast %15 : vector<1x32xf32> to vector<2x32xf32>
    %726 = arith.mulf %724, %725 : vector<2x32xf32>
    %727 = vector.broadcast %16 : vector<1x32xf32> to vector<2x32xf32>
    %728 = arith.addf %726, %727 : vector<2x32xf32>
    %729 = tpu.concatenate %728, %638 in 1 : vector<2x32xf32>, vector<2x32xf32> -> vector<2x64xf32>
    %730 = arith.truncf %729 : vector<2x64xf32> to vector<2x64xbf16>
    %731 = vector.extract_strided_slice %1 {offsets = [0, 0, 0], sizes = [1, 64, 128], strides = [1, 1, 1]} : vector<2x64x128xbf16> to vector<1x64x128xbf16>
    %732 = vector.shape_cast %731 : vector<1x64x128xbf16> to vector<64x128xbf16>
    %cst_151 = arith.constant dense<0.000000e+00> : vector<2x128xf32>
    %733 = tpu.matmul %730, %732, %cst_151 {dimension_numbers = #tpu.dot_dimension_numbers<[1], [0], [0], [1], [0, 0, 1, 1], [], []>} : vector<2x64xbf16>, vector<64x128xbf16>, vector<2x128xf32> -> vector<2x128xf32>
    %734 = vector.extract_strided_slice %2 {offsets = [0, 0], sizes = [1, 128], strides = [1, 1]} : vector<2x128xf32> to vector<1x128xf32>
    %735 = vector.broadcast %734 : vector<1x128xf32> to vector<2x128xf32>
    %736 = arith.addf %733, %735 : vector<2x128xf32>
    %737 = arith.negf %736 : vector<2x128xf32>
    %738 = math.exp %737 : vector<2x128xf32>
    %cst_152 = arith.constant 1.000000e+00 : f32
    %739 = vector.broadcast %cst_152 : f32 to vector<2x128xf32>
    %740 = arith.addf %739, %738 : vector<2x128xf32>
    %741 = arith.divf %739, %740 : vector<2x128xf32>
    %742 = math.tanh %736 : vector<2x128xf32>
    %743 = vector.extract_strided_slice %741 {offsets = [0, 0], sizes = [2, 32], strides = [1, 1]} : vector<2x128xf32> to vector<2x32xf32>
    %744 = vector.extract_strided_slice %741 {offsets = [0, 32], sizes = [2, 32], strides = [1, 1]} : vector<2x128xf32> to vector<2x32xf32>
    %745 = vector.extract_strided_slice %742 {offsets = [0, 64], sizes = [2, 32], strides = [1, 1]} : vector<2x128xf32> to vector<2x32xf32>
    %746 = vector.extract_strided_slice %741 {offsets = [0, 96], sizes = [2, 32], strides = [1, 1]} : vector<2x128xf32> to vector<2x32xf32>
    %747 = arith.mulf %744, %636 : vector<2x32xf32>
    %748 = arith.mulf %743, %745 : vector<2x32xf32>
    %749 = arith.addf %747, %748 : vector<2x32xf32>
    %750 = math.tanh %749 : vector<2x32xf32>
    %751 = arith.mulf %746, %750 : vector<2x32xf32>
    %752 = tpu.concatenate %751, %661 in 1 : vector<2x32xf32>, vector<2x32xf32> -> vector<2x64xf32>
    %753 = arith.truncf %752 : vector<2x64xf32> to vector<2x64xbf16>
    %754 = vector.extract_strided_slice %1 {offsets = [1, 0, 0], sizes = [1, 64, 128], strides = [1, 1, 1]} : vector<2x64x128xbf16> to vector<1x64x128xbf16>
    %755 = vector.shape_cast %754 : vector<1x64x128xbf16> to vector<64x128xbf16>
    %cst_153 = arith.constant dense<0.000000e+00> : vector<2x128xf32>
    %756 = tpu.matmul %753, %755, %cst_153 {dimension_numbers = #tpu.dot_dimension_numbers<[1], [0], [0], [1], [0, 0, 1, 1], [], []>} : vector<2x64xbf16>, vector<64x128xbf16>, vector<2x128xf32> -> vector<2x128xf32>
    %757 = vector.extract_strided_slice %2 {offsets = [1, 0], sizes = [1, 128], strides = [1, 1]} : vector<2x128xf32> to vector<1x128xf32>
    %758 = vector.broadcast %757 : vector<1x128xf32> to vector<2x128xf32>
    %759 = arith.addf %756, %758 : vector<2x128xf32>
    %760 = arith.negf %759 : vector<2x128xf32>
    %761 = math.exp %760 : vector<2x128xf32>
    %cst_154 = arith.constant 1.000000e+00 : f32
    %762 = vector.broadcast %cst_154 : f32 to vector<2x128xf32>
    %763 = arith.addf %762, %761 : vector<2x128xf32>
    %764 = arith.divf %762, %763 : vector<2x128xf32>
    %765 = math.tanh %759 : vector<2x128xf32>
    %766 = vector.extract_strided_slice %764 {offsets = [0, 0], sizes = [2, 32], strides = [1, 1]} : vector<2x128xf32> to vector<2x32xf32>
    %767 = vector.extract_strided_slice %764 {offsets = [0, 32], sizes = [2, 32], strides = [1, 1]} : vector<2x128xf32> to vector<2x32xf32>
    %768 = vector.extract_strided_slice %765 {offsets = [0, 64], sizes = [2, 32], strides = [1, 1]} : vector<2x128xf32> to vector<2x32xf32>
    %769 = vector.extract_strided_slice %764 {offsets = [0, 96], sizes = [2, 32], strides = [1, 1]} : vector<2x128xf32> to vector<2x32xf32>
    %770 = arith.mulf %767, %659 : vector<2x32xf32>
    %771 = arith.mulf %766, %768 : vector<2x32xf32>
    %772 = arith.addf %770, %771 : vector<2x32xf32>
    %773 = math.tanh %772 : vector<2x32xf32>
    %774 = arith.mulf %769, %773 : vector<2x32xf32>
    %cst_155 = arith.constant dense<0.000000e+00> : vector<2xf32>
    %775 = vector.multi_reduction <add>, %774, %cst_155 [1] : vector<2x32xf32> to vector<2xf32>
    %776 = vector.shape_cast %775 : vector<2xf32> to vector<2x1xf32>
    %cst_156 = arith.constant 3.200000e+01 : f32
    %777 = vector.broadcast %cst_156 : f32 to vector<2x1xf32>
    %778 = arith.divf %776, %777 : vector<2x1xf32>
    %779 = vector.broadcast %778 : vector<2x1xf32> to vector<2x32xf32>
    %780 = arith.subf %774, %779 : vector<2x32xf32>
    %781 = arith.mulf %780, %780 : vector<2x32xf32>
    %cst_157 = arith.constant dense<0.000000e+00> : vector<2xf32>
    %782 = vector.multi_reduction <add>, %781, %cst_157 [1] : vector<2x32xf32> to vector<2xf32>
    %783 = vector.shape_cast %782 : vector<2xf32> to vector<2x1xf32>
    %cst_158 = arith.constant 3.200000e+01 : f32
    %784 = vector.broadcast %cst_158 : f32 to vector<2x1xf32>
    %785 = arith.divf %783, %784 : vector<2x1xf32>
    %786 = vector.broadcast %778 : vector<2x1xf32> to vector<2x32xf32>
    %787 = arith.subf %774, %786 : vector<2x32xf32>
    %cst_159 = arith.constant 9.99999974E-6 : f32
    %788 = vector.broadcast %cst_159 : f32 to vector<2x1xf32>
    %789 = arith.addf %785, %788 : vector<2x1xf32>
    %790 = math.rsqrt %789 : vector<2x1xf32>
    %791 = vector.broadcast %790 : vector<2x1xf32> to vector<2x32xf32>
    %792 = arith.mulf %787, %791 : vector<2x32xf32>
    %793 = vector.broadcast %17 : vector<1x32xf32> to vector<2x32xf32>
    %794 = arith.mulf %792, %793 : vector<2x32xf32>
    %795 = vector.broadcast %18 : vector<1x32xf32> to vector<2x32xf32>
    %796 = arith.addf %794, %795 : vector<2x32xf32>
    %797 = arith.truncf %796 : vector<2x32xf32> to vector<2x32xbf16>
    %cst_160 = arith.constant dense<0.000000e+00> : vector<2x128xf32>
    %798 = tpu.matmul %797, %4, %cst_160 {dimension_numbers = #tpu.dot_dimension_numbers<[1], [0], [0], [1], [0, 0, 1, 1], [], []>} : vector<2x32xbf16>, vector<32x128xbf16>, vector<2x128xf32> -> vector<2x128xf32>
    %799 = vector.broadcast %5 : vector<1x128xf32> to vector<2x128xf32>
    %800 = arith.addf %798, %799 : vector<2x128xf32>
    %801 = vector.extract_strided_slice %6 {offsets = [6, 0, 0], sizes = [1, 2, 128], strides = [1, 1, 1]} : vector<8x2x128xf32> to vector<1x2x128xf32>
    %802 = vector.shape_cast %801 : vector<1x2x128xf32> to vector<2x128xf32>
    %803 = arith.addf %800, %802 : vector<2x128xf32>
    %cst_161 = arith.constant -1.000000e+30 : f32
    %804 = vector.broadcast %cst_161 : f32 to vector<2x128xf32>
    %805 = arith.select %22, %803, %804 : vector<2x128xi1>, vector<2x128xf32>
    %cst_162 = arith.constant dense<0xFF800000> : vector<2xf32>
    %806 = vector.multi_reduction <maximumf>, %805, %cst_162 [1] : vector<2x128xf32> to vector<2xf32>
    %807 = vector.shape_cast %806 : vector<2xf32> to vector<2x1xf32>
    %808 = vector.broadcast %807 : vector<2x1xf32> to vector<2x128xf32>
    %809 = arith.cmpf oge, %805, %808 : vector<2x128xf32>
    %cst_163 = arith.constant 2.560000e+02 : f32
    %810 = vector.broadcast %cst_163 : f32 to vector<2x128xf32>
    %811 = arith.select %809, %20, %810 : vector<2x128xi1>, vector<2x128xf32>
    %cst_164 = arith.constant dense<0x7F800000> : vector<2xf32>
    %812 = vector.multi_reduction <minimumf>, %811, %cst_164 [1] : vector<2x128xf32> to vector<2xf32>
    %813 = vector.shape_cast %812 : vector<2xf32> to vector<2x1xf32>
    %814 = vector.broadcast %813 : vector<2x1xf32> to vector<2x128xf32>
    %815 = arith.cmpf oeq, %20, %814 : vector<2x128xf32>
    %816 = arith.extui %815 : vector<2x128xi1> to vector<2x128xi32>
    %817 = arith.sitofp %816 : vector<2x128xi32> to vector<2x128xf32>
    %818 = arith.truncf %817 : vector<2x128xf32> to vector<2x128xbf16>
    %cst_165 = arith.constant dense<0.000000e+00> : vector<2x32xf32>
    %819 = tpu.matmul %818, %0, %cst_165 {dimension_numbers = #tpu.dot_dimension_numbers<[1], [0], [0], [1], [0, 0, 1, 1], [], []>} : vector<2x128xbf16>, vector<128x32xbf16>, vector<2x32xf32> -> vector<2x32xf32>
    %cst_166 = arith.constant dense<0.000000e+00> : vector<2xf32>
    %820 = vector.multi_reduction <add>, %819, %cst_166 [1] : vector<2x32xf32> to vector<2xf32>
    %821 = vector.shape_cast %820 : vector<2xf32> to vector<2x1xf32>
    %cst_167 = arith.constant 3.200000e+01 : f32
    %822 = vector.broadcast %cst_167 : f32 to vector<2x1xf32>
    %823 = arith.divf %821, %822 : vector<2x1xf32>
    %824 = vector.broadcast %823 : vector<2x1xf32> to vector<2x32xf32>
    %825 = arith.subf %819, %824 : vector<2x32xf32>
    %826 = arith.mulf %825, %825 : vector<2x32xf32>
    %cst_168 = arith.constant dense<0.000000e+00> : vector<2xf32>
    %827 = vector.multi_reduction <add>, %826, %cst_168 [1] : vector<2x32xf32> to vector<2xf32>
    %828 = vector.shape_cast %827 : vector<2xf32> to vector<2x1xf32>
    %cst_169 = arith.constant 3.200000e+01 : f32
    %829 = vector.broadcast %cst_169 : f32 to vector<2x1xf32>
    %830 = arith.divf %828, %829 : vector<2x1xf32>
    %831 = vector.broadcast %823 : vector<2x1xf32> to vector<2x32xf32>
    %832 = arith.subf %819, %831 : vector<2x32xf32>
    %cst_170 = arith.constant 9.99999974E-6 : f32
    %833 = vector.broadcast %cst_170 : f32 to vector<2x1xf32>
    %834 = arith.addf %830, %833 : vector<2x1xf32>
    %835 = math.rsqrt %834 : vector<2x1xf32>
    %836 = vector.broadcast %835 : vector<2x1xf32> to vector<2x32xf32>
    %837 = arith.mulf %832, %836 : vector<2x32xf32>
    %838 = vector.broadcast %15 : vector<1x32xf32> to vector<2x32xf32>
    %839 = arith.mulf %837, %838 : vector<2x32xf32>
    %840 = vector.broadcast %16 : vector<1x32xf32> to vector<2x32xf32>
    %841 = arith.addf %839, %840 : vector<2x32xf32>
    %842 = tpu.concatenate %841, %751 in 1 : vector<2x32xf32>, vector<2x32xf32> -> vector<2x64xf32>
    %843 = arith.truncf %842 : vector<2x64xf32> to vector<2x64xbf16>
    %844 = vector.extract_strided_slice %1 {offsets = [0, 0, 0], sizes = [1, 64, 128], strides = [1, 1, 1]} : vector<2x64x128xbf16> to vector<1x64x128xbf16>
    %845 = vector.shape_cast %844 : vector<1x64x128xbf16> to vector<64x128xbf16>
    %cst_171 = arith.constant dense<0.000000e+00> : vector<2x128xf32>
    %846 = tpu.matmul %843, %845, %cst_171 {dimension_numbers = #tpu.dot_dimension_numbers<[1], [0], [0], [1], [0, 0, 1, 1], [], []>} : vector<2x64xbf16>, vector<64x128xbf16>, vector<2x128xf32> -> vector<2x128xf32>
    %847 = vector.extract_strided_slice %2 {offsets = [0, 0], sizes = [1, 128], strides = [1, 1]} : vector<2x128xf32> to vector<1x128xf32>
    %848 = vector.broadcast %847 : vector<1x128xf32> to vector<2x128xf32>
    %849 = arith.addf %846, %848 : vector<2x128xf32>
    %850 = arith.negf %849 : vector<2x128xf32>
    %851 = math.exp %850 : vector<2x128xf32>
    %cst_172 = arith.constant 1.000000e+00 : f32
    %852 = vector.broadcast %cst_172 : f32 to vector<2x128xf32>
    %853 = arith.addf %852, %851 : vector<2x128xf32>
    %854 = arith.divf %852, %853 : vector<2x128xf32>
    %855 = math.tanh %849 : vector<2x128xf32>
    %856 = vector.extract_strided_slice %854 {offsets = [0, 0], sizes = [2, 32], strides = [1, 1]} : vector<2x128xf32> to vector<2x32xf32>
    %857 = vector.extract_strided_slice %854 {offsets = [0, 32], sizes = [2, 32], strides = [1, 1]} : vector<2x128xf32> to vector<2x32xf32>
    %858 = vector.extract_strided_slice %855 {offsets = [0, 64], sizes = [2, 32], strides = [1, 1]} : vector<2x128xf32> to vector<2x32xf32>
    %859 = vector.extract_strided_slice %854 {offsets = [0, 96], sizes = [2, 32], strides = [1, 1]} : vector<2x128xf32> to vector<2x32xf32>
    %860 = arith.mulf %857, %749 : vector<2x32xf32>
    %861 = arith.mulf %856, %858 : vector<2x32xf32>
    %862 = arith.addf %860, %861 : vector<2x32xf32>
    %863 = math.tanh %862 : vector<2x32xf32>
    %864 = arith.mulf %859, %863 : vector<2x32xf32>
    %865 = tpu.concatenate %864, %774 in 1 : vector<2x32xf32>, vector<2x32xf32> -> vector<2x64xf32>
    %866 = arith.truncf %865 : vector<2x64xf32> to vector<2x64xbf16>
    %867 = vector.extract_strided_slice %1 {offsets = [1, 0, 0], sizes = [1, 64, 128], strides = [1, 1, 1]} : vector<2x64x128xbf16> to vector<1x64x128xbf16>
    %868 = vector.shape_cast %867 : vector<1x64x128xbf16> to vector<64x128xbf16>
    %cst_173 = arith.constant dense<0.000000e+00> : vector<2x128xf32>
    %869 = tpu.matmul %866, %868, %cst_173 {dimension_numbers = #tpu.dot_dimension_numbers<[1], [0], [0], [1], [0, 0, 1, 1], [], []>} : vector<2x64xbf16>, vector<64x128xbf16>, vector<2x128xf32> -> vector<2x128xf32>
    %870 = vector.extract_strided_slice %2 {offsets = [1, 0], sizes = [1, 128], strides = [1, 1]} : vector<2x128xf32> to vector<1x128xf32>
    %871 = vector.broadcast %870 : vector<1x128xf32> to vector<2x128xf32>
    %872 = arith.addf %869, %871 : vector<2x128xf32>
    %873 = arith.negf %872 : vector<2x128xf32>
    %874 = math.exp %873 : vector<2x128xf32>
    %cst_174 = arith.constant 1.000000e+00 : f32
    %875 = vector.broadcast %cst_174 : f32 to vector<2x128xf32>
    %876 = arith.addf %875, %874 : vector<2x128xf32>
    %877 = arith.divf %875, %876 : vector<2x128xf32>
    %878 = math.tanh %872 : vector<2x128xf32>
    %879 = vector.extract_strided_slice %877 {offsets = [0, 0], sizes = [2, 32], strides = [1, 1]} : vector<2x128xf32> to vector<2x32xf32>
    %880 = vector.extract_strided_slice %877 {offsets = [0, 32], sizes = [2, 32], strides = [1, 1]} : vector<2x128xf32> to vector<2x32xf32>
    %881 = vector.extract_strided_slice %878 {offsets = [0, 64], sizes = [2, 32], strides = [1, 1]} : vector<2x128xf32> to vector<2x32xf32>
    %882 = vector.extract_strided_slice %877 {offsets = [0, 96], sizes = [2, 32], strides = [1, 1]} : vector<2x128xf32> to vector<2x32xf32>
    %883 = arith.mulf %880, %772 : vector<2x32xf32>
    %884 = arith.mulf %879, %881 : vector<2x32xf32>
    %885 = arith.addf %883, %884 : vector<2x32xf32>
    %886 = math.tanh %885 : vector<2x32xf32>
    %887 = arith.mulf %882, %886 : vector<2x32xf32>
    %cst_175 = arith.constant dense<0.000000e+00> : vector<2xf32>
    %888 = vector.multi_reduction <add>, %887, %cst_175 [1] : vector<2x32xf32> to vector<2xf32>
    %889 = vector.shape_cast %888 : vector<2xf32> to vector<2x1xf32>
    %cst_176 = arith.constant 3.200000e+01 : f32
    %890 = vector.broadcast %cst_176 : f32 to vector<2x1xf32>
    %891 = arith.divf %889, %890 : vector<2x1xf32>
    %892 = vector.broadcast %891 : vector<2x1xf32> to vector<2x32xf32>
    %893 = arith.subf %887, %892 : vector<2x32xf32>
    %894 = arith.mulf %893, %893 : vector<2x32xf32>
    %cst_177 = arith.constant dense<0.000000e+00> : vector<2xf32>
    %895 = vector.multi_reduction <add>, %894, %cst_177 [1] : vector<2x32xf32> to vector<2xf32>
    %896 = vector.shape_cast %895 : vector<2xf32> to vector<2x1xf32>
    %cst_178 = arith.constant 3.200000e+01 : f32
    %897 = vector.broadcast %cst_178 : f32 to vector<2x1xf32>
    %898 = arith.divf %896, %897 : vector<2x1xf32>
    %899 = vector.broadcast %891 : vector<2x1xf32> to vector<2x32xf32>
    %900 = arith.subf %887, %899 : vector<2x32xf32>
    %cst_179 = arith.constant 9.99999974E-6 : f32
    %901 = vector.broadcast %cst_179 : f32 to vector<2x1xf32>
    %902 = arith.addf %898, %901 : vector<2x1xf32>
    %903 = math.rsqrt %902 : vector<2x1xf32>
    %904 = vector.broadcast %903 : vector<2x1xf32> to vector<2x32xf32>
    %905 = arith.mulf %900, %904 : vector<2x32xf32>
    %906 = vector.broadcast %17 : vector<1x32xf32> to vector<2x32xf32>
    %907 = arith.mulf %905, %906 : vector<2x32xf32>
    %908 = vector.broadcast %18 : vector<1x32xf32> to vector<2x32xf32>
    %909 = arith.addf %907, %908 : vector<2x32xf32>
    %910 = arith.truncf %909 : vector<2x32xf32> to vector<2x32xbf16>
    %cst_180 = arith.constant dense<0.000000e+00> : vector<2x128xf32>
    %911 = tpu.matmul %910, %4, %cst_180 {dimension_numbers = #tpu.dot_dimension_numbers<[1], [0], [0], [1], [0, 0, 1, 1], [], []>} : vector<2x32xbf16>, vector<32x128xbf16>, vector<2x128xf32> -> vector<2x128xf32>
    %912 = vector.broadcast %5 : vector<1x128xf32> to vector<2x128xf32>
    %913 = arith.addf %911, %912 : vector<2x128xf32>
    %914 = vector.extract_strided_slice %6 {offsets = [7, 0, 0], sizes = [1, 2, 128], strides = [1, 1, 1]} : vector<8x2x128xf32> to vector<1x2x128xf32>
    %915 = vector.shape_cast %914 : vector<1x2x128xf32> to vector<2x128xf32>
    %916 = arith.addf %913, %915 : vector<2x128xf32>
    %cst_181 = arith.constant -1.000000e+30 : f32
    %917 = vector.broadcast %cst_181 : f32 to vector<2x128xf32>
    %918 = arith.select %22, %916, %917 : vector<2x128xi1>, vector<2x128xf32>
    %cst_182 = arith.constant dense<0xFF800000> : vector<2xf32>
    %919 = vector.multi_reduction <maximumf>, %918, %cst_182 [1] : vector<2x128xf32> to vector<2xf32>
    %920 = vector.shape_cast %919 : vector<2xf32> to vector<2x1xf32>
    %921 = vector.broadcast %920 : vector<2x1xf32> to vector<2x128xf32>
    %922 = arith.cmpf oge, %918, %921 : vector<2x128xf32>
    %cst_183 = arith.constant 2.560000e+02 : f32
    %923 = vector.broadcast %cst_183 : f32 to vector<2x128xf32>
    %924 = arith.select %922, %20, %923 : vector<2x128xi1>, vector<2x128xf32>
    %cst_184 = arith.constant dense<0x7F800000> : vector<2xf32>
    %925 = vector.multi_reduction <minimumf>, %924, %cst_184 [1] : vector<2x128xf32> to vector<2xf32>
    %926 = vector.shape_cast %925 : vector<2xf32> to vector<2x1xf32>
    %927 = vector.shape_cast %118 : vector<2x32xf32> to vector<2x1x32xf32>
    %928 = vector.shape_cast %231 : vector<2x32xf32> to vector<2x1x32xf32>
    %929 = vector.shape_cast %344 : vector<2x32xf32> to vector<2x1x32xf32>
    %930 = vector.shape_cast %457 : vector<2x32xf32> to vector<2x1x32xf32>
    %931 = vector.shape_cast %570 : vector<2x32xf32> to vector<2x1x32xf32>
    %932 = vector.shape_cast %683 : vector<2x32xf32> to vector<2x1x32xf32>
    %933 = vector.shape_cast %796 : vector<2x32xf32> to vector<2x1x32xf32>
    %934 = vector.shape_cast %909 : vector<2x32xf32> to vector<2x1x32xf32>
    %935 = tpu.concatenate %927, %928, %929, %930, %931, %932, %933, %934 in 1 : vector<2x1x32xf32>, vector<2x1x32xf32>, vector<2x1x32xf32>, vector<2x1x32xf32>, vector<2x1x32xf32>, vector<2x1x32xf32>, vector<2x1x32xf32>, vector<2x1x32xf32> -> vector<2x8x32xf32>
    %936 = vector.shape_cast %935 : vector<2x8x32xf32> to vector<16x32xf32>
    %937 = vector.shape_cast %135 : vector<2x1xf32> to vector<2x1x1xf32>
    %938 = vector.shape_cast %248 : vector<2x1xf32> to vector<2x1x1xf32>
    %939 = vector.shape_cast %361 : vector<2x1xf32> to vector<2x1x1xf32>
    %940 = vector.shape_cast %474 : vector<2x1xf32> to vector<2x1x1xf32>
    %941 = vector.shape_cast %587 : vector<2x1xf32> to vector<2x1x1xf32>
    %942 = vector.shape_cast %700 : vector<2x1xf32> to vector<2x1x1xf32>
    %943 = vector.shape_cast %813 : vector<2x1xf32> to vector<2x1x1xf32>
    %944 = vector.shape_cast %926 : vector<2x1xf32> to vector<2x1x1xf32>
    %945 = tpu.concatenate %937, %938, %939, %940, %941, %942, %943, %944 in 1 : vector<2x1x1xf32>, vector<2x1x1xf32>, vector<2x1x1xf32>, vector<2x1x1xf32>, vector<2x1x1xf32>, vector<2x1x1xf32>, vector<2x1x1xf32>, vector<2x1x1xf32> -> vector<2x8x1xf32>
    %946 = vector.shape_cast %945 : vector<2x8x1xf32> to vector<16x1xf32>
    %947 = arith.truncf %936 : vector<16x32xf32> to vector<16x32xbf16>
    %cst_185 = arith.constant dense<0.000000e+00> : vector<16x128xf32>
    %948 = tpu.matmul %947, %4, %cst_185 {dimension_numbers = #tpu.dot_dimension_numbers<[1], [0], [0], [1], [0, 0, 1, 1], [], []>} : vector<16x32xbf16>, vector<32x128xbf16>, vector<16x128xf32> -> vector<16x128xf32>
    %949 = vector.broadcast %5 : vector<1x128xf32> to vector<16x128xf32>
    %950 = arith.addf %948, %949 : vector<16x128xf32>
    %951 = tpu.iota {dimensions = array<i32: 1>} : vector<16x128xi32>
    %c10_i32_186 = arith.constant 10 : i32
    %952 = vector.broadcast %c10_i32_186 : i32 to vector<16x128xi32>
    %953 = arith.cmpi slt, %951, %952 : vector<16x128xi32>
    %cst_187 = arith.constant -1.000000e+30 : f32
    %954 = vector.broadcast %cst_187 : f32 to vector<16x128xf32>
    %955 = arith.select %953, %950, %954 : vector<16x128xi1>, vector<16x128xf32>
    %cst_188 = arith.constant dense<0xFF800000> : vector<16xf32>
    %956 = vector.multi_reduction <maximumf>, %955, %cst_188 [1] : vector<16x128xf32> to vector<16xf32>
    %957 = vector.shape_cast %956 : vector<16xf32> to vector<16x1xf32>
    %958 = vector.shape_cast %957 : vector<16x1xf32> to vector<16x1xf32>
    %959 = vector.broadcast %958 : vector<16x1xf32> to vector<16x128xf32>
    %960 = arith.select %953, %950, %959 : vector<16x128xi1>, vector<16x128xf32>
    %961 = vector.broadcast %957 : vector<16x1xf32> to vector<16x128xf32>
    %962 = arith.subf %960, %961 : vector<16x128xf32>
    %963 = math.exp %962 : vector<16x128xf32>
    %cst_189 = arith.constant 0.000000e+00 : f32
    %964 = vector.broadcast %cst_189 : f32 to vector<16x128xf32>
    %965 = arith.select %953, %963, %964 : vector<16x128xi1>, vector<16x128xf32>
    %cst_190 = arith.constant dense<0.000000e+00> : vector<16xf32>
    %966 = vector.multi_reduction <add>, %965, %cst_190 [1] : vector<16x128xf32> to vector<16xf32>
    %967 = vector.shape_cast %966 : vector<16xf32> to vector<16x1xf32>
    %968 = tpu.reciprocal %967 {approx = true} : vector<16x1xf32> -> vector<16x1xf32>
    %969 = arith.mulf %967, %968 : vector<16x1xf32>
    %cst_191 = arith.constant 2.000000e+00 : f32
    %970 = vector.broadcast %cst_191 : f32 to vector<16x1xf32>
    %971 = arith.subf %970, %969 : vector<16x1xf32>
    %972 = arith.mulf %968, %971 : vector<16x1xf32>
    %973 = vector.broadcast %972 : vector<16x1xf32> to vector<16x128xf32>
    %974 = arith.mulf %965, %973 : vector<16x128xf32>
    %975 = vector.extract_strided_slice %950 {offsets = [0, 10], sizes = [16, 1], strides = [1, 1]} : vector<16x128xf32> to vector<16x1xf32>
    %c10_i32_192 = arith.constant 10 : i32
    %976 = vector.broadcast %c10_i32_192 : i32 to vector<16x128xi32>
    %977 = arith.cmpi eq, %951, %976 : vector<16x128xi32>
    %978 = vector.shape_cast %975 : vector<16x1xf32> to vector<16x1xf32>
    %979 = vector.broadcast %978 : vector<16x1xf32> to vector<16x128xf32>
    %980 = arith.select %977, %979, %974 : vector<16x128xi1>, vector<16x128xf32>
    %c11_i32 = arith.constant 11 : i32
    %981 = vector.broadcast %c11_i32 : i32 to vector<16x128xi32>
    %982 = arith.cmpi eq, %951, %981 : vector<16x128xi32>
    %983 = vector.shape_cast %946 : vector<16x1xf32> to vector<16x1xf32>
    %984 = vector.broadcast %983 : vector<16x1xf32> to vector<16x128xf32>
    %985 = arith.select %982, %984, %980 : vector<16x128xi1>, vector<16x128xf32>
    %986 = vector.shape_cast %985 : vector<16x128xf32> to vector<2x8x128xf32>
    %c0_193 = arith.constant 0 : index
    %c0_194 = arith.constant 0 : index
    %c0_195 = arith.constant 0 : index
    %987 = vector.load %arg9[%c0_193, %c0_194, %c0_195] : memref<2x8x128xf32, #tpu.memory_space<vmem>>, vector<2x8x128xf32>
    tpu.vector_store %arg9[%c0_193, %c0_194, %c0_195], %986 {strides = array<i32>} : memref<2x8x128xf32, #tpu.memory_space<vmem>>, vector<2x8x128xf32>,
    return
  }
}

</mosaic_0001>

<bundles_post_ra>
// kernel: tpu_custom_call.1
= control target key start
LH: loop header
LB: loop body
LE: loop exit
PB: predicated region body
PF: predicated region fallthrough
CT: control target
= control target key end

     0   :  { %14 = vsyncpa [#allocation3], 0  ;;  %s5428_s0 = inlined_call_operand.vmem [shape: f32[8,2,128], index: 0, kind: input, shape index: {}]   ;;  %s5429_s1 = inlined_call_operand.vmem [shape: f32[2,2,32], index: 1, kind: input, shape index: {}]   ;;  %s5430_s2 = inlined_call_operand.vmem [shape: f32[2,2,32], index: 2, kind: input, shape index: {}]   ;;  %s5431_s3 = inlined_call_operand.vmem [shape: bf16[128,32], index: 3, kind: input, shape index: {}]   ;;  %s5432_s4 = inlined_call_operand.hbm [shape: f32[4,32], index: 4, kind: input, shape index: {}]   ;;  %s5433_s5 = inlined_call_operand.vmem [shape: bf16[2,64,128], index: 5, kind: input, shape index: {}]   ;;  %s5434_s6 = inlined_call_operand.vmem [shape: f32[2,128], index: 6, kind: input, shape index: {}]   ;;  %s5435_s7 = inlined_call_operand.hbm [shape: bf16[32,128], index: 7, kind: input, shape index: {}]   ;;  %s5436_s8 = inlined_call_operand.vmem [shape: f32[1,128], index: 8, kind: input, shape index: {}]   ;;  %s5437_s9 = inlined_call_operand.hbm [shape: f32[2,8,128], index: 9, kind: output, shape index: {}]  }
   0x1   :  { %15 = vsyncpa [#allocation6], 0 }
   0x2   :  { %16 = vsyncpa [#allocation4], 0  ;;  %s4079_s30 = smov [#allocation2]   ;;  %s4080_s11 = smov [#allocation5]  }
   0x3   :  { %s31_s10 = sshll.u32 %s4079_s30, 4  ;;  %s44_s12 = sshll.u32 %s4080_s11, 4  ;;  %s32_s10 = int_to_ptr.vmem [resolvable:$true] %s31_s10  ;;  %s45_s12 = int_to_ptr.vmem [resolvable:$true] %s44_s12 }
   0x4   :  { %s4021_s13 = scalar_lea.vmem %s32_s10, 64  ;;  %p4026_p1 = scmp.lt.s32.totalorder %s32_s10, %s32_s10 }
   0x5   :  { %p4022_p0 = scmp.ne.s32.totalorder %s32_s10, %s4021_s13  ;;  %p4027_p2 = scmp.lt.s32.totalorder %s4021_s13, %s4021_s13 }
   0x7   :  { %p4028_p3 = por %p4027_p2, %p4026_p1 }
   0x9   :  { %p4029_p4 = pnand %p4028_p3, %p4022_p0 }
   0xb   :  { %4032 = shalt.err (!%p4029_p4)
}
   0xc   :  { %34 = dma.hbm_to_vmem [thread:$0]  %s5432_s4, 64, %s32_s10, [#allocation3]  }
   0xd   :  { %s4041_s16 = scalar_lea.vmem %s45_s12, 256  ;;  %p4046_p6 = scmp.lt.s32.totalorder %s45_s12, %s45_s12 }
   0xe   :  { %p4042_p5 = scmp.ne.s32.totalorder %s45_s12, %s4041_s16  ;;  %p4047_p7 = scmp.lt.s32.totalorder %s4041_s16, %s4041_s16 }
  0x10   :  { %p4048_p8 = por %p4047_p7, %p4046_p6 }
  0x12   :  { %p4049_p9 = pnand %p4048_p8, %p4042_p5 }
  0x14   :  { %4052 = shalt.err (!%p4049_p9)
}
  0x15   :  { %s4081_s17 = smov 64   ;;  %s4082_s18 = smov 4  }
  0x16   :  { %50 = dma.hbm_to_vmem [thread:$0]  %s5435_s7, 256, %s45_s12, [#allocation6], %s4081_s17, %s4081_s17, %s4082_s18  }
  0x17   :  { %4073 = dma.done.wait [#allocation3], 64  }
  0x18   :  { %4074 = vsyncadd [#allocation3], 4294967232 }
  0x19   :  { %4075 = dma.done.wait [#allocation6], 256  }
  0x1a   :  { %4076 = vsyncadd [#allocation6], 4294967040  ;;  %v4083_v0 = vmov 0.0   ;;  %vm4084_vm0 = vmmov 0   ;;  %v4161_v1 = vld [vmem:[%s5431_s3 + $0x38] sm:$0xff]   ;;  %v4167_v2 = vld [vmem:[%s5431_s3 + $0x30] sm:$0xff]   ;;  %v113_v7 = vlaneseq }
  0x1b   :  { %3341 = vmatprep.subr.bf16.mxu0 %v4083_v0  ;;  %3357 = vmatprep.mubr.msk.bf16.mxu0 %vm4084_vm0, %v4083_v0  ;;  %v4174_v3 = vld [vmem:[%s5431_s3 + $0x28] sm:$0xff]   ;;  %v4180_v4 = vld [vmem:[%s5431_s3 + $0x20] sm:$0xff]   ;;  %v4188_v5 = vld [vmem:[%s5431_s3 + $0x18] sm:$0xff]   ;;  %v4085_v11 = vmov 1.0|1.0   ;;  %vm209_vm3 = vcmask 254976  }
  0x1c   :  { %3361 = vmatprep.subr.bf16.mxu1 %v4083_v0  ;;  %3369 = vmatprep.mubr.msk.bf16.mxu1 %vm4084_vm0, %v4083_v0  ;;  %v4195_v6 = vld [vmem:[%s5431_s3 + $0x10] sm:$0xff]   ;;  %v4202_v8 = vld [vmem:[%s5431_s3 + $0x8] sm:$0xff]   ;;  %v4205_v9 = vand.u32 127, %v113_v7  ;;  %v4211_v10 = vld [vmem:[%s5431_s3] sm:$0xff]   ;;  %s4086_s16 = smov 32   ;;  %v4258_v31 = vshrl.u32 %v113_v7, 7 }
  0x1d   :  { %3342 = vmatpush3.bf16.msra.mxu0 %v4161_v1  ;;  %v107_v17 = vld [vmem:[%s5429_s1] sm:$0x3]  ;;  %v4229_v23 = vld [vmem:[%s5433_s5 + $0x18] sm:$0xff]   ;;  %v4235_v24 = vld [vmem:[%s5433_s5 + $0x10] sm:$0xff]   ;;  %vm238_vm4 = vcmask 261120   ;;  %vm269_vm5 = vcmask 523264  }
  0x1e   :  { %3343 = vmatprep.subr.bf16.mxu0 %v4083_v0  ;;  %vm117_vm1 = vcmp.eq.s32.totalorder %v4205_v9, 0  ;;  %235 = vrot.lane.b32.xlu1 %v107_v17, %s4086_s16  ;;  %v4242_v25 = vld [vmem:[%s5433_s5 + $0x8] sm:$0xff]   ;;  %v4250_v26 = vld [vmem:[%s5433_s5] sm:$0xff]   ;;  %v4261_v32 = vsub.s32 0, %v4258_v31  ;;  %v4266_v34 = vsub.s32 1, %v4258_v31  ;;  %v4300_v62 = vld [vmem:[%s5433_s5 + $0x38] sm:$0xff]  }
  0x1f   :  { %vm3087_vm2 = vmpackc.low %vm117_vm1, %vm117_vm1  ;;  %3362 = vmatpush3.bf16.msra.mxu1 %v4229_v23  ;;  %v110_v27 = vld [vmem:[%s5430_s2] sm:$0x3]  ;;  %v4306_v63 = vld [vmem:[%s5433_s5 + $0x30] sm:$0xff]   ;;  %vm116_vm6 = vcmp.lt.s32.totalorder %v4205_v9, 10  ;;  %vm556_vm7 = vcmask 1041408   ;;  %vm2830_vm11 = vcmask 1040384  }
  0x20   :  { %3363 = vmatprep.subr.bf16.mxu1 %v4083_v0  ;;  %v4263_v33 = vld [vmem:[#allocation2] sm:$0xf]  ;;  %v4313_v7 = vld [vmem:[%s5433_s5 + $0x28] sm:$0xff]  }
  0x21   :  { %3344 = vmatpush3.bf16.msra.mxu0 %v4167_v2  ;;  %v4270_v35 = vrot.slane %v4263_v33, %v4261_v32  ;;  %v4274_v38 = vrot.slane %v4263_v33, %v4266_v34  ;;  %v4285_v44 = vld [vmem:[%s5434_s6] sm:$0x3] }
  0x22   :  { %3345 = vmatprep.subr.bf16.mxu0 %v4083_v0  ;;  %v4289_v45 = vrot.slane %v4285_v44, %v4261_v32 }
  0x23   :  { %3364 = vmatpush3.bf16.msra.mxu1 %v4235_v24 }
  0x24   :  { %3365 = vmatprep.subr.bf16.mxu1 %v4083_v0 }
  0x25   :  { %3346 = vmatpush3.bf16.msra.mxu0 %v4174_v3 }
  0x26   :  { %3347 = vmatprep.subr.bf16.mxu0 %v4083_v0 }
  0x27   :  { %3366 = vmatpush3.bf16.msra.mxu1 %v4242_v25 }
  0x28   :  { %3367 = vmatprep.subr.bf16.mxu1 %v4083_v0 }
  0x29   :  { %3348 = vmatpush3.bf16.msra.mxu0 %v4180_v4 }
  0x2a   :  { %3349 = vmatprep.subr.bf16.mxu0 %v4083_v0 }
  0x2b   :  { %3368 = vmatpush3.bf16.msra.mxu1 %v4250_v26 }
  0x2c   :  { %3373 = vmatprep.subr.bf16.mxu1 %v4083_v0 }
  0x2d   :  { %3350 = vmatpush3.bf16.msra.mxu0 %v4188_v5 }
  0x2e   :  { %3351 = vmatprep.subr.bf16.mxu0 %v4083_v0 }
  0x31   :  { %3352 = vmatpush3.bf16.msra.mxu0 %v4195_v6 }
  0x32   :  { %3353 = vmatprep.subr.bf16.mxu0 %v4083_v0 }
  0x35   :  { %3354 = vmatpush3.bf16.msra.mxu0 %v4202_v8 }
  0x36   :  { %3355 = vmatprep.subr.bf16.mxu0 %v4083_v0 }
  0x39   :  { %3356 = vmatpush3.bf16.msra.mxu0 %v4211_v10 }
  0x3a   :  { %3385 = vmatprep.subr.bf16.mxu0 %v4083_v0 }
  0x3c   :  { %3358 = vmatmul.mubr.msk.bf16.vlgmr.msra.gmra.mxu0 %vm3087_vm2, %v4085_v11 }
  0x3d   :  { %3389 = vmatprep.mubr.msk.bf16.mxu0 %vm4084_vm0, %v4083_v0 }
  0x90   :  { %v236_v40 = vpop.permute.xlu1 %235 }
  0xfc   :  { %v203_v12 = vpop.f32.mrf.mxu0 }
  0xfd   :  { %v210_v13 = vsel %vm209_vm3, %v203_v12, 0.0 }
  0xfe   :  { %211 = vadd.xlane.f32.xlu0 %v210_v13  ;;  %v3359_v14 = vpop.f32.mrf.mxu0  ;;  %v4322_v13 = vld [vmem:[%s5433_s5 + $0x20] sm:$0xff]  }
  0xff   :  { %v3076_v14 = vld [vmem:[%s5429_s1 + $0x2] sm:$0x3] }
 0x100   :  { %v206_v15 = vpop.f32.mrf.mxu0 }
 0x102   :  { %v3360_v16 = vpop.f32.mrf.mxu0 }
 0x187   :  { %v212_v18 = vpop.xlane.xlu0 %211 }
 0x188   :  { %v214_v19 = vmul.f32 0.03125, %v212_v18 }
 0x18a   :  { %v215_v20 = vsub.f32 %v203_v12, %v214_v19 }
 0x18c   :  { %v216_v21 = vmul.f32 %v215_v20, %v215_v20 }
 0x18e   :  { %v217_v22 = vsel %vm209_vm3, %v216_v21, 0.0 }
 0x18f   :  { %218 = vadd.xlane.f32.xlu0 %v217_v22 }
 0x1a5   :  { %321 = vrot.lane.b32.xlu0 %v110_v27, %s4086_s16  ;;  %v4355_v27 = vrot.slane %v4285_v44, %v4266_v34 }
 0x218   :  { %v219_v28 = vpop.xlane.xlu0 %218 }
 0x219   :  { %v220_v29 = vmul.f32 0.03125, %v219_v28 }
 0x21b   :  { %v221_v30 = vadd.f32 1e-05, %v220_v29 }
 0x21c   :  { %v322_v58 = vpop.permute.xlu0 %321 }
 0x21d   :  { %3807 = vrsqrt.f32 %v221_v30 }
 0x22a   :  { %v3808_v36 = vpop.eup %3807 }
 0x22b   :  { %v223_v37 = vmul.f32 %v3808_v36, %v215_v20 }
 0x22d   :  { %v228_v39 = vmul.f32 %v4270_v35, %v223_v37 }
 0x22f   :  { %v233_v41 = vadd.f32 %v4274_v38, %v228_v39 }
 0x231   :  { %v239_v42 = vsel %vm238_vm4, %v233_v41, %v236_v40  ;;  %v3077_v40 = vld [vmem:[%s5430_s2 + $0x2] sm:$0x3]  ;;  %s4087_s2 = smov 96  }
 0x232   :  { %v240_v43 = vpack.c.bf16 %v239_v42, %v239_v42 }
 0x234   :  { %3370 = vmatmul.mubr.msk.bf16.vlgmr.msra.gmra.mxu1 %vm269_vm5, %v240_v43 }
 0x235   :  { %3381 = vmatprep.mubr.msk.bf16.mxu1 %vm4084_vm0, %v4083_v0  ;;  %3374 = vmatpush3.bf16.msra.mxu1 %v4300_v62 }
 0x236   :  { %3375 = vmatprep.subr.bf16.mxu1 %v4083_v0 }
 0x239   :  { %3376 = vmatpush3.bf16.msra.mxu1 %v4306_v63 }
 0x23a   :  { %3377 = vmatprep.subr.bf16.mxu1 %v4083_v0 }
 0x23d   :  { %3378 = vmatpush3.bf16.msra.mxu1 %v4313_v7 }
 0x23e   :  { %3379 = vmatprep.subr.bf16.mxu1 %v4083_v0 }
 0x241   :  { %3380 = vmatpush3.bf16.msra.mxu1 %v4322_v13 }
 0x242   :  { %3393 = vmatprep.subr.bf16.mxu1 %v4083_v0 }
 0x2f4   :  { %v307_v46 = vpop.f32.mrf.mxu1 }
 0x2f5   :  { %v308_v47 = vadd.f32 %v307_v46, %v4289_v45 }
 0x2f6   :  { %v3371_v48 = vpop.f32.mrf.mxu1 }
 0x2f7   :  { %3809 = vtanh.f32 %v308_v47  ;;  %v3094_v52 = vmul.f32 -1.442695, %v308_v47 }
 0x2f8   :  { %v310_v49 = vpop.f32.mrf.mxu1 }
 0x2f9   :  { %3811 = vpow2.f32 %v3094_v52 }
 0x2fa   :  { %v3372_v50 = vpop.f32.mrf.mxu1 }
 0x304   :  { %v3810_v51 = vpop.eup %3809 }
 0x305   :  { %326 = vrot.lane.b32.xlu1 %v3810_v51, %s4081_s17 }
 0x306   :  { %v3812_v53 = vpop.eup %3811 }
 0x307   :  { %v316_v54 = vadd.f32 1.0, %v3812_v53 }
 0x309   :  { %3813 = vrcp.f32 %v316_v54 }
 0x316   :  { %v3814_v55 = vpop.eup %3813 }
 0x317   :  { %v324_v59 = vmul.f32 %v3814_v55, %v322_v58 }
 0x377   :  { %v327_v56 = vpop.permute.xlu1 %326 }
 0x378   :  { %v329_v57 = vmul.f32 %v3814_v55, %v327_v56 }
 0x37a   :  { %331 = vrot.lane.b32.xlu1 %v329_v57, %s4086_s16  ;;  %v473_v57 = vsub.s32 2, %v4258_v31 }
 0x37c   :  { %v474_v58 = vrot.slane %v4263_v33, %v473_v57 }
 0x3ec   :  { %v332_v60 = vpop.permute.xlu1 %331 }
 0x3ed   :  { %v4294_v61 = vadd.f32 %v332_v60, %v324_v59 }
 0x3ef   :  { %3815 = vtanh.f32 %v4294_v61 }
 0x3fc   :  { %v3816_v12 = vpop.eup %3815 }
 0x3fd   :  { %337 = vrot.lane.b32.xlu1 %v3816_v12, %s4081_s17 }
 0x46f   :  { %v338_v15 = vpop.permute.xlu1 %337 }
 0x470   :  { %v4329_v16 = vmul.f32 %v3814_v55, %v338_v15 }
 0x472   :  { %v3780_v17 = vpack.i.bf16 %v3076_v14, %v4329_v16 }
 0x474   :  { %3781 = vrot.lane.b32.xlu1 %v3780_v17, %s4086_s16 }
 0x4e6   :  { %v3782_v18 = vpop.permute.xlu1 %3781 }
 0x4e7   :  { %v3784_v19 = vunpack.i.h.bf16 %v3782_v18  ;;  %v3783_v20 = vunpack.i.l.bf16 %v3782_v18  ;;  %v482_v18 = vsub.s32 3, %v4258_v31 }
 0x4e9   :  { %v349_v21 = vsel %vm238_vm4, %v3783_v20, %v3784_v19  ;;  %v483_v19 = vrot.slane %v4263_v33, %v482_v18  ;;  %v4380_v20 = vld [vmem:[#allocation5 + $0x8] sm:$0xff]  }
 0x4ea   :  { %v350_v22 = vpack.c.bf16 %v349_v21, %v349_v21  ;;  %3386 = vmatpush3.bf16.msra.mxu0 %v4380_v20  ;;  %v4383_v21 = vld [vmem:[#allocation5] sm:$0xff]  }
 0x4eb   :  { %3387 = vmatprep.subr.bf16.mxu0 %v4083_v0 }
 0x4ec   :  { %3382 = vmatmul.mubr.msk.bf16.vlgmr.msra.gmra.mxu1 %vm269_vm5, %v350_v22 }
 0x4ed   :  { %3394 = vmatpush3.bf16.msra.mxu1 %v4161_v1  ;;  %3409 = vmatprep.mubr.msk.bf16.mxu1 %vm4084_vm0, %v4083_v0 }
 0x4ee   :  { %3395 = vmatprep.subr.bf16.mxu1 %v4083_v0  ;;  %3388 = vmatpush3.bf16.msra.mxu0 %v4383_v21 }
 0x4ef   :  { %3413 = vmatprep.subr.bf16.mxu0 %v4083_v0 }
 0x4f1   :  { %3396 = vmatpush3.bf16.msra.mxu1 %v4167_v2 }
 0x4f2   :  { %3397 = vmatprep.subr.bf16.mxu1 %v4083_v0 }
 0x4f5   :  { %3398 = vmatpush3.bf16.msra.mxu1 %v4174_v3 }
 0x4f6   :  { %3399 = vmatprep.subr.bf16.mxu1 %v4083_v0 }
 0x4f9   :  { %3400 = vmatpush3.bf16.msra.mxu1 %v4180_v4 }
 0x4fa   :  { %3401 = vmatprep.subr.bf16.mxu1 %v4083_v0 }
 0x4fd   :  { %3402 = vmatpush3.bf16.msra.mxu1 %v4188_v5 }
 0x4fe   :  { %3403 = vmatprep.subr.bf16.mxu1 %v4083_v0 }
 0x501   :  { %3404 = vmatpush3.bf16.msra.mxu1 %v4195_v6 }
 0x502   :  { %3405 = vmatprep.subr.bf16.mxu1 %v4083_v0 }
 0x505   :  { %3406 = vmatpush3.bf16.msra.mxu1 %v4202_v8 }
 0x506   :  { %3407 = vmatprep.subr.bf16.mxu1 %v4083_v0 }
 0x509   :  { %3408 = vmatpush3.bf16.msra.mxu1 %v4211_v10 }
 0x50a   :  { %3437 = vmatprep.subr.bf16.mxu1 %v4083_v0 }
 0x5ac   :  { %v416_v28 = vpop.f32.mrf.mxu1 }
 0x5ad   :  { %v417_v29 = vadd.f32 %v416_v28, %v4355_v27 }
 0x5ae   :  { %v3383_v30 = vpop.f32.mrf.mxu1 }
 0x5af   :  { %3817 = vtanh.f32 %v417_v29  ;;  %v3100_v41 = vmul.f32 -1.442695, %v417_v29 }
 0x5b0   :  { %v419_v36 = vpop.f32.mrf.mxu1 }
 0x5b1   :  { %3819 = vpow2.f32 %v3100_v41 }
 0x5b2   :  { %v3384_v37 = vpop.f32.mrf.mxu1 }
 0x5bc   :  { %v3818_v39 = vpop.eup %3817 }
 0x5bd   :  { %435 = vrot.lane.b32.xlu1 %v3818_v39, %s4081_s17 }
 0x5be   :  { %v3820_v42 = vpop.eup %3819 }
 0x5bf   :  { %v425_v43 = vadd.f32 1.0, %v3820_v42 }
 0x5c1   :  { %430 = vrot.lane.b32.xlu1 %v3077_v40, %s4086_s16  ;;  %3821 = vrcp.f32 %v425_v43  ;;  %v4413_v43 = vld [vmem:[%s5436_s8] ss:$0 sm:$0xff] }
 0x5ce   :  { %v3822_v44 = vpop.eup %3821 }
 0x62f   :  { %v436_v46 = vpop.permute.xlu1 %435 }
 0x630   :  { %v438_v47 = vmul.f32 %v3822_v44, %v436_v46 }
 0x632   :  { %440 = vrot.lane.b32.xlu1 %v438_v47, %s4086_s16 }
 0x633   :  { %v431_v48 = vpop.permute.xlu1 %430 }
 0x634   :  { %v433_v49 = vmul.f32 %v3822_v44, %v431_v48 }
 0x6a4   :  { %v441_v50 = vpop.permute.xlu1 %440 }
 0x6a5   :  { %v4364_v51 = vadd.f32 %v441_v50, %v433_v49 }
 0x6a7   :  { %3823 = vtanh.f32 %v4364_v51 }
 0x6b4   :  { %v3824_v52 = vpop.eup %3823 }
 0x6b5   :  { %446 = vrot.lane.b32.xlu0 %v3824_v52, %s4081_s17 }
 0x727   :  { %v447_v53 = vpop.permute.xlu0 %446 }
 0x728   :  { %v4368_v54 = vmul.f32 %v3822_v44, %v447_v53  ;;  %v99_v44 = vld [vmem:[%s5428_s0] sm:$0x3] }
 0x72a   :  { %451 = vrot.lane.b32.xlu1 %v4368_v54, %s4086_s16 }
 0x79c   :  { %v452_v55 = vpop.permute.xlu1 %451 }
 0x79d   :  { %v454_v56 = vsel %vm209_vm3, %v452_v55, 0.0 }
 0x79e   :  { %455 = vadd.xlane.f32.xlu0 %v454_v56  ;;  %v4424_v56 = vcvt.s32.f32 %v4205_v9 }
 0x7b4   :  { %476 = vrot.lane.b32.xlu0 %v474_v58, %s4087_s2 }
 0x827   :  { %v456_v59 = vpop.xlane.xlu0 %455 }
 0x828   :  { %v457_v60 = vmul.f32 0.03125, %v456_v59 }
 0x82a   :  { %v458_v12 = vsub.f32 %v4368_v54, %v457_v60 }
 0x82b   :  { %v4388_v36 = vpop.permute.xlu0 %476 }
 0x82c   :  { %v459_v14 = vmul.f32 %v458_v12, %v458_v12 }
 0x82e   :  { %461 = vrot.lane.b32.xlu1 %v459_v14, %s4086_s16 }
 0x8a0   :  { %v462_v15 = vpop.permute.xlu1 %461 }
 0x8a1   :  { %v464_v17 = vsel %vm209_vm3, %v462_v15, 0.0 }
 0x8a2   :  { %465 = vadd.xlane.f32.xlu1 %v464_v17 }
 0x8b3   :  { %485 = vrot.lane.b32.xlu1 %v483_v19, %s4087_s2 }
 0x92b   :  { %v466_v22 = vpop.xlane.xlu1 %465 }
 0x92c   :  { %v467_v28 = vmul.f32 0.03125, %v466_v22 }
 0x92e   :  { %v468_v29 = vadd.f32 1e-05, %v467_v28 }
 0x92f   :  { %v4390_v37 = vpop.permute.xlu1 %485 }
 0x930   :  { %3825 = vrsqrt.f32 %v468_v29 }
 0x93d   :  { %v3826_v30 = vpop.eup %3825 }
 0x93e   :  { %v470_v33 = vmul.f32 %v3826_v30, %v458_v12 }
 0x940   :  { %v479_v39 = vmul.f32 %v4388_v36, %v470_v33 }
 0x942   :  { %v4394_v40 = vadd.f32 %v4390_v37, %v479_v39 }
 0x944   :  { %v489_v41 = vpack.c.bf16 %v4394_v40, %v4394_v40 }
 0x946   :  { %497 = vrot.lane.b32.xlu0 %v489_v41, %s4086_s16 }
 0x9b8   :  { %v498_v42 = vpop.permute.xlu0 %497 }
 0x9b9   :  { %3390 = vmatmul.mubr.msk.bf16.vlgmr.msra.gmra.mxu0 %vm238_vm4, %v498_v42 }
 0x9ba   :  { %3414 = vmatpush3.bf16.msra.mxu0 %v4229_v23  ;;  %3421 = vmatprep.mubr.msk.bf16.mxu0 %vm4084_vm0, %v4083_v0 }
 0x9bb   :  { %3415 = vmatprep.subr.bf16.mxu0 %v4083_v0 }
 0x9be   :  { %3416 = vmatpush3.bf16.msra.mxu0 %v4235_v24 }
 0x9bf   :  { %3417 = vmatprep.subr.bf16.mxu0 %v4083_v0 }
 0x9c2   :  { %3418 = vmatpush3.bf16.msra.mxu0 %v4242_v25 }
 0x9c3   :  { %3419 = vmatprep.subr.bf16.mxu0 %v4083_v0 }
 0x9c6   :  { %3420 = vmatpush3.bf16.msra.mxu0 %v4250_v26 }
 0x9c7   :  { %3425 = vmatprep.subr.bf16.mxu0 %v4083_v0 }
 0xa79   :  { %v548_v46 = vpop.f32.mrf.mxu0 }
 0xa7a   :  { %v549_v47 = vadd.f32 %v4413_v43, %v548_v46 }
 0xa7b   :  { %v3391_v48 = vpop.f32.mrf.mxu0 }
 0xa7c   :  { %v554_v49 = vadd.f32 %v549_v47, %v99_v44 }
 0xa7d   :  { %v551_v50 = vpop.f32.mrf.mxu0 }
 0xa7e   :  { %v555_v52 = vsel %vm116_vm6, %v554_v49, -1e+30 }
 0xa7f   :  { %v3392_v53 = vpop.f32.mrf.mxu0  ;;  %v557_v55 = vsel %vm556_vm7, %v555_v52, -inf }
 0xa80   :  { %558 = vmax.xlane.f32.xlu0 %v557_v55 }
 0xb09   :  { %v559_v57 = vpop.xlane.xlu0 %558 }
 0xb0a   :  { %vm560_vm8 = vcmp.ge.f32.partialorder %v555_v52, %v559_v57 }
 0xb0b   :  { %v561_v58 = vsel %vm560_vm8, %v4424_v56, 256.0  ;;  %vm2835_vm8 = vcmask 1042432  }
 0xb0c   :  { %v562_v59 = vsel %vm556_vm7, %v561_v58, inf }
 0xb0d   :  { %563 = vmin.xlane.f32.xlu1 %v562_v59 }
 0xb1e   :  { %624 = vrot.lane.b32.xlu1 %v4329_v16, %s4081_s17 }
 0xb96   :  { %v4430_v60 = vpop.xlane.xlu1 %563 }
 0xb97   :  { %vm565_vm9 = vcmp.eq.f32.partialorder %v4424_v56, %v4430_v60 }
 0xb98   :  { %vm3106_vm10 = vmpackc.low %vm565_vm9, %vm565_vm9 }
 0xb99   :  { %3410 = vmatmul.mubr.msk.bf16.vlgmr.msra.gmra.mxu1 %vm3106_vm10, %v4085_v11 }
 0xb9a   :  { %3438 = vmatpush3.bf16.msra.mxu1 %v4380_v20  ;;  %3441 = vmatprep.mubr.msk.bf16.mxu1 %vm4084_vm0, %v4083_v0  ;;  %v625_v47 = vpop.permute.xlu1 %624 }
 0xb9b   :  { %3439 = vmatprep.subr.bf16.mxu1 %v4083_v0 }
 0xb9e   :  { %3440 = vmatpush3.bf16.msra.mxu1 %v4383_v21 }
 0xb9f   :  { %3465 = vmatprep.subr.bf16.mxu1 %v4083_v0 }
 0xc59   :  { %v603_v16 = vpop.f32.mrf.mxu1 }
 0xc5a   :  { %v609_v12 = vsel %vm209_vm3, %v603_v16, 0.0 }
 0xc5b   :  { %610 = vadd.xlane.f32.xlu0 %v609_v12  ;;  %v3411_v14 = vpop.f32.mrf.mxu1 }
 0xc5d   :  { %v606_v15 = vpop.f32.mrf.mxu1 }
 0xc5f   :  { %v3412_v17 = vpop.f32.mrf.mxu1 }
 0xce4   :  { %v611_v18 = vpop.xlane.xlu0 %610 }
 0xce5   :  { %v612_v19 = vmul.f32 0.03125, %v611_v18 }
 0xce7   :  { %v613_v22 = vsub.f32 %v603_v16, %v612_v19 }
 0xce9   :  { %v614_v28 = vmul.f32 %v613_v22, %v613_v22 }
 0xceb   :  { %v615_v29 = vsel %vm209_vm3, %v614_v28, 0.0 }
 0xcec   :  { %616 = vadd.xlane.f32.xlu0 %v615_v29 }
 0xd75   :  { %v617_v30 = vpop.xlane.xlu0 %616 }
 0xd76   :  { %v618_v33 = vmul.f32 0.03125, %v617_v30 }
 0xd78   :  { %v619_v39 = vadd.f32 1e-05, %v618_v33 }
 0xd7a   :  { %3827 = vrsqrt.f32 %v619_v39 }
 0xd87   :  { %v3828_v41 = vpop.eup %3827 }
 0xd88   :  { %v621_v42 = vmul.f32 %v3828_v41, %v613_v22 }
 0xd8a   :  { %v622_v44 = vmul.f32 %v621_v42, %v4270_v35 }
 0xd8c   :  { %v623_v46 = vadd.f32 %v622_v44, %v4274_v38 }
 0xd8e   :  { %v627_v48 = vsel %vm238_vm4, %v623_v46, %v625_v47 }
 0xd8f   :  { %v628_v49 = vpack.c.bf16 %v627_v48, %v627_v48 }
 0xd91   :  { %3422 = vmatmul.mubr.msk.bf16.vlgmr.msra.gmra.mxu0 %vm269_vm5, %v628_v49 }
 0xd92   :  { %3426 = vmatpush3.bf16.msra.mxu0 %v4300_v62  ;;  %3433 = vmatprep.mubr.msk.bf16.mxu0 %vm4084_vm0, %v4083_v0 }
 0xd93   :  { %3427 = vmatprep.subr.bf16.mxu0 %v4083_v0 }
 0xd96   :  { %3428 = vmatpush3.bf16.msra.mxu0 %v4306_v63 }
 0xd97   :  { %3429 = vmatprep.subr.bf16.mxu0 %v4083_v0 }
 0xd9a   :  { %3430 = vmatpush3.bf16.msra.mxu0 %v4313_v7 }
 0xd9b   :  { %3431 = vmatprep.subr.bf16.mxu0 %v4083_v0 }
 0xd9e   :  { %3432 = vmatpush3.bf16.msra.mxu0 %v4322_v13 }
 0xd9f   :  { %3445 = vmatprep.subr.bf16.mxu0 %v4083_v0 }
 0xe51   :  { %v666_v50 = vpop.f32.mrf.mxu0 }
 0xe52   :  { %v667_v52 = vadd.f32 %v666_v50, %v4289_v45 }
 0xe53   :  { %v3423_v53 = vpop.f32.mrf.mxu0 }
 0xe54   :  { %3829 = vtanh.f32 %v667_v52  ;;  %v3109_v59 = vmul.f32 -1.442695, %v667_v52 }
 0xe55   :  { %v669_v55 = vpop.f32.mrf.mxu0 }
 0xe56   :  { %3831 = vpow2.f32 %v3109_v59 }
 0xe57   :  { %v3424_v57 = vpop.f32.mrf.mxu0 }
 0xe61   :  { %v3830_v58 = vpop.eup %3829 }
 0xe62   :  { %681 = vrot.lane.b32.xlu0 %v3830_v58, %s4081_s17 }
 0xe63   :  { %v3832_v16 = vpop.eup %3831 }
 0xe64   :  { %v675_v12 = vadd.f32 1.0, %v3832_v16 }
 0xe66   :  { %3833 = vrcp.f32 %v675_v12 }
 0xe73   :  { %v3834_v14 = vpop.eup %3833 }
 0xe74   :  { %v679_v18 = vmul.f32 %v3834_v14, %v4294_v61 }
 0xed4   :  { %v682_v15 = vpop.permute.xlu0 %681 }
 0xed5   :  { %v684_v17 = vmul.f32 %v3834_v14, %v682_v15 }
 0xed7   :  { %686 = vrot.lane.b32.xlu1 %v684_v17, %s4086_s16 }
 0xf49   :  { %v687_v19 = vpop.permute.xlu1 %686 }
 0xf4a   :  { %v4461_v22 = vadd.f32 %v687_v19, %v679_v18 }
 0xf4c   :  { %3835 = vtanh.f32 %v4461_v22 }
 0xf59   :  { %v3836_v28 = vpop.eup %3835 }
 0xf5a   :  { %692 = vrot.lane.b32.xlu1 %v3836_v28, %s4081_s17 }
 0xf5e   :  { %700 = vrot.lane.b32.xlu1 %v4368_v54, %s4081_s17 }
 0xfcc   :  { %v693_v29 = vpop.permute.xlu1 %692 }
 0xfcd   :  { %v4467_v30 = vmul.f32 %v3834_v14, %v693_v29 }
 0xfcf   :  { %697 = vrot.lane.b32.xlu0 %v4467_v30, %s4086_s16 }
 0xfd0   :  { %v701_v33 = vpop.permute.xlu1 %700 }
0x1041   :  { %v698_v39 = vpop.permute.xlu0 %697 }
0x1042   :  { %v703_v61 = vsel %vm238_vm4, %v698_v39, %v701_v33  ;;  %v4088_v39 = vmov 1966171168  }
0x1043   :  { %v704_v41 = vpack.c.bf16 %v703_v61, %v703_v61  ;;  %v2576_v61 = vunpack.c.l.s4 %v4088_v39 }
0x1045   :  { %3434 = vmatmul.mubr.msk.bf16.vlgmr.msra.gmra.mxu0 %vm269_vm5, %v704_v41  ;;  %v2577_v41 = vunpack.c.0.s8 %v2576_v61 }
0x1046   :  { %3446 = vmatpush3.bf16.msra.mxu0 %v4161_v1  ;;  %3461 = vmatprep.mubr.msk.bf16.mxu0 %vm4084_vm0, %v4083_v0 }
0x1047   :  { %3447 = vmatprep.subr.bf16.mxu0 %v4083_v0 }
0x104a   :  { %3448 = vmatpush3.bf16.msra.mxu0 %v4167_v2 }
0x104b   :  { %3449 = vmatprep.subr.bf16.mxu0 %v4083_v0 }
0x104e   :  { %3450 = vmatpush3.bf16.msra.mxu0 %v4174_v3 }
0x104f   :  { %3451 = vmatprep.subr.bf16.mxu0 %v4083_v0 }
0x1052   :  { %3452 = vmatpush3.bf16.msra.mxu0 %v4180_v4 }
0x1053   :  { %3453 = vmatprep.subr.bf16.mxu0 %v4083_v0 }
0x1056   :  { %3454 = vmatpush3.bf16.msra.mxu0 %v4188_v5 }
0x1057   :  { %3455 = vmatprep.subr.bf16.mxu0 %v4083_v0 }
0x105a   :  { %3456 = vmatpush3.bf16.msra.mxu0 %v4195_v6 }
0x105b   :  { %3457 = vmatprep.subr.bf16.mxu0 %v4083_v0 }
0x105e   :  { %3458 = vmatpush3.bf16.msra.mxu0 %v4202_v8 }
0x105f   :  { %3459 = vmatprep.subr.bf16.mxu0 %v4083_v0 }
0x1062   :  { %3460 = vmatpush3.bf16.msra.mxu0 %v4211_v10 }
0x1063   :  { %3489 = vmatprep.subr.bf16.mxu0 %v4083_v0 }
0x1105   :  { %v742_v1 = vpop.f32.mrf.mxu0 }
0x1106   :  { %v743_v2 = vadd.f32 %v742_v1, %v4355_v27 }
0x1107   :  { %v3435_v3 = vpop.f32.mrf.mxu0 }
0x1108   :  { %3837 = vtanh.f32 %v743_v2  ;;  %v3111_v44 = vmul.f32 -1.442695, %v743_v2  ;;  %v4508_v2 = vsub.s32 %v2577_v41, %v4258_v31 }
0x1109   :  { %v745_v4 = vpop.f32.mrf.mxu0 }
0x110a   :  { %3839 = vpow2.f32 %v3111_v44 }
0x110b   :  { %v3436_v54 = vpop.f32.mrf.mxu0 }
0x110c   :  { %v2581_v54 = vrot.slane %v4394_v40, %v4508_v2 }
0x110e   :  { %v2589_v31 = vrot.slane %v2581_v54, %v4508_v2 }
0x1115   :  { %v3838_v42 = vpop.eup %3837 }
0x1116   :  { %757 = vrot.lane.b32.xlu0 %v3838_v42, %s4081_s17 }
0x1117   :  { %v3840_v46 = vpop.eup %3839 }
0x1118   :  { %v751_v47 = vadd.f32 1.0, %v3840_v46 }
0x111a   :  { %3841 = vrcp.f32 %v751_v47  ;;  %v2582_v47 = vcombine.high %v2581_v54, %v2581_v54 }
0x111c   :  { %v2596_v40 = vrot.slane %v2582_v47, %v4508_v2 }
0x1127   :  { %v3842_v48 = vpop.eup %3841 }
0x1128   :  { %v755_v52 = vmul.f32 %v3842_v48, %v4364_v51 }
0x1188   :  { %v758_v49 = vpop.permute.xlu0 %757 }
0x1189   :  { %v760_v50 = vmul.f32 %v3842_v48, %v758_v49 }
0x118b   :  { %762 = vrot.lane.b32.xlu1 %v760_v50, %s4086_s16 }
0x11fd   :  { %v763_v53 = vpop.permute.xlu1 %762 }
0x11fe   :  { %v4495_v55 = vadd.f32 %v763_v53, %v755_v52 }
0x1200   :  { %3843 = vtanh.f32 %v4495_v55 }
0x120d   :  { %v3844_v57 = vpop.eup %3843 }
0x120e   :  { %768 = vrot.lane.b32.xlu0 %v3844_v57, %s4081_s17 }
0x1280   :  { %v769_v58 = vpop.permute.xlu0 %768 }
0x1281   :  { %v4499_v59 = vmul.f32 %v3842_v48, %v769_v58 }
0x1283   :  { %773 = vrot.lane.b32.xlu1 %v4499_v59, %s4086_s16 }
0x12f5   :  { %v774_v16 = vpop.permute.xlu1 %773 }
0x12f6   :  { %v776_v12 = vsel %vm209_vm3, %v774_v16, 0.0 }
0x12f7   :  { %777 = vadd.xlane.f32.xlu0 %v776_v12 }
0x1380   :  { %v778_v14 = vpop.xlane.xlu0 %777 }
0x1381   :  { %v779_v51 = vmul.f32 0.03125, %v778_v14 }
0x1383   :  { %v780_v15 = vsub.f32 %v4499_v59, %v779_v51 }
0x1385   :  { %v781_v17 = vmul.f32 %v780_v15, %v780_v15 }
0x1387   :  { %783 = vrot.lane.b32.xlu1 %v781_v17, %s4086_s16 }
0x13f9   :  { %v784_v18 = vpop.permute.xlu1 %783 }
0x13fa   :  { %v786_v19 = vsel %vm209_vm3, %v784_v18, 0.0 }
0x13fb   :  { %787 = vadd.xlane.f32.xlu1 %v786_v19 }
0x1484   :  { %v788_v28 = vpop.xlane.xlu1 %787 }
0x1485   :  { %v789_v29 = vmul.f32 0.03125, %v788_v28 }
0x1487   :  { %v790_v33 = vadd.f32 1e-05, %v789_v29 }
0x1489   :  { %3845 = vrsqrt.f32 %v790_v33 }
0x1496   :  { %v3846_v1 = vpop.eup %3845 }
0x1497   :  { %v792_v3 = vmul.f32 %v3846_v1, %v780_v15 }
0x1499   :  { %v793_v4 = vmul.f32 %v792_v3, %v4388_v36 }
0x149b   :  { %v794_v42 = vadd.f32 %v793_v4, %v4390_v37 }
0x149d   :  { %v795_v44 = vpack.c.bf16 %v794_v42, %v794_v42  ;;  %v2606_v46 = vrot.slane %v794_v42, %v4508_v2 }
0x149f   :  { %v2607_v48 = vcombine.high %v2606_v46, %v2606_v46  ;;  %v2614_v49 = vrot.slane %v2606_v46, %v4508_v2  ;;  %797 = vrot.lane.b32.xlu0 %v795_v44, %s4086_s16 }
0x14a1   :  { %v2621_v50 = vrot.slane %v2607_v48, %v4508_v2  ;;  %v2763_v52 = vrot.slane %v2614_v49, %v4261_v32 }
0x14a3   :  { %v2767_v53 = vrot.slane %v2621_v50, %v4261_v32  ;;  %v4523_v57 = vsel %vm2830_vm11, %v2589_v31, %v2763_v52 }
0x14a5   :  { %v4526_v58 = vsel %vm2830_vm11, %v2596_v40, %v2767_v53 }
0x1511   :  { %v798_v16 = vpop.permute.xlu0 %797 }
0x1512   :  { %3442 = vmatmul.mubr.msk.bf16.vlgmr.msra.gmra.mxu1 %vm238_vm4, %v798_v16 }
0x1513   :  { %3466 = vmatpush3.bf16.msra.mxu1 %v4229_v23  ;;  %3473 = vmatprep.mubr.msk.bf16.mxu1 %vm4084_vm0, %v4083_v0  ;;  %v100_v23 = vld [vmem:[%s5428_s0 + $0x2] sm:$0x3] }
0x1514   :  { %3467 = vmatprep.subr.bf16.mxu1 %v4083_v0 }
0x1517   :  { %3468 = vmatpush3.bf16.msra.mxu1 %v4235_v24 }
0x1518   :  { %3469 = vmatprep.subr.bf16.mxu1 %v4083_v0 }
0x151b   :  { %3470 = vmatpush3.bf16.msra.mxu1 %v4242_v25 }
0x151c   :  { %3471 = vmatprep.subr.bf16.mxu1 %v4083_v0 }
0x151f   :  { %3472 = vmatpush3.bf16.msra.mxu1 %v4250_v26 }
0x1520   :  { %3477 = vmatprep.subr.bf16.mxu1 %v4083_v0 }
0x15d2   :  { %v836_v12 = vpop.f32.mrf.mxu1 }
0x15d3   :  { %v837_v14 = vadd.f32 %v4413_v43, %v836_v12 }
0x15d4   :  { %v3443_v51 = vpop.f32.mrf.mxu1 }
0x15d5   :  { %v842_v15 = vadd.f32 %v837_v14, %v100_v23 }
0x15d6   :  { %v839_v24 = vpop.f32.mrf.mxu1 }
0x15d7   :  { %v843_v17 = vsel %vm116_vm6, %v842_v15, -1e+30 }
0x15d8   :  { %v3444_v25 = vpop.f32.mrf.mxu1  ;;  %v844_v18 = vsel %vm556_vm7, %v843_v17, -inf }
0x15d9   :  { %845 = vmax.xlane.f32.xlu1 %v844_v18 }
0x1662   :  { %v846_v26 = vpop.xlane.xlu1 %845 }
0x1663   :  { %vm847_vm12 = vcmp.ge.f32.partialorder %v843_v17, %v846_v26 }
0x1664   :  { %v848_v19 = vsel %vm847_vm12, %v4424_v56, 256.0 }
0x1665   :  { %v849_v28 = vsel %vm556_vm7, %v848_v19, inf }
0x1666   :  { %850 = vmin.xlane.f32.xlu1 %v849_v28 }
0x16ef   :  { %v4548_v29 = vpop.xlane.xlu1 %850 }
0x16f0   :  { %vm852_vm13 = vcmp.eq.f32.partialorder %v4424_v56, %v4548_v29 }
0x16f1   :  { %vm3114_vm14 = vmpackc.low %vm852_vm13, %vm852_vm13  ;;  %vm2838_vm13 = vcmask 1043456  }
0x16f2   :  { %3462 = vmatmul.mubr.msk.bf16.vlgmr.msra.gmra.mxu0 %vm3114_vm14, %v4085_v11 }
0x16f3   :  { %3490 = vmatpush3.bf16.msra.mxu0 %v4380_v20  ;;  %3493 = vmatprep.mubr.msk.bf16.mxu0 %vm4084_vm0, %v4083_v0 }
0x16f4   :  { %3491 = vmatprep.subr.bf16.mxu0 %v4083_v0 }
0x16f7   :  { %3492 = vmatpush3.bf16.msra.mxu0 %v4383_v21 }
0x16f8   :  { %3517 = vmatprep.subr.bf16.mxu0 %v4083_v0 }
0x17b2   :  { %v890_v33 = vpop.f32.mrf.mxu0 }
0x17b3   :  { %v896_v39 = vsel %vm209_vm3, %v890_v33, 0.0 }
0x17b4   :  { %897 = vadd.xlane.f32.xlu1 %v896_v39  ;;  %v3463_v61 = vpop.f32.mrf.mxu0 }
0x17b6   :  { %v893_v41 = vpop.f32.mrf.mxu0 }
0x17b8   :  { %v3464_v1 = vpop.f32.mrf.mxu0 }
0x17b9   :  { %v4605_v1 = vld [vmem:[%s5431_s3 + $0x30] sm:$0xff]  }
0x17c5   :  { %911 = vrot.lane.b32.xlu1 %v4467_v30, %s4081_s17 }
0x183d   :  { %v898_v3 = vpop.xlane.xlu1 %897 }
0x183e   :  { %v899_v4 = vmul.f32 0.03125, %v898_v3  ;;  %v4612_v3 = vld [vmem:[%s5431_s3 + $0x28] sm:$0xff]  }
0x1840   :  { %v900_v54 = vsub.f32 %v890_v33, %v899_v4  ;;  %v4619_v4 = vld [vmem:[%s5431_s3 + $0x20] sm:$0xff]  }
0x1841   :  { %v912_v52 = vpop.permute.xlu1 %911 }
0x1842   :  { %v901_v42 = vmul.f32 %v900_v54, %v900_v54 }
0x1844   :  { %v902_v44 = vsel %vm209_vm3, %v901_v42, 0.0 }
0x1845   :  { %903 = vadd.xlane.f32.xlu0 %v902_v44 }
0x185b   :  { %987 = vrot.lane.b32.xlu0 %v4499_v59, %s4081_s17 }
0x18ce   :  { %v904_v46 = vpop.xlane.xlu0 %903 }
0x18cf   :  { %v905_v47 = vmul.f32 0.03125, %v904_v46 }
0x18d1   :  { %v906_v48 = vadd.f32 1e-05, %v905_v47 }
0x18d2   :  { %v988_v33 = vpop.permute.xlu0 %987 }
0x18d3   :  { %3847 = vrsqrt.f32 %v906_v48 }
0x18e0   :  { %v3848_v49 = vpop.eup %3847 }
0x18e1   :  { %v908_v31 = vmul.f32 %v3848_v49, %v900_v54 }
0x18e3   :  { %v909_v50 = vmul.f32 %v908_v31, %v4270_v35 }
0x18e5   :  { %v910_v30 = vadd.f32 %v909_v50, %v4274_v38 }
0x18e7   :  { %v914_v40 = vsel %vm238_vm4, %v910_v30, %v912_v52 }
0x18e8   :  { %v915_v53 = vpack.c.bf16 %v914_v40, %v914_v40 }
0x18ea   :  { %3474 = vmatmul.mubr.msk.bf16.vlgmr.msra.gmra.mxu1 %vm269_vm5, %v915_v53 }
0x18eb   :  { %3478 = vmatpush3.bf16.msra.mxu1 %v4300_v62  ;;  %3485 = vmatprep.mubr.msk.bf16.mxu1 %vm4084_vm0, %v4083_v0 }
0x18ec   :  { %3479 = vmatprep.subr.bf16.mxu1 %v4083_v0 }
0x18ef   :  { %3480 = vmatpush3.bf16.msra.mxu1 %v4306_v63 }
0x18f0   :  { %3481 = vmatprep.subr.bf16.mxu1 %v4083_v0 }
0x18f3   :  { %3482 = vmatpush3.bf16.msra.mxu1 %v4313_v7 }
0x18f4   :  { %3483 = vmatprep.subr.bf16.mxu1 %v4083_v0 }
0x18f7   :  { %3484 = vmatpush3.bf16.msra.mxu1 %v4322_v13 }
0x18f8   :  { %3497 = vmatprep.subr.bf16.mxu1 %v4083_v0 }
0x19aa   :  { %v953_v59 = vpop.f32.mrf.mxu1 }
0x19ab   :  { %v954_v62 = vadd.f32 %v953_v59, %v4289_v45 }
0x19ac   :  { %v3475_v16 = vpop.f32.mrf.mxu1 }
0x19ad   :  { %3849 = vtanh.f32 %v954_v62  ;;  %v3117_v63 = vmul.f32 -1.442695, %v954_v62 }
0x19ae   :  { %v956_v23 = vpop.f32.mrf.mxu1 }
0x19af   :  { %3851 = vpow2.f32 %v3117_v63 }
0x19b0   :  { %v3476_v12 = vpop.f32.mrf.mxu1 }
0x19ba   :  { %v3850_v14 = vpop.eup %3849 }
0x19bb   :  { %968 = vrot.lane.b32.xlu1 %v3850_v14, %s4081_s17 }
0x19bc   :  { %v3852_v51 = vpop.eup %3851 }
0x19bd   :  { %v962_v7 = vadd.f32 1.0, %v3852_v51 }
0x19bf   :  { %3853 = vrcp.f32 %v962_v7 }
0x19cc   :  { %v3854_v15 = vpop.eup %3853 }
0x19cd   :  { %v966_v17 = vmul.f32 %v3854_v15, %v4461_v22  ;;  %v4596_v22 = vld [vmem:[%s5431_s3 + $0x38] sm:$0xff]  }
0x1a2d   :  { %v969_v24 = vpop.permute.xlu1 %968 }
0x1a2e   :  { %v971_v13 = vmul.f32 %v3854_v15, %v969_v24 }
0x1a30   :  { %973 = vrot.lane.b32.xlu1 %v971_v13, %s4086_s16 }
0x1aa2   :  { %v974_v25 = vpop.permute.xlu1 %973 }
0x1aa3   :  { %v4583_v18 = vadd.f32 %v974_v25, %v966_v17 }
0x1aa5   :  { %3855 = vtanh.f32 %v4583_v18 }
0x1ab2   :  { %v3856_v26 = vpop.eup %3855 }
0x1ab3   :  { %979 = vrot.lane.b32.xlu1 %v3856_v26, %s4081_s17 }
0x1b25   :  { %v980_v19 = vpop.permute.xlu1 %979 }
0x1b26   :  { %v4587_v28 = vmul.f32 %v3854_v15, %v980_v19 }
0x1b28   :  { %984 = vrot.lane.b32.xlu1 %v4587_v28, %s4086_s16 }
0x1b9a   :  { %v985_v39 = vpop.permute.xlu1 %984 }
0x1b9b   :  { %v990_v61 = vsel %vm238_vm4, %v985_v39, %v988_v33 }
0x1b9c   :  { %v991_v41 = vpack.c.bf16 %v990_v61, %v990_v61 }
0x1b9e   :  { %3486 = vmatmul.mubr.msk.bf16.vlgmr.msra.gmra.mxu1 %vm269_vm5, %v991_v41 }
0x1b9f   :  { %3498 = vmatpush3.bf16.msra.mxu1 %v4596_v22  ;;  %3513 = vmatprep.mubr.msk.bf16.mxu1 %vm4084_vm0, %v4083_v0 }
0x1ba0   :  { %3499 = vmatprep.subr.bf16.mxu1 %v4083_v0 }
0x1ba3   :  { %3500 = vmatpush3.bf16.msra.mxu1 %v4605_v1 }
0x1ba4   :  { %3501 = vmatprep.subr.bf16.mxu1 %v4083_v0 }
0x1ba7   :  { %3502 = vmatpush3.bf16.msra.mxu1 %v4612_v3 }
0x1ba8   :  { %3503 = vmatprep.subr.bf16.mxu1 %v4083_v0 }
0x1bab   :  { %3504 = vmatpush3.bf16.msra.mxu1 %v4619_v4 }
0x1bac   :  { %3505 = vmatprep.subr.bf16.mxu1 %v4083_v0 }
0x1baf   :  { %3506 = vmatpush3.bf16.msra.mxu1 %v4188_v5 }
0x1bb0   :  { %3507 = vmatprep.subr.bf16.mxu1 %v4083_v0 }
0x1bb3   :  { %3508 = vmatpush3.bf16.msra.mxu1 %v4195_v6 }
0x1bb4   :  { %3509 = vmatprep.subr.bf16.mxu1 %v4083_v0 }
0x1bb7   :  { %3510 = vmatpush3.bf16.msra.mxu1 %v4202_v8 }
0x1bb8   :  { %3511 = vmatprep.subr.bf16.mxu1 %v4083_v0 }
0x1bbb   :  { %3512 = vmatpush3.bf16.msra.mxu1 %v4211_v10 }
0x1bbc   :  { %3541 = vmatprep.subr.bf16.mxu1 %v4083_v0 }
0x1c5e   :  { %v1029_v54 = vpop.f32.mrf.mxu1 }
0x1c5f   :  { %v1030_v42 = vadd.f32 %v1029_v54, %v4355_v27 }
0x1c60   :  { %v3487_v44 = vpop.f32.mrf.mxu1 }
0x1c61   :  { %3857 = vtanh.f32 %v1030_v42  ;;  %v3119_v6 = vmul.f32 -1.442695, %v1030_v42 }
0x1c62   :  { %v1032_v5 = vpop.f32.mrf.mxu1 }
0x1c63   :  { %3859 = vpow2.f32 %v3119_v6  ;;  %v101_v6 = vld [vmem:[%s5428_s0 + $0x4] sm:$0x3] }
0x1c64   :  { %v3488_v46 = vpop.f32.mrf.mxu1 }
0x1c6e   :  { %v3858_v47 = vpop.eup %3857 }
0x1c6f   :  { %1044 = vrot.lane.b32.xlu1 %v3858_v47, %s4081_s17  ;;  %v4669_v47 = vld [vmem:[%s5433_s5 + $0x18] sm:$0xff]  }
0x1c70   :  { %v3860_v48 = vpop.eup %3859 }
0x1c71   :  { %v1038_v8 = vadd.f32 1.0, %v3860_v48 }
0x1c73   :  { %3861 = vrcp.f32 %v1038_v8 }
0x1c80   :  { %v3862_v49 = vpop.eup %3861 }
0x1c81   :  { %v1042_v50 = vmul.f32 %v3862_v49, %v4495_v55 }
0x1ce1   :  { %v1045_v31 = vpop.permute.xlu1 %1044 }
0x1ce2   :  { %v1047_v10 = vmul.f32 %v3862_v49, %v1045_v31 }
0x1ce4   :  { %1049 = vrot.lane.b32.xlu1 %v1047_v10, %s4086_s16 }
0x1d56   :  { %v1050_v30 = vpop.permute.xlu1 %1049 }
0x1d57   :  { %v4635_v52 = vadd.f32 %v1050_v30, %v1042_v50 }
0x1d59   :  { %3863 = vtanh.f32 %v4635_v52 }
0x1d66   :  { %v3864_v40 = vpop.eup %3863 }
0x1d67   :  { %1055 = vrot.lane.b32.xlu1 %v3864_v40, %s4081_s17 }
0x1dd9   :  { %v1056_v53 = vpop.permute.xlu1 %1055 }
0x1dda   :  { %v4639_v59 = vmul.f32 %v3862_v49, %v1056_v53 }
0x1ddc   :  { %1060 = vrot.lane.b32.xlu1 %v4639_v59, %s4086_s16 }
0x1e4e   :  { %v1061_v62 = vpop.permute.xlu1 %1060 }
0x1e4f   :  { %v1063_v16 = vsel %vm209_vm3, %v1061_v62, 0.0 }
0x1e50   :  { %1064 = vadd.xlane.f32.xlu1 %v1063_v16 }
0x1ed9   :  { %v1065_v23 = vpop.xlane.xlu1 %1064 }
0x1eda   :  { %v1066_v55 = vmul.f32 0.03125, %v1065_v23 }
0x1edc   :  { %v1067_v12 = vsub.f32 %v4639_v59, %v1066_v55 }
0x1ede   :  { %v1068_v14 = vmul.f32 %v1067_v12, %v1067_v12 }
0x1ee0   :  { %1070 = vrot.lane.b32.xlu0 %v1068_v14, %s4086_s16 }
0x1f52   :  { %v1071_v63 = vpop.permute.xlu0 %1070 }
0x1f53   :  { %v1073_v51 = vsel %vm209_vm3, %v1071_v63, 0.0 }
0x1f54   :  { %1074 = vadd.xlane.f32.xlu0 %v1073_v51 }
0x1fdd   :  { %v1075_v7 = vpop.xlane.xlu0 %1074 }
0x1fde   :  { %v1076_v15 = vmul.f32 0.03125, %v1075_v7 }
0x1fe0   :  { %v1077_v24 = vadd.f32 1e-05, %v1076_v15 }
0x1fe2   :  { %3865 = vrsqrt.f32 %v1077_v24 }
0x1fef   :  { %v3866_v13 = vpop.eup %3865 }
0x1ff0   :  { %v1079_v17 = vmul.f32 %v3866_v13, %v1067_v12 }
0x1ff2   :  { %v1080_v25 = vmul.f32 %v1079_v17, %v4388_v36 }
0x1ff4   :  { %v1081_v26 = vadd.f32 %v1080_v25, %v4390_v37 }
0x1ff6   :  { %v1082_v19 = vpack.c.bf16 %v1081_v26, %v1081_v26  ;;  %v2629_v33 = vrot.slane %v1081_v26, %v4508_v2 }
0x1ff8   :  { %v2630_v39 = vcombine.high %v2629_v33, %v2629_v33  ;;  %v2637_v61 = vrot.slane %v2629_v33, %v4508_v2  ;;  %1084 = vrot.lane.b32.xlu1 %v1082_v19, %s4086_s16 }
0x1ffa   :  { %v2644_v41 = vrot.slane %v2630_v39, %v4508_v2  ;;  %v2773_v54 = vrot.slane %v2637_v61, %v4261_v32 }
0x1ffc   :  { %v2777_v42 = vrot.slane %v2644_v41, %v4261_v32  ;;  %1198 = vrot.lane.b32.xlu1 %v4587_v28, %s4081_s17  ;;  %v4659_v44 = vsel %vm556_vm7, %v4523_v57, %v2773_v54  ;;  %v4678_v57 = vld [vmem:[%s5433_s5 + $0x10] sm:$0xff]   ;;  %v4692_v28 = vld [vmem:[%s5433_s5] sm:$0xff]   ;;  %v4725_v54 = vld [vmem:[%s5433_s5 + $0x38] sm:$0xff]  }
0x1ffe   :  { %v4663_v5 = vsel %vm556_vm7, %v4526_v58, %v2777_v42  ;;  %v4685_v58 = vld [vmem:[%s5433_s5 + $0x8] sm:$0xff]   ;;  %v4734_v42 = vld [vmem:[%s5433_s5 + $0x30] sm:$0xff]  }
0x206a   :  { %v1085_v46 = vpop.permute.xlu1 %1084 }
0x206b   :  { %3494 = vmatmul.mubr.msk.bf16.vlgmr.msra.gmra.mxu0 %vm238_vm4, %v1085_v46  ;;  %v4741_v46 = vld [vmem:[%s5433_s5 + $0x28] sm:$0xff]  }
0x206c   :  { %3518 = vmatpush3.bf16.msra.mxu0 %v4669_v47  ;;  %3525 = vmatprep.mubr.msk.bf16.mxu0 %vm4084_vm0, %v4083_v0 }
0x206d   :  { %3519 = vmatprep.subr.bf16.mxu0 %v4083_v0 }
0x206e   :  { %v1199_v39 = vpop.permute.xlu1 %1198 }
0x2070   :  { %3520 = vmatpush3.bf16.msra.mxu0 %v4678_v57 }
0x2071   :  { %3521 = vmatprep.subr.bf16.mxu0 %v4083_v0 }
0x2074   :  { %3522 = vmatpush3.bf16.msra.mxu0 %v4685_v58 }
0x2075   :  { %3523 = vmatprep.subr.bf16.mxu0 %v4083_v0 }
0x2078   :  { %3524 = vmatpush3.bf16.msra.mxu0 %v4692_v28 }
0x2079   :  { %3529 = vmatprep.subr.bf16.mxu0 %v4083_v0 }
0x212b   :  { %v1123_v48 = vpop.f32.mrf.mxu0 }
0x212c   :  { %v1124_v8 = vadd.f32 %v4413_v43, %v1123_v48 }
0x212d   :  { %v3495_v49 = vpop.f32.mrf.mxu0 }
0x212e   :  { %v1129_v31 = vadd.f32 %v1124_v8, %v101_v6  ;;  %v4748_v6 = vld [vmem:[%s5433_s5 + $0x20] sm:$0xff]  }
0x212f   :  { %v1126_v10 = vpop.f32.mrf.mxu0 }
0x2130   :  { %v1130_v50 = vsel %vm116_vm6, %v1129_v31, -1e+30 }
0x2131   :  { %v3496_v30 = vpop.f32.mrf.mxu0  ;;  %v1131_v40 = vsel %vm556_vm7, %v1130_v50, -inf }
0x2132   :  { %1132 = vmax.xlane.f32.xlu0 %v1131_v40 }
0x21bb   :  { %v1133_v53 = vpop.xlane.xlu0 %1132 }
0x21bc   :  { %vm1134_vm15 = vcmp.ge.f32.partialorder %v1130_v50, %v1133_v53 }
0x21bd   :  { %v1135_v62 = vsel %vm1134_vm15, %v4424_v56, 256.0 }
0x21be   :  { %v1136_v16 = vsel %vm556_vm7, %v1135_v62, inf }
0x21bf   :  { %1137 = vmin.xlane.f32.xlu0 %v1136_v16 }
0x2248   :  { %v4705_v23 = vpop.xlane.xlu0 %1137 }
0x2249   :  { %vm1139_vm1 = vcmp.eq.f32.partialorder %v4424_v56, %v4705_v23 }
0x224a   :  { %vm3122_vm2 = vmpackc.low %vm1139_vm1, %vm1139_vm1 }
0x224b   :  { %3514 = vmatmul.mubr.msk.bf16.vlgmr.msra.gmra.mxu1 %vm3122_vm2, %v4085_v11  ;;  %vm2841_vm2 = vcmask 1044480  }
0x224c   :  { %3542 = vmatpush3.bf16.msra.mxu1 %v4380_v20  ;;  %3545 = vmatprep.mubr.msk.bf16.mxu1 %vm4084_vm0, %v4083_v0 }
0x224d   :  { %3543 = vmatprep.subr.bf16.mxu1 %v4083_v0 }
0x2250   :  { %3544 = vmatpush3.bf16.msra.mxu1 %v4383_v21 }
0x2251   :  { %3569 = vmatprep.subr.bf16.mxu1 %v4083_v0 }
0x230b   :  { %v1177_v43 = vpop.f32.mrf.mxu1 }
0x230c   :  { %v1183_v55 = vsel %vm209_vm3, %v1177_v43, 0.0 }
0x230d   :  { %1184 = vadd.xlane.f32.xlu0 %v1183_v55  ;;  %v3515_v12 = vpop.f32.mrf.mxu1 }
0x230f   :  { %v1180_v14 = vpop.f32.mrf.mxu1 }
0x2311   :  { %v3516_v63 = vpop.f32.mrf.mxu1 }
0x2396   :  { %v1185_v51 = vpop.xlane.xlu0 %1184 }
0x2397   :  { %v1186_v7 = vmul.f32 0.03125, %v1185_v51 }
0x2399   :  { %v1187_v15 = vsub.f32 %v1177_v43, %v1186_v7 }
0x239b   :  { %v1188_v20 = vmul.f32 %v1187_v15, %v1187_v15 }
0x239d   :  { %v1189_v24 = vsel %vm209_vm3, %v1188_v20, 0.0 }
0x239e   :  { %1190 = vadd.xlane.f32.xlu0 %v1189_v24 }
0x2427   :  { %v1191_v13 = vpop.xlane.xlu0 %1190 }
0x2428   :  { %v1192_v17 = vmul.f32 0.03125, %v1191_v13  ;;  %v4788_v13 = vld [vmem:[%s5431_s3 + $0x10] sm:$0xff]  }
0x242a   :  { %v1193_v25 = vadd.f32 1e-05, %v1192_v17  ;;  %v4795_v17 = vld [vmem:[%s5431_s3 + $0x8] sm:$0xff]  }
0x242c   :  { %3867 = vrsqrt.f32 %v1193_v25  ;;  %v4802_v25 = vld [vmem:[%s5431_s3] sm:$0xff]  }
0x2439   :  { %v3868_v21 = vpop.eup %3867 }
0x243a   :  { %v1195_v26 = vmul.f32 %v3868_v21, %v1187_v15 }
0x243c   :  { %v1196_v19 = vmul.f32 %v1195_v26, %v4270_v35 }
0x243e   :  { %v1197_v33 = vadd.f32 %v1196_v19, %v4274_v38 }
0x2440   :  { %v1201_v61 = vsel %vm238_vm4, %v1197_v33, %v1199_v39 }
0x2441   :  { %v1202_v41 = vpack.c.bf16 %v1201_v61, %v1201_v61 }
0x2443   :  { %3526 = vmatmul.mubr.msk.bf16.vlgmr.msra.gmra.mxu0 %vm269_vm5, %v1202_v41 }
0x2444   :  { %3530 = vmatpush3.bf16.msra.mxu0 %v4725_v54  ;;  %3537 = vmatprep.mubr.msk.bf16.mxu0 %vm4084_vm0, %v4083_v0 }
0x2445   :  { %3531 = vmatprep.subr.bf16.mxu0 %v4083_v0 }
0x2448   :  { %3532 = vmatpush3.bf16.msra.mxu0 %v4734_v42 }
0x2449   :  { %3533 = vmatprep.subr.bf16.mxu0 %v4083_v0 }
0x244c   :  { %3534 = vmatpush3.bf16.msra.mxu0 %v4741_v46 }
0x244d   :  { %3535 = vmatprep.subr.bf16.mxu0 %v4083_v0 }
0x2450   :  { %3536 = vmatpush3.bf16.msra.mxu0 %v4748_v6 }
0x2451   :  { %3549 = vmatprep.subr.bf16.mxu0 %v4083_v0 }
0x2503   :  { %v1240_v48 = vpop.f32.mrf.mxu0 }
0x2504   :  { %v1241_v8 = vadd.f32 %v1240_v48, %v4289_v45 }
0x2505   :  { %v3527_v49 = vpop.f32.mrf.mxu0 }
0x2506   :  { %3869 = vtanh.f32 %v1241_v8  ;;  %v3125_v30 = vmul.f32 -1.442695, %v1241_v8 }
0x2507   :  { %v1243_v31 = vpop.f32.mrf.mxu0 }
0x2508   :  { %3871 = vpow2.f32 %v3125_v30 }
0x2509   :  { %v3528_v10 = vpop.f32.mrf.mxu0 }
0x2513   :  { %v3870_v50 = vpop.eup %3869 }
0x2514   :  { %1255 = vrot.lane.b32.xlu0 %v3870_v50, %s4081_s17 }
0x2515   :  { %v3872_v40 = vpop.eup %3871 }
0x2516   :  { %v1249_v53 = vadd.f32 1.0, %v3872_v40 }
0x2518   :  { %3873 = vrcp.f32 %v1249_v53 }
0x2525   :  { %v3874_v62 = vpop.eup %3873 }
0x2526   :  { %v1253_v55 = vmul.f32 %v3874_v62, %v4583_v18 }
0x2586   :  { %v1256_v16 = vpop.permute.xlu0 %1255 }
0x2587   :  { %v1258_v43 = vmul.f32 %v3874_v62, %v1256_v16 }
0x2589   :  { %1260 = vrot.lane.b32.xlu1 %v1258_v43, %s4086_s16 }
0x25fb   :  { %v1261_v12 = vpop.permute.xlu1 %1260 }
0x25fc   :  { %v4756_v14 = vadd.f32 %v1261_v12, %v1253_v55 }
0x25fe   :  { %3875 = vtanh.f32 %v4756_v14 }
0x260b   :  { %v3876_v63 = vpop.eup %3875 }
0x260c   :  { %1266 = vrot.lane.b32.xlu1 %v3876_v63, %s4081_s17 }
0x267e   :  { %v1267_v51 = vpop.permute.xlu1 %1266 }
0x267f   :  { %v4760_v7 = vmul.f32 %v3874_v62, %v1267_v51 }
0x2681   :  { %1271 = vrot.lane.b32.xlu1 %v4760_v7, %s4086_s16 }
0x2685   :  { %1274 = vrot.lane.b32.xlu1 %v4639_v59, %s4081_s17  ;;  %v4781_v59 = vld [vmem:[%s5431_s3 + $0x18] sm:$0xff]  }
0x26f3   :  { %v1272_v15 = vpop.permute.xlu1 %1271 }
0x26f7   :  { %v1275_v20 = vpop.permute.xlu1 %1274 }
0x26f8   :  { %v1277_v18 = vsel %vm238_vm4, %v1272_v15, %v1275_v20 }
0x26f9   :  { %v1278_v24 = vpack.c.bf16 %v1277_v18, %v1277_v18 }
0x26fb   :  { %3538 = vmatmul.mubr.msk.bf16.vlgmr.msra.gmra.mxu0 %vm269_vm5, %v1278_v24 }
0x26fc   :  { %3550 = vmatpush3.bf16.msra.mxu0 %v4596_v22  ;;  %3565 = vmatprep.mubr.msk.bf16.mxu0 %vm4084_vm0, %v4083_v0 }
0x26fd   :  { %3551 = vmatprep.subr.bf16.mxu0 %v4083_v0 }
0x2700   :  { %3552 = vmatpush3.bf16.msra.mxu0 %v4605_v1 }
0x2701   :  { %3553 = vmatprep.subr.bf16.mxu0 %v4083_v0 }
0x2704   :  { %3554 = vmatpush3.bf16.msra.mxu0 %v4612_v3 }
0x2705   :  { %3555 = vmatprep.subr.bf16.mxu0 %v4083_v0 }
0x2708   :  { %3556 = vmatpush3.bf16.msra.mxu0 %v4619_v4 }
0x2709   :  { %3557 = vmatprep.subr.bf16.mxu0 %v4083_v0 }
0x270c   :  { %3558 = vmatpush3.bf16.msra.mxu0 %v4781_v59 }
0x270d   :  { %3559 = vmatprep.subr.bf16.mxu0 %v4083_v0 }
0x2710   :  { %3560 = vmatpush3.bf16.msra.mxu0 %v4788_v13 }
0x2711   :  { %3561 = vmatprep.subr.bf16.mxu0 %v4083_v0 }
0x2714   :  { %3562 = vmatpush3.bf16.msra.mxu0 %v4795_v17 }
0x2715   :  { %3563 = vmatprep.subr.bf16.mxu0 %v4083_v0 }
0x2718   :  { %3564 = vmatpush3.bf16.msra.mxu0 %v4802_v25 }
0x2719   :  { %3593 = vmatprep.subr.bf16.mxu0 %v4083_v0 }
0x27bb   :  { %v1316_v21 = vpop.f32.mrf.mxu0 }
0x27bc   :  { %v1317_v26 = vadd.f32 %v1316_v21, %v4355_v27 }
0x27bd   :  { %v3539_v19 = vpop.f32.mrf.mxu0 }
0x27be   :  { %3877 = vtanh.f32 %v1317_v26  ;;  %v3127_v41 = vmul.f32 -1.442695, %v1317_v26 }
0x27bf   :  { %v1319_v33 = vpop.f32.mrf.mxu0 }
0x27c0   :  { %3879 = vpow2.f32 %v3127_v41 }
0x27c1   :  { %v3540_v39 = vpop.f32.mrf.mxu0 }
0x27cb   :  { %v3878_v61 = vpop.eup %3877 }
0x27cc   :  { %1331 = vrot.lane.b32.xlu1 %v3878_v61, %s4081_s17 }
0x27cd   :  { %v3880_v48 = vpop.eup %3879 }
0x27ce   :  { %v1325_v8 = vadd.f32 1.0, %v3880_v48 }
0x27d0   :  { %3881 = vrcp.f32 %v1325_v8 }
0x27dd   :  { %v3882_v49 = vpop.eup %3881 }
0x27de   :  { %v1329_v50 = vmul.f32 %v3882_v49, %v4635_v52 }
0x283e   :  { %v1332_v31 = vpop.permute.xlu1 %1331 }
0x283f   :  { %v1334_v10 = vmul.f32 %v3882_v49, %v1332_v31 }
0x2841   :  { %1336 = vrot.lane.b32.xlu0 %v1334_v10, %s4086_s16 }
0x28b3   :  { %v1337_v30 = vpop.permute.xlu0 %1336 }
0x28b4   :  { %v4810_v40 = vadd.f32 %v1337_v30, %v1329_v50 }
0x28b6   :  { %3883 = vtanh.f32 %v4810_v40 }
0x28c3   :  { %v3884_v53 = vpop.eup %3883 }
0x28c4   :  { %1342 = vrot.lane.b32.xlu1 %v3884_v53, %s4081_s17 }
0x2936   :  { %v1343_v62 = vpop.permute.xlu1 %1342 }
0x2937   :  { %v4814_v16 = vmul.f32 %v3882_v49, %v1343_v62 }
0x2939   :  { %1347 = vrot.lane.b32.xlu0 %v4814_v16, %s4086_s16 }
0x29ab   :  { %v1348_v43 = vpop.permute.xlu0 %1347 }
0x29ac   :  { %v1350_v55 = vsel %vm209_vm3, %v1348_v43, 0.0 }
0x29ad   :  { %1351 = vadd.xlane.f32.xlu1 %v1350_v55 }
0x2a36   :  { %v1352_v12 = vpop.xlane.xlu1 %1351 }
0x2a37   :  { %v1353_v52 = vmul.f32 0.03125, %v1352_v12 }
0x2a39   :  { %v1354_v63 = vsub.f32 %v4814_v16, %v1353_v52 }
0x2a3b   :  { %v1355_v51 = vmul.f32 %v1354_v63, %v1354_v63 }
0x2a3d   :  { %1357 = vrot.lane.b32.xlu0 %v1355_v51, %s4086_s16 }
0x2aaf   :  { %v1358_v15 = vpop.permute.xlu0 %1357 }
0x2ab0   :  { %v1360_v20 = vsel %vm209_vm3, %v1358_v15, 0.0 }
0x2ab1   :  { %1361 = vadd.xlane.f32.xlu0 %v1360_v20 }
0x2b3a   :  { %v1362_v18 = vpop.xlane.xlu0 %1361 }
0x2b3b   :  { %v1363_v24 = vmul.f32 0.03125, %v1362_v18 }
0x2b3d   :  { %v1364_v21 = vadd.f32 1e-05, %v1363_v24 }
0x2b3f   :  { %3885 = vrsqrt.f32 %v1364_v21  ;;  %v4870_v21 = vld [vmem:[#allocation5 + $0x8] sm:$0xff]  }
0x2b4c   :  { %v3886_v26 = vpop.eup %3885 }
0x2b4d   :  { %v1366_v19 = vmul.f32 %v3886_v26, %v1354_v63  ;;  %v4876_v26 = vld [vmem:[#allocation5] sm:$0xff]  }
0x2b4f   :  { %v1367_v33 = vmul.f32 %v1366_v19, %v4388_v36 }
0x2b51   :  { %v1368_v39 = vadd.f32 %v1367_v33, %v4390_v37 }
0x2b53   :  { %v1369_v61 = vpack.c.bf16 %v1368_v39, %v1368_v39  ;;  %v2652_v41 = vrot.slane %v1368_v39, %v4508_v2 }
0x2b55   :  { %v2653_v48 = vcombine.high %v2652_v41, %v2652_v41  ;;  %v2660_v8 = vrot.slane %v2652_v41, %v4508_v2  ;;  %1371 = vrot.lane.b32.xlu1 %v1369_v61, %s4086_s16 }
0x2b57   :  { %v2667_v49 = vrot.slane %v2653_v48, %v4508_v2  ;;  %v2783_v31 = vrot.slane %v2660_v8, %v4261_v32 }
0x2b59   :  { %v2787_v10 = vrot.slane %v2667_v49, %v4261_v32  ;;  %1485 = vrot.lane.b32.xlu1 %v4760_v7, %s4081_s17  ;;  %v4834_v50 = vsel %vm2835_vm8, %v4659_v44, %v2783_v31  ;;  %v102_v44 = vld [vmem:[%s5428_s0 + $0x6] sm:$0x3]  ;;  %v4857_v7 = vld [vmem:[%s5436_s8] ss:$0 sm:$0xff] }
0x2b5b   :  { %v4838_v30 = vsel %vm2835_vm8, %v4663_v5, %v2787_v10 }
0x2bc7   :  { %v1372_v53 = vpop.permute.xlu1 %1371 }
0x2bc8   :  { %3546 = vmatmul.mubr.msk.bf16.vlgmr.msra.gmra.mxu1 %vm238_vm4, %v1372_v53 }
0x2bc9   :  { %3570 = vmatpush3.bf16.msra.mxu1 %v4669_v47  ;;  %3577 = vmatprep.mubr.msk.bf16.mxu1 %vm4084_vm0, %v4083_v0 }
0x2bca   :  { %3571 = vmatprep.subr.bf16.mxu1 %v4083_v0 }
0x2bcd   :  { %3572 = vmatpush3.bf16.msra.mxu1 %v4678_v57 }
0x2bce   :  { %3573 = vmatprep.subr.bf16.mxu1 %v4083_v0 }
0x2bd1   :  { %3574 = vmatpush3.bf16.msra.mxu1 %v4685_v58 }
0x2bd2   :  { %3575 = vmatprep.subr.bf16.mxu1 %v4083_v0 }
0x2bd5   :  { %3576 = vmatpush3.bf16.msra.mxu1 %v4692_v28 }
0x2bd6   :  { %3581 = vmatprep.subr.bf16.mxu1 %v4083_v0 }
0x2c88   :  { %v1410_v5 = vpop.f32.mrf.mxu1 }
0x2c89   :  { %v1411_v62 = vadd.f32 %v4857_v7, %v1410_v5 }
0x2c8a   :  { %v3547_v43 = vpop.f32.mrf.mxu1 }
0x2c8b   :  { %v1416_v55 = vadd.f32 %v1411_v62, %v102_v44 }
0x2c8c   :  { %v1413_v12 = vpop.f32.mrf.mxu1 }
0x2c8d   :  { %v1417_v52 = vsel %vm116_vm6, %v1416_v55, -1e+30 }
0x2c8e   :  { %v3548_v63 = vpop.f32.mrf.mxu1  ;;  %v1418_v51 = vsel %vm556_vm7, %v1417_v52, -inf }
0x2c8f   :  { %1419 = vmax.xlane.f32.xlu0 %v1418_v51 }
0x2d18   :  { %v1420_v15 = vpop.xlane.xlu0 %1419 }
0x2d19   :  { %vm1421_vm9 = vcmp.ge.f32.partialorder %v1417_v52, %v1420_v15  ;;  %v1486_v52 = vpop.permute.xlu1 %1485 }
0x2d1a   :  { %v1422_v20 = vsel %vm1421_vm9, %v4424_v56, 256.0 }
0x2d1b   :  { %v1423_v18 = vsel %vm556_vm7, %v1422_v20, inf }
0x2d1c   :  { %1424 = vmin.xlane.f32.xlu0 %v1423_v18 }
0x2da5   :  { %v4865_v24 = vpop.xlane.xlu0 %1424 }
0x2da6   :  { %vm1426_vm10 = vcmp.eq.f32.partialorder %v4424_v56, %v4865_v24 }
0x2da7   :  { %vm3130_vm12 = vmpackc.low %vm1426_vm10, %vm1426_vm10 }
0x2da8   :  { %3566 = vmatmul.mubr.msk.bf16.vlgmr.msra.gmra.mxu0 %vm3130_vm12, %v4085_v11 }
0x2da9   :  { %3594 = vmatpush3.bf16.msra.mxu0 %v4870_v21  ;;  %3597 = vmatprep.mubr.msk.bf16.mxu0 %vm4084_vm0, %v4083_v0 }
0x2daa   :  { %3595 = vmatprep.subr.bf16.mxu0 %v4083_v0 }
0x2dad   :  { %3596 = vmatpush3.bf16.msra.mxu0 %v4876_v26 }
0x2dae   :  { %3621 = vmatprep.subr.bf16.mxu0 %v4083_v0 }
0x2e68   :  { %v1464_v19 = vpop.f32.mrf.mxu0 }
0x2e69   :  { %v1470_v33 = vsel %vm209_vm3, %v1464_v19, 0.0 }
0x2e6a   :  { %1471 = vadd.xlane.f32.xlu0 %v1470_v33  ;;  %v3567_v39 = vpop.f32.mrf.mxu0 }
0x2e6c   :  { %v1467_v61 = vpop.f32.mrf.mxu0 }
0x2e6e   :  { %v3568_v41 = vpop.f32.mrf.mxu0 }
0x2ef3   :  { %v1472_v48 = vpop.xlane.xlu0 %1471 }
0x2ef4   :  { %v1473_v8 = vmul.f32 0.03125, %v1472_v48 }
0x2ef6   :  { %v1474_v49 = vsub.f32 %v1464_v19, %v1473_v8 }
0x2ef8   :  { %v1475_v31 = vmul.f32 %v1474_v49, %v1474_v49 }
0x2efa   :  { %v1476_v10 = vsel %vm209_vm3, %v1475_v31, 0.0 }
0x2efb   :  { %1477 = vadd.xlane.f32.xlu0 %v1476_v10 }
0x2f84   :  { %v1478_v53 = vpop.xlane.xlu0 %1477 }
0x2f85   :  { %v1479_v44 = vmul.f32 0.03125, %v1478_v53 }
0x2f87   :  { %v1480_v5 = vadd.f32 1e-05, %v1479_v44 }
0x2f89   :  { %3887 = vrsqrt.f32 %v1480_v5 }
0x2f96   :  { %v3888_v62 = vpop.eup %3887 }
0x2f97   :  { %v1482_v43 = vmul.f32 %v3888_v62, %v1474_v49 }
0x2f99   :  { %v1483_v55 = vmul.f32 %v1482_v43, %v4270_v35 }
0x2f9b   :  { %v1484_v12 = vadd.f32 %v1483_v55, %v4274_v38 }
0x2f9d   :  { %v1488_v63 = vsel %vm238_vm4, %v1484_v12, %v1486_v52 }
0x2f9e   :  { %v1489_v51 = vpack.c.bf16 %v1488_v63, %v1488_v63 }
0x2fa0   :  { %3578 = vmatmul.mubr.msk.bf16.vlgmr.msra.gmra.mxu1 %vm269_vm5, %v1489_v51 }
0x2fa1   :  { %3582 = vmatpush3.bf16.msra.mxu1 %v4725_v54  ;;  %3589 = vmatprep.mubr.msk.bf16.mxu1 %vm4084_vm0, %v4083_v0 }
0x2fa2   :  { %3583 = vmatprep.subr.bf16.mxu1 %v4083_v0 }
0x2fa5   :  { %3584 = vmatpush3.bf16.msra.mxu1 %v4734_v42 }
0x2fa6   :  { %3585 = vmatprep.subr.bf16.mxu1 %v4083_v0 }
0x2fa9   :  { %3586 = vmatpush3.bf16.msra.mxu1 %v4741_v46 }
0x2faa   :  { %3587 = vmatprep.subr.bf16.mxu1 %v4083_v0 }
0x2fad   :  { %3588 = vmatpush3.bf16.msra.mxu1 %v4748_v6 }
0x2fae   :  { %3601 = vmatprep.subr.bf16.mxu1 %v4083_v0 }
0x3060   :  { %v1527_v15 = vpop.f32.mrf.mxu1 }
0x3061   :  { %v1528_v20 = vadd.f32 %v1527_v15, %v4289_v45 }
0x3062   :  { %v3579_v18 = vpop.f32.mrf.mxu1 }
0x3063   :  { %3889 = vtanh.f32 %v1528_v20  ;;  %v3133_v61 = vmul.f32 -1.442695, %v1528_v20 }
0x3064   :  { %v1530_v19 = vpop.f32.mrf.mxu1 }
0x3065   :  { %3891 = vpow2.f32 %v3133_v61 }
0x3066   :  { %v3580_v33 = vpop.f32.mrf.mxu1 }
0x3070   :  { %v3890_v39 = vpop.eup %3889 }
0x3071   :  { %1542 = vrot.lane.b32.xlu0 %v3890_v39, %s4081_s17 }
0x3072   :  { %v3892_v41 = vpop.eup %3891 }
0x3073   :  { %v1536_v48 = vadd.f32 1.0, %v3892_v41 }
0x3075   :  { %3893 = vrcp.f32 %v1536_v48 }
0x3082   :  { %v3894_v8 = vpop.eup %3893 }
0x3083   :  { %v1540_v10 = vmul.f32 %v3894_v8, %v4756_v14 }
0x30e3   :  { %v1543_v49 = vpop.permute.xlu0 %1542 }
0x30e4   :  { %v1545_v31 = vmul.f32 %v3894_v8, %v1543_v49 }
0x30e6   :  { %1547 = vrot.lane.b32.xlu1 %v1545_v31, %s4086_s16 }
0x3158   :  { %v1548_v53 = vpop.permute.xlu1 %1547 }
0x3159   :  { %v4900_v44 = vadd.f32 %v1548_v53, %v1540_v10 }
0x315b   :  { %3895 = vtanh.f32 %v4900_v44 }
0x3168   :  { %v3896_v5 = vpop.eup %3895 }
0x3169   :  { %1553 = vrot.lane.b32.xlu1 %v3896_v5, %s4081_s17 }
0x31db   :  { %v1554_v62 = vpop.permute.xlu1 %1553 }
0x31dc   :  { %v4904_v43 = vmul.f32 %v3894_v8, %v1554_v62 }
0x31de   :  { %1558 = vrot.lane.b32.xlu1 %v4904_v43, %s4086_s16 }
0x31e2   :  { %1561 = vrot.lane.b32.xlu1 %v4814_v16, %s4081_s17 }
0x3250   :  { %v1559_v55 = vpop.permute.xlu1 %1558 }
0x3254   :  { %v1562_v12 = vpop.permute.xlu1 %1561 }
0x3255   :  { %v1564_v14 = vsel %vm238_vm4, %v1559_v55, %v1562_v12 }
0x3256   :  { %v1565_v52 = vpack.c.bf16 %v1564_v14, %v1564_v14 }
0x3258   :  { %3590 = vmatmul.mubr.msk.bf16.vlgmr.msra.gmra.mxu1 %vm269_vm5, %v1565_v52 }
0x3259   :  { %3602 = vmatpush3.bf16.msra.mxu1 %v4596_v22  ;;  %3617 = vmatprep.mubr.msk.bf16.mxu1 %vm4084_vm0, %v4083_v0 }
0x325a   :  { %3603 = vmatprep.subr.bf16.mxu1 %v4083_v0 }
0x325d   :  { %3604 = vmatpush3.bf16.msra.mxu1 %v4605_v1 }
0x325e   :  { %3605 = vmatprep.subr.bf16.mxu1 %v4083_v0 }
0x3261   :  { %3606 = vmatpush3.bf16.msra.mxu1 %v4612_v3 }
0x3262   :  { %3607 = vmatprep.subr.bf16.mxu1 %v4083_v0 }
0x3265   :  { %3608 = vmatpush3.bf16.msra.mxu1 %v4619_v4 }
0x3266   :  { %3609 = vmatprep.subr.bf16.mxu1 %v4083_v0 }
0x3269   :  { %3610 = vmatpush3.bf16.msra.mxu1 %v4781_v59 }
0x326a   :  { %3611 = vmatprep.subr.bf16.mxu1 %v4083_v0 }
0x326d   :  { %3612 = vmatpush3.bf16.msra.mxu1 %v4788_v13 }
0x326e   :  { %3613 = vmatprep.subr.bf16.mxu1 %v4083_v0 }
0x3271   :  { %3614 = vmatpush3.bf16.msra.mxu1 %v4795_v17 }
0x3272   :  { %3615 = vmatprep.subr.bf16.mxu1 %v4083_v0 }
0x3275   :  { %3616 = vmatpush3.bf16.msra.mxu1 %v4802_v25 }
0x3276   :  { %3645 = vmatprep.subr.bf16.mxu1 %v4083_v0 }
0x3318   :  { %v1603_v22 = vpop.f32.mrf.mxu1 }
0x3319   :  { %v1604_v1 = vadd.f32 %v1603_v22, %v4355_v27 }
0x331a   :  { %v3591_v3 = vpop.f32.mrf.mxu1 }
0x331b   :  { %3897 = vtanh.f32 %v1604_v1  ;;  %v3135_v51 = vmul.f32 -1.442695, %v1604_v1 }
0x331c   :  { %v1606_v4 = vpop.f32.mrf.mxu1 }
0x331d   :  { %3899 = vpow2.f32 %v3135_v51 }
0x331e   :  { %v3592_v16 = vpop.f32.mrf.mxu1 }
0x3328   :  { %v3898_v63 = vpop.eup %3897 }
0x3329   :  { %1618 = vrot.lane.b32.xlu1 %v3898_v63, %s4081_s17 }
0x332a   :  { %v3900_v15 = vpop.eup %3899 }
0x332b   :  { %v1612_v20 = vadd.f32 1.0, %v3900_v15 }
0x332d   :  { %3901 = vrcp.f32 %v1612_v20 }
0x333a   :  { %v3902_v18 = vpop.eup %3901 }
0x333b   :  { %v1616_v39 = vmul.f32 %v3902_v18, %v4810_v40 }
0x339b   :  { %v1619_v19 = vpop.permute.xlu1 %1618 }
0x339c   :  { %v1621_v33 = vmul.f32 %v3902_v18, %v1619_v19 }
0x339e   :  { %1623 = vrot.lane.b32.xlu0 %v1621_v33, %s4086_s16 }
0x3410   :  { %v1624_v61 = vpop.permute.xlu0 %1623 }
0x3411   :  { %v4934_v41 = vadd.f32 %v1624_v61, %v1616_v39 }
0x3413   :  { %3903 = vtanh.f32 %v4934_v41 }
0x3420   :  { %v3904_v48 = vpop.eup %3903 }
0x3421   :  { %1629 = vrot.lane.b32.xlu1 %v3904_v48, %s4081_s17 }
0x3493   :  { %v1630_v8 = vpop.permute.xlu1 %1629 }
0x3494   :  { %v4938_v49 = vmul.f32 %v3902_v18, %v1630_v8 }
0x3496   :  { %1634 = vrot.lane.b32.xlu0 %v4938_v49, %s4086_s16 }
0x3508   :  { %v1635_v31 = vpop.permute.xlu0 %1634 }
0x3509   :  { %v1637_v10 = vsel %vm209_vm3, %v1635_v31, 0.0 }
0x350a   :  { %1638 = vadd.xlane.f32.xlu1 %v1637_v10 }
0x3593   :  { %v1639_v53 = vpop.xlane.xlu1 %1638 }
0x3594   :  { %v1640_v40 = vmul.f32 0.03125, %v1639_v53 }
0x3596   :  { %v1641_v5 = vsub.f32 %v4938_v49, %v1640_v40 }
0x3598   :  { %v1642_v62 = vmul.f32 %v1641_v5, %v1641_v5 }
0x359a   :  { %1644 = vrot.lane.b32.xlu0 %v1642_v62, %s4086_s16 }
0x360c   :  { %v1645_v55 = vpop.permute.xlu0 %1644 }
0x360d   :  { %v1647_v12 = vsel %vm209_vm3, %v1645_v55, 0.0 }
0x360e   :  { %1648 = vadd.xlane.f32.xlu0 %v1647_v12 }
0x3697   :  { %v1649_v14 = vpop.xlane.xlu0 %1648 }
0x3698   :  { %v1650_v52 = vmul.f32 0.03125, %v1649_v14 }
0x369a   :  { %v1651_v22 = vadd.f32 1e-05, %v1650_v52 }
0x369c   :  { %3905 = vrsqrt.f32 %v1651_v22 }
0x36a9   :  { %v3906_v1 = vpop.eup %3905 }
0x36aa   :  { %v1653_v3 = vmul.f32 %v3906_v1, %v1641_v5 }
0x36ac   :  { %v1654_v4 = vmul.f32 %v1653_v3, %v4388_v36 }
0x36ae   :  { %v1655_v16 = vadd.f32 %v1654_v4, %v4390_v37 }
0x36b0   :  { %v1656_v63 = vpack.c.bf16 %v1655_v16, %v1655_v16  ;;  %v2675_v51 = vrot.slane %v1655_v16, %v4508_v2 }
0x36b2   :  { %v2676_v15 = vcombine.high %v2675_v51, %v2675_v51  ;;  %v2683_v20 = vrot.slane %v2675_v51, %v4508_v2  ;;  %1658 = vrot.lane.b32.xlu1 %v1656_v63, %s4086_s16 }
0x36b4   :  { %v2690_v18 = vrot.slane %v2676_v15, %v4508_v2  ;;  %v2793_v19 = vrot.slane %v2683_v20, %v4261_v32 }
0x36b6   :  { %v2797_v33 = vrot.slane %v2690_v18, %v4261_v32  ;;  %1772 = vrot.lane.b32.xlu1 %v4904_v43, %s4081_s17  ;;  %v4958_v39 = vsel %vm2838_vm13, %v4834_v50, %v2793_v19 }
0x36b8   :  { %v4962_v61 = vsel %vm2838_vm13, %v4838_v30, %v2797_v33 }
0x3724   :  { %v1659_v48 = vpop.permute.xlu1 %1658 }
0x3725   :  { %3598 = vmatmul.mubr.msk.bf16.vlgmr.msra.gmra.mxu0 %vm238_vm4, %v1659_v48 }
0x3726   :  { %3622 = vmatpush3.bf16.msra.mxu0 %v4669_v47  ;;  %3629 = vmatprep.mubr.msk.bf16.mxu0 %vm4084_vm0, %v4083_v0  ;;  %v103_v47 = vld [vmem:[%s5428_s0 + $0x8] sm:$0x3] }
0x3727   :  { %3623 = vmatprep.subr.bf16.mxu0 %v4083_v0 }
0x3728   :  { %v1773_v48 = vpop.permute.xlu1 %1772 }
0x372a   :  { %3624 = vmatpush3.bf16.msra.mxu0 %v4678_v57 }
0x372b   :  { %3625 = vmatprep.subr.bf16.mxu0 %v4083_v0 }
0x372e   :  { %3626 = vmatpush3.bf16.msra.mxu0 %v4685_v58 }
0x372f   :  { %3627 = vmatprep.subr.bf16.mxu0 %v4083_v0 }
0x3732   :  { %3628 = vmatpush3.bf16.msra.mxu0 %v4692_v28 }
0x3733   :  { %3633 = vmatprep.subr.bf16.mxu0 %v4083_v0 }
0x37e5   :  { %v1697_v50 = vpop.f32.mrf.mxu0 }
0x37e6   :  { %v1698_v30 = vadd.f32 %v4857_v7, %v1697_v50 }
0x37e7   :  { %v3599_v43 = vpop.f32.mrf.mxu0 }
0x37e8   :  { %v1703_v8 = vadd.f32 %v1698_v30, %v103_v47 }
0x37e9   :  { %v1700_v57 = vpop.f32.mrf.mxu0 }
0x37ea   :  { %v1704_v31 = vsel %vm116_vm6, %v1703_v8, -1e+30 }
0x37eb   :  { %v3600_v58 = vpop.f32.mrf.mxu0  ;;  %v1705_v10 = vsel %vm556_vm7, %v1704_v31, -inf }
0x37ec   :  { %1706 = vmax.xlane.f32.xlu0 %v1705_v10 }
0x3875   :  { %v1707_v28 = vpop.xlane.xlu0 %1706 }
0x3876   :  { %vm1708_vm14 = vcmp.ge.f32.partialorder %v1704_v31, %v1707_v28 }
0x3877   :  { %v1709_v53 = vsel %vm1708_vm14, %v4424_v56, 256.0  ;;  %vm2844_vm14 = vcmask 1045504  }
0x3878   :  { %v1710_v40 = vsel %vm556_vm7, %v1709_v53, inf }
0x3879   :  { %1711 = vmin.xlane.f32.xlu0 %v1710_v40 }
0x3902   :  { %v4984_v5 = vpop.xlane.xlu0 %1711 }
0x3903   :  { %vm1713_vm15 = vcmp.eq.f32.partialorder %v4424_v56, %v4984_v5 }
0x3904   :  { %vm3138_vm1 = vmpackc.low %vm1713_vm15, %vm1713_vm15 }
0x3905   :  { %3618 = vmatmul.mubr.msk.bf16.vlgmr.msra.gmra.mxu1 %vm3138_vm1, %v4085_v11 }
0x3906   :  { %3646 = vmatpush3.bf16.msra.mxu1 %v4870_v21  ;;  %3649 = vmatprep.mubr.msk.bf16.mxu1 %vm4084_vm0, %v4083_v0 }
0x3907   :  { %3647 = vmatprep.subr.bf16.mxu1 %v4083_v0 }
0x390a   :  { %3648 = vmatpush3.bf16.msra.mxu1 %v4876_v26 }
0x390b   :  { %3673 = vmatprep.subr.bf16.mxu1 %v4083_v0 }
0x39c5   :  { %v1751_v62 = vpop.f32.mrf.mxu1 }
0x39c6   :  { %v1757_v55 = vsel %vm209_vm3, %v1751_v62, 0.0 }
0x39c7   :  { %1758 = vadd.xlane.f32.xlu0 %v1757_v55  ;;  %v3619_v12 = vpop.f32.mrf.mxu1 }
0x39c9   :  { %v1754_v14 = vpop.f32.mrf.mxu1 }
0x39cb   :  { %v3620_v52 = vpop.f32.mrf.mxu1 }
0x3a50   :  { %v1759_v22 = vpop.xlane.xlu0 %1758 }
0x3a51   :  { %v1760_v1 = vmul.f32 0.03125, %v1759_v22 }
0x3a53   :  { %v1761_v3 = vsub.f32 %v1751_v62, %v1760_v1 }
0x3a55   :  { %v1762_v4 = vmul.f32 %v1761_v3, %v1761_v3 }
0x3a57   :  { %v1763_v16 = vsel %vm209_vm3, %v1762_v4, 0.0  ;;  %v5046_v4 = vld [vmem:[%s5431_s3 + $0x28] sm:$0xff]  }
0x3a58   :  { %1764 = vadd.xlane.f32.xlu0 %v1763_v16  ;;  %v5053_v16 = vld [vmem:[%s5431_s3 + $0x20] sm:$0xff]  }
0x3ae1   :  { %v1765_v63 = vpop.xlane.xlu0 %1764 }
0x3ae2   :  { %v1766_v51 = vmul.f32 0.03125, %v1765_v63 }
0x3ae4   :  { %v1767_v15 = vadd.f32 1e-05, %v1766_v51 }
0x3ae6   :  { %3907 = vrsqrt.f32 %v1767_v15 }
0x3af3   :  { %v3908_v20 = vpop.eup %3907 }
0x3af4   :  { %v1769_v18 = vmul.f32 %v3908_v20, %v1761_v3  ;;  %v5030_v3 = vld [vmem:[%s5431_s3 + $0x38] sm:$0xff]  }
0x3af6   :  { %v1770_v19 = vmul.f32 %v1769_v18, %v4270_v35 }
0x3af8   :  { %v1771_v33 = vadd.f32 %v1770_v19, %v4274_v38 }
0x3afa   :  { %v1775_v47 = vsel %vm238_vm4, %v1771_v33, %v1773_v48 }
0x3afb   :  { %v1776_v50 = vpack.c.bf16 %v1775_v47, %v1775_v47 }
0x3afd   :  { %3630 = vmatmul.mubr.msk.bf16.vlgmr.msra.gmra.mxu0 %vm269_vm5, %v1776_v50 }
0x3afe   :  { %3634 = vmatpush3.bf16.msra.mxu0 %v4725_v54  ;;  %3641 = vmatprep.mubr.msk.bf16.mxu0 %vm4084_vm0, %v4083_v0 }
0x3aff   :  { %3635 = vmatprep.subr.bf16.mxu0 %v4083_v0 }
0x3b02   :  { %3636 = vmatpush3.bf16.msra.mxu0 %v4734_v42 }
0x3b03   :  { %3637 = vmatprep.subr.bf16.mxu0 %v4083_v0 }
0x3b06   :  { %3638 = vmatpush3.bf16.msra.mxu0 %v4741_v46 }
0x3b07   :  { %3639 = vmatprep.subr.bf16.mxu0 %v4083_v0 }
0x3b0a   :  { %3640 = vmatpush3.bf16.msra.mxu0 %v4748_v6 }
0x3b0b   :  { %3653 = vmatprep.subr.bf16.mxu0 %v4083_v0 }
0x3bbd   :  { %v1814_v30 = vpop.f32.mrf.mxu0 }
0x3bbe   :  { %v1815_v54 = vadd.f32 %v1814_v30, %v4289_v45 }
0x3bbf   :  { %v3631_v43 = vpop.f32.mrf.mxu0 }
0x3bc0   :  { %3909 = vtanh.f32 %v1815_v54  ;;  %v3141_v42 = vmul.f32 -1.442695, %v1815_v54 }
0x3bc1   :  { %v1817_v8 = vpop.f32.mrf.mxu0 }
0x3bc2   :  { %3911 = vpow2.f32 %v3141_v42 }
0x3bc3   :  { %v3632_v57 = vpop.f32.mrf.mxu0 }
0x3bcd   :  { %v3910_v31 = vpop.eup %3909 }
0x3bce   :  { %1829 = vrot.lane.b32.xlu0 %v3910_v31, %s4081_s17 }
0x3bcf   :  { %v3912_v58 = vpop.eup %3911 }
0x3bd0   :  { %v1823_v46 = vadd.f32 1.0, %v3912_v58 }
0x3bd2   :  { %3913 = vrcp.f32 %v1823_v46 }
0x3bdf   :  { %v3914_v10 = vpop.eup %3913 }
0x3be0   :  { %v1827_v53 = vmul.f32 %v3914_v10, %v4900_v44 }
0x3c40   :  { %v1830_v28 = vpop.permute.xlu0 %1829 }
0x3c41   :  { %v1832_v6 = vmul.f32 %v3914_v10, %v1830_v28 }
0x3c43   :  { %1834 = vrot.lane.b32.xlu1 %v1832_v6, %s4086_s16 }
0x3cb5   :  { %v1835_v40 = vpop.permute.xlu1 %1834 }
0x3cb6   :  { %v5015_v62 = vadd.f32 %v1835_v40, %v1827_v53 }
0x3cb8   :  { %3915 = vtanh.f32 %v5015_v62 }
0x3cc5   :  { %v3916_v55 = vpop.eup %3915 }
0x3cc6   :  { %1840 = vrot.lane.b32.xlu1 %v3916_v55, %s4081_s17 }
0x3d38   :  { %v1841_v12 = vpop.permute.xlu1 %1840 }
0x3d39   :  { %v5019_v14 = vmul.f32 %v3914_v10, %v1841_v12 }
0x3d3b   :  { %1845 = vrot.lane.b32.xlu1 %v5019_v14, %s4086_s16 }
0x3d3f   :  { %1848 = vrot.lane.b32.xlu1 %v4938_v49, %s4081_s17  ;;  %v5039_v49 = vld [vmem:[%s5431_s3 + $0x30] sm:$0xff]  }
0x3dad   :  { %v1846_v52 = vpop.permute.xlu1 %1845 }
0x3db1   :  { %v1849_v22 = vpop.permute.xlu1 %1848 }
0x3db2   :  { %v1851_v44 = vsel %vm238_vm4, %v1846_v52, %v1849_v22 }
0x3db3   :  { %v1852_v1 = vpack.c.bf16 %v1851_v44, %v1851_v44 }
0x3db5   :  { %3642 = vmatmul.mubr.msk.bf16.vlgmr.msra.gmra.mxu0 %vm269_vm5, %v1852_v1 }
0x3db6   :  { %3654 = vmatpush3.bf16.msra.mxu0 %v5030_v3  ;;  %3669 = vmatprep.mubr.msk.bf16.mxu0 %vm4084_vm0, %v4083_v0 }
0x3db7   :  { %3655 = vmatprep.subr.bf16.mxu0 %v4083_v0 }
0x3dba   :  { %3656 = vmatpush3.bf16.msra.mxu0 %v5039_v49 }
0x3dbb   :  { %3657 = vmatprep.subr.bf16.mxu0 %v4083_v0 }
0x3dbe   :  { %3658 = vmatpush3.bf16.msra.mxu0 %v5046_v4 }
0x3dbf   :  { %3659 = vmatprep.subr.bf16.mxu0 %v4083_v0 }
0x3dc2   :  { %3660 = vmatpush3.bf16.msra.mxu0 %v5053_v16 }
0x3dc3   :  { %3661 = vmatprep.subr.bf16.mxu0 %v4083_v0 }
0x3dc6   :  { %3662 = vmatpush3.bf16.msra.mxu0 %v4781_v59 }
0x3dc7   :  { %3663 = vmatprep.subr.bf16.mxu0 %v4083_v0 }
0x3dca   :  { %3664 = vmatpush3.bf16.msra.mxu0 %v4788_v13 }
0x3dcb   :  { %3665 = vmatprep.subr.bf16.mxu0 %v4083_v0 }
0x3dce   :  { %3666 = vmatpush3.bf16.msra.mxu0 %v4795_v17 }
0x3dcf   :  { %3667 = vmatprep.subr.bf16.mxu0 %v4083_v0 }
0x3dd2   :  { %3668 = vmatpush3.bf16.msra.mxu0 %v4802_v25 }
0x3dd3   :  { %3697 = vmatprep.subr.bf16.mxu0 %v4083_v0 }
0x3e75   :  { %v1890_v63 = vpop.f32.mrf.mxu0 }
0x3e76   :  { %v1891_v51 = vadd.f32 %v1890_v63, %v4355_v27 }
0x3e77   :  { %v3643_v15 = vpop.f32.mrf.mxu0 }
0x3e78   :  { %3917 = vtanh.f32 %v1891_v51  ;;  %v3143_v13 = vmul.f32 -1.442695, %v1891_v51 }
0x3e79   :  { %v1893_v59 = vpop.f32.mrf.mxu0 }
0x3e7a   :  { %3919 = vpow2.f32 %v3143_v13 }
0x3e7b   :  { %v3644_v20 = vpop.f32.mrf.mxu0 }
0x3e85   :  { %v3918_v18 = vpop.eup %3917 }
0x3e86   :  { %1905 = vrot.lane.b32.xlu1 %v3918_v18, %s4081_s17 }
0x3e87   :  { %v3920_v19 = vpop.eup %3919 }
0x3e88   :  { %v1899_v17 = vadd.f32 1.0, %v3920_v19 }
0x3e8a   :  { %3921 = vrcp.f32 %v1899_v17  ;;  %v5103_v17 = vld [vmem:[%s5433_s5 + $0x18] sm:$0xff]  }
0x3e97   :  { %v3922_v33 = vpop.eup %3921 }
0x3e98   :  { %v1903_v47 = vmul.f32 %v3922_v33, %v4934_v41 }
0x3ef8   :  { %v1906_v48 = vpop.permute.xlu1 %1905 }
0x3ef9   :  { %v1908_v25 = vmul.f32 %v3922_v33, %v1906_v48 }
0x3efb   :  { %1910 = vrot.lane.b32.xlu0 %v1908_v25, %s4086_s16 }
0x3f6d   :  { %v1911_v50 = vpop.permute.xlu0 %1910 }
0x3f6e   :  { %v5069_v30 = vadd.f32 %v1911_v50, %v1903_v47 }
0x3f70   :  { %3923 = vtanh.f32 %v5069_v30 }
0x3f7d   :  { %v3924_v54 = vpop.eup %3923 }
0x3f7e   :  { %1916 = vrot.lane.b32.xlu1 %v3924_v54, %s4081_s17 }
0x3ff0   :  { %v1917_v43 = vpop.permute.xlu1 %1916 }
0x3ff1   :  { %v5073_v8 = vmul.f32 %v3922_v33, %v1917_v43  ;;  %v104_v33 = vld [vmem:[%s5428_s0 + $0xa] sm:$0x3] }
0x3ff3   :  { %1921 = vrot.lane.b32.xlu0 %v5073_v8, %s4086_s16 }
0x4065   :  { %v1922_v57 = vpop.permute.xlu0 %1921 }
0x4066   :  { %v1924_v31 = vsel %vm209_vm3, %v1922_v57, 0.0 }
0x4067   :  { %1925 = vadd.xlane.f32.xlu1 %v1924_v31 }
0x40f0   :  { %v1926_v42 = vpop.xlane.xlu1 %1925 }
0x40f1   :  { %v1927_v41 = vmul.f32 0.03125, %v1926_v42 }
0x40f3   :  { %v1928_v58 = vsub.f32 %v5073_v8, %v1927_v41 }
0x40f5   :  { %v1929_v46 = vmul.f32 %v1928_v58, %v1928_v58 }
0x40f7   :  { %1931 = vrot.lane.b32.xlu0 %v1929_v46, %s4086_s16 }
0x4169   :  { %v1932_v10 = vpop.permute.xlu0 %1931 }
0x416a   :  { %v1934_v28 = vsel %vm209_vm3, %v1932_v10, 0.0 }
0x416b   :  { %1935 = vadd.xlane.f32.xlu0 %v1934_v28 }
0x41f4   :  { %v1936_v6 = vpop.xlane.xlu0 %1935 }
0x41f5   :  { %v1937_v53 = vmul.f32 0.03125, %v1936_v6 }
0x41f7   :  { %v1938_v40 = vadd.f32 1e-05, %v1937_v53 }
0x41f9   :  { %3925 = vrsqrt.f32 %v1938_v40 }
0x4206   :  { %v3926_v55 = vpop.eup %3925 }
0x4207   :  { %v1940_v12 = vmul.f32 %v3926_v55, %v1928_v58 }
0x4209   :  { %v1941_v52 = vmul.f32 %v1940_v12, %v4388_v36 }
0x420b   :  { %v1942_v22 = vadd.f32 %v1941_v52, %v4390_v37 }
0x420d   :  { %v1943_v44 = vpack.c.bf16 %v1942_v22, %v1942_v22  ;;  %v2698_v1 = vrot.slane %v1942_v22, %v4508_v2 }
0x420f   :  { %v2699_v63 = vcombine.high %v2698_v1, %v2698_v1  ;;  %v2706_v51 = vrot.slane %v2698_v1, %v4508_v2  ;;  %1945 = vrot.lane.b32.xlu1 %v1943_v44, %s4086_s16 }
0x4211   :  { %v2713_v15 = vrot.slane %v2699_v63, %v4508_v2  ;;  %v2803_v59 = vrot.slane %v2706_v51, %v4261_v32 }
0x4213   :  { %2059 = vrot.lane.b32.xlu1 %v5019_v14, %s4081_s17  ;;  %v2807_v20 = vrot.slane %v2713_v15, %v4261_v32  ;;  %v5093_v18 = vsel %vm2841_vm2, %v4958_v39, %v2803_v59  ;;  %v5112_v39 = vld [vmem:[%s5433_s5 + $0x10] sm:$0xff]   ;;  %v5126_v14 = vld [vmem:[%s5433_s5] sm:$0xff]  }
0x4215   :  { %v5097_v13 = vsel %vm2841_vm2, %v4962_v61, %v2807_v20  ;;  %v5119_v61 = vld [vmem:[%s5433_s5 + $0x8] sm:$0xff]  }
0x4281   :  { %v1946_v19 = vpop.permute.xlu1 %1945 }
0x4282   :  { %3650 = vmatmul.mubr.msk.bf16.vlgmr.msra.gmra.mxu1 %vm238_vm4, %v1946_v19 }
0x4283   :  { %3674 = vmatpush3.bf16.msra.mxu1 %v5103_v17  ;;  %3681 = vmatprep.mubr.msk.bf16.mxu1 %vm4084_vm0, %v4083_v0 }
0x4284   :  { %3675 = vmatprep.subr.bf16.mxu1 %v4083_v0 }
0x4285   :  { %v2060_v59 = vpop.permute.xlu1 %2059 }
0x4287   :  { %3676 = vmatpush3.bf16.msra.mxu1 %v5112_v39 }
0x4288   :  { %3677 = vmatprep.subr.bf16.mxu1 %v4083_v0 }
0x428b   :  { %3678 = vmatpush3.bf16.msra.mxu1 %v5119_v61 }
0x428c   :  { %3679 = vmatprep.subr.bf16.mxu1 %v4083_v0 }
0x428f   :  { %3680 = vmatpush3.bf16.msra.mxu1 %v5126_v14 }
0x4290   :  { %3685 = vmatprep.subr.bf16.mxu1 %v4083_v0 }
0x4342   :  { %v1984_v48 = vpop.f32.mrf.mxu1 }
0x4343   :  { %v1985_v25 = vadd.f32 %v4857_v7, %v1984_v48  ;;  %v5168_v48 = vld [vmem:[%s5433_s5 + $0x30] sm:$0xff]  }
0x4344   :  { %v3651_v47 = vpop.f32.mrf.mxu1 }
0x4345   :  { %v1990_v50 = vadd.f32 %v1985_v25, %v104_v33  ;;  %v5159_v33 = vld [vmem:[%s5433_s5 + $0x38] sm:$0xff]   ;;  %v5175_v25 = vld [vmem:[%s5433_s5 + $0x28] sm:$0xff]   ;;  %v5182_v47 = vld [vmem:[%s5433_s5 + $0x20] sm:$0xff]  }
0x4346   :  { %v1987_v54 = vpop.f32.mrf.mxu1 }
0x4347   :  { %v1991_v43 = vsel %vm116_vm6, %v1990_v50, -1e+30 }
0x4348   :  { %v3652_v57 = vpop.f32.mrf.mxu1  ;;  %v1992_v31 = vsel %vm556_vm7, %v1991_v43, -inf }
0x4349   :  { %1993 = vmax.xlane.f32.xlu0 %v1992_v31 }
0x43d2   :  { %v1994_v42 = vpop.xlane.xlu0 %1993 }
0x43d3   :  { %vm1995_vm9 = vcmp.ge.f32.partialorder %v1991_v43, %v1994_v42 }
0x43d4   :  { %v1996_v41 = vsel %vm1995_vm9, %v4424_v56, 256.0 }
0x43d5   :  { %v1997_v58 = vsel %vm556_vm7, %v1996_v41, inf }
0x43d6   :  { %1998 = vmin.xlane.f32.xlu0 %v1997_v58 }
0x445f   :  { %v5139_v46 = vpop.xlane.xlu0 %1998 }
0x4460   :  { %vm2000_vm10 = vcmp.eq.f32.partialorder %v4424_v56, %v5139_v46 }
0x4461   :  { %vm3146_vm12 = vmpackc.low %vm2000_vm10, %vm2000_vm10 }
0x4462   :  { %3670 = vmatmul.mubr.msk.bf16.vlgmr.msra.gmra.mxu0 %vm3146_vm12, %v4085_v11 }
0x4463   :  { %3698 = vmatpush3.bf16.msra.mxu0 %v4870_v21  ;;  %3701 = vmatprep.mubr.msk.bf16.mxu0 %vm4084_vm0, %v4083_v0 }
0x4464   :  { %3699 = vmatprep.subr.bf16.mxu0 %v4083_v0 }
0x4467   :  { %3700 = vmatpush3.bf16.msra.mxu0 %v4876_v26 }
0x4468   :  { %3725 = vmatprep.subr.bf16.mxu0 %v4083_v0 }
0x4522   :  { %v2038_v7 = vpop.f32.mrf.mxu0 }
0x4523   :  { %v2044_v10 = vsel %vm209_vm3, %v2038_v7, 0.0 }
0x4524   :  { %2045 = vadd.xlane.f32.xlu0 %v2044_v10  ;;  %v3671_v28 = vpop.f32.mrf.mxu0 }
0x4526   :  { %v2041_v6 = vpop.f32.mrf.mxu0 }
0x4528   :  { %v3672_v53 = vpop.f32.mrf.mxu0 }
0x45ad   :  { %v2046_v40 = vpop.xlane.xlu0 %2045 }
0x45ae   :  { %v2047_v55 = vmul.f32 0.03125, %v2046_v40 }
0x45b0   :  { %v2048_v12 = vsub.f32 %v2038_v7, %v2047_v55 }
0x45b2   :  { %v2049_v21 = vmul.f32 %v2048_v12, %v2048_v12 }
0x45b4   :  { %v2050_v52 = vsel %vm209_vm3, %v2049_v21, 0.0 }
0x45b5   :  { %2051 = vadd.xlane.f32.xlu0 %v2050_v52 }
0x463e   :  { %v2052_v22 = vpop.xlane.xlu0 %2051 }
0x463f   :  { %v2053_v44 = vmul.f32 0.03125, %v2052_v22 }
0x4641   :  { %v2054_v1 = vadd.f32 1e-05, %v2053_v44 }
0x4643   :  { %3927 = vrsqrt.f32 %v2054_v1 }
0x4650   :  { %v3928_v26 = vpop.eup %3927 }
0x4651   :  { %v2056_v63 = vmul.f32 %v3928_v26, %v2048_v12 }
0x4653   :  { %v2057_v51 = vmul.f32 %v2056_v63, %v4270_v35 }
0x4655   :  { %v2058_v15 = vadd.f32 %v2057_v51, %v4274_v38 }
0x4657   :  { %v2062_v20 = vsel %vm238_vm4, %v2058_v15, %v2060_v59 }
0x4658   :  { %v2063_v19 = vpack.c.bf16 %v2062_v20, %v2062_v20 }
0x465a   :  { %3682 = vmatmul.mubr.msk.bf16.vlgmr.msra.gmra.mxu1 %vm269_vm5, %v2063_v19 }
0x465b   :  { %3686 = vmatpush3.bf16.msra.mxu1 %v5159_v33  ;;  %3693 = vmatprep.mubr.msk.bf16.mxu1 %vm4084_vm0, %v4083_v0 }
0x465c   :  { %3687 = vmatprep.subr.bf16.mxu1 %v4083_v0 }
0x465f   :  { %3688 = vmatpush3.bf16.msra.mxu1 %v5168_v48 }
0x4660   :  { %3689 = vmatprep.subr.bf16.mxu1 %v4083_v0 }
0x4663   :  { %3690 = vmatpush3.bf16.msra.mxu1 %v5175_v25 }
0x4664   :  { %3691 = vmatprep.subr.bf16.mxu1 %v4083_v0 }
0x4667   :  { %3692 = vmatpush3.bf16.msra.mxu1 %v5182_v47 }
0x4668   :  { %3705 = vmatprep.subr.bf16.mxu1 %v4083_v0 }
0x471a   :  { %v2101_v50 = vpop.f32.mrf.mxu1 }
0x471b   :  { %v2102_v54 = vadd.f32 %v2101_v50, %v4289_v45 }
0x471c   :  { %v3683_v43 = vpop.f32.mrf.mxu1 }
0x471d   :  { %3929 = vtanh.f32 %v2102_v54  ;;  %v3149_v41 = vmul.f32 -1.442695, %v2102_v54 }
0x471e   :  { %v2104_v57 = vpop.f32.mrf.mxu1 }
0x471f   :  { %3931 = vpow2.f32 %v3149_v41 }
0x4720   :  { %v3684_v31 = vpop.f32.mrf.mxu1 }
0x472a   :  { %v3930_v42 = vpop.eup %3929 }
0x472b   :  { %2116 = vrot.lane.b32.xlu0 %v3930_v42, %s4081_s17 }
0x472c   :  { %v3932_v58 = vpop.eup %3931 }
0x472d   :  { %v2110_v7 = vadd.f32 1.0, %v3932_v58 }
0x472f   :  { %3933 = vrcp.f32 %v2110_v7 }
0x473c   :  { %v3934_v10 = vpop.eup %3933 }
0x473d   :  { %v2114_v53 = vmul.f32 %v3934_v10, %v5015_v62 }
0x479d   :  { %v2117_v28 = vpop.permute.xlu0 %2116 }
0x479e   :  { %v2119_v6 = vmul.f32 %v3934_v10, %v2117_v28 }
0x47a0   :  { %2121 = vrot.lane.b32.xlu1 %v2119_v6, %s4086_s16 }
0x4812   :  { %v2122_v40 = vpop.permute.xlu1 %2121 }
0x4813   :  { %v5190_v55 = vadd.f32 %v2122_v40, %v2114_v53 }
0x4815   :  { %3935 = vtanh.f32 %v5190_v55 }
0x4822   :  { %v3936_v12 = vpop.eup %3935 }
0x4823   :  { %2127 = vrot.lane.b32.xlu1 %v3936_v12, %s4081_s17 }
0x4895   :  { %v2128_v21 = vpop.permute.xlu1 %2127 }
0x4896   :  { %v5194_v52 = vmul.f32 %v3934_v10, %v2128_v21 }
0x4898   :  { %2132 = vrot.lane.b32.xlu1 %v5194_v52, %s4086_s16 }
0x489c   :  { %2135 = vrot.lane.b32.xlu1 %v5073_v8, %s4081_s17 }
0x490a   :  { %v2133_v22 = vpop.permute.xlu1 %2132 }
0x490e   :  { %v2136_v44 = vpop.permute.xlu1 %2135 }
0x490f   :  { %v2138_v62 = vsel %vm238_vm4, %v2133_v22, %v2136_v44 }
0x4910   :  { %v2139_v1 = vpack.c.bf16 %v2138_v62, %v2138_v62 }
0x4912   :  { %3694 = vmatmul.mubr.msk.bf16.vlgmr.msra.gmra.mxu1 %vm269_vm5, %v2139_v1 }
0x4913   :  { %3706 = vmatpush3.bf16.msra.mxu1 %v5030_v3  ;;  %3721 = vmatprep.mubr.msk.bf16.mxu1 %vm4084_vm0, %v4083_v0  ;;  %v4006_v3 = vld [vmem:[%s5431_s3 + $0x18] sm:$0xff]  }
0x4914   :  { %3707 = vmatprep.subr.bf16.mxu1 %v4083_v0 }
0x4917   :  { %3708 = vmatpush3.bf16.msra.mxu1 %v5039_v49  ;;  %v4007_v49 = vld [vmem:[%s5431_s3 + $0x10] sm:$0xff]  }
0x4918   :  { %3709 = vmatprep.subr.bf16.mxu1 %v4083_v0 }
0x491b   :  { %3710 = vmatpush3.bf16.msra.mxu1 %v5046_v4  ;;  %v4008_v4 = vld [vmem:[%s5431_s3 + $0x8] sm:$0xff]  }
0x491c   :  { %3711 = vmatprep.subr.bf16.mxu1 %v4083_v0 }
0x491f   :  { %3712 = vmatpush3.bf16.msra.mxu1 %v5053_v16  ;;  %v4009_v16 = vld [vmem:[%s5431_s3] sm:$0xff]  }
0x4920   :  { %3713 = vmatprep.subr.bf16.mxu1 %v4083_v0 }
0x4923   :  { %3714 = vmatpush3.bf16.msra.mxu1 %v4006_v3 }
0x4924   :  { %3715 = vmatprep.subr.bf16.mxu1 %v4083_v0 }
0x4927   :  { %3716 = vmatpush3.bf16.msra.mxu1 %v4007_v49 }
0x4928   :  { %3717 = vmatprep.subr.bf16.mxu1 %v4083_v0 }
0x492b   :  { %3718 = vmatpush3.bf16.msra.mxu1 %v4008_v4 }
0x492c   :  { %3719 = vmatprep.subr.bf16.mxu1 %v4083_v0 }
0x492f   :  { %3720 = vmatpush3.bf16.msra.mxu1 %v4009_v16 }
0x4930   :  { %3749 = vmatprep.subr.bf16.mxu1 %v4083_v0 }
0x49d2   :  { %v2177_v8 = vpop.f32.mrf.mxu1 }
0x49d3   :  { %v2178_v26 = vadd.f32 %v2177_v8, %v4355_v27 }
0x49d4   :  { %v3695_v63 = vpop.f32.mrf.mxu1 }
0x49d5   :  { %3937 = vtanh.f32 %v2178_v26  ;;  %v3151_v20 = vmul.f32 -1.442695, %v2178_v26 }
0x49d6   :  { %v2180_v51 = vpop.f32.mrf.mxu1 }
0x49d7   :  { %3939 = vpow2.f32 %v3151_v20 }
0x49d8   :  { %v3696_v15 = vpop.f32.mrf.mxu1 }
0x49e2   :  { %v3938_v59 = vpop.eup %3937 }
0x49e3   :  { %2192 = vrot.lane.b32.xlu1 %v3938_v59, %s4081_s17 }
0x49e4   :  { %v3940_v19 = vpop.eup %3939 }
0x49e5   :  { %v2186_v50 = vadd.f32 1.0, %v3940_v19 }
0x49e7   :  { %3941 = vrcp.f32 %v2186_v50 }
0x49f4   :  { %v3942_v54 = vpop.eup %3941 }
0x49f5   :  { %v2190_v31 = vmul.f32 %v3942_v54, %v5069_v30 }
0x4a55   :  { %v2193_v43 = vpop.permute.xlu1 %2192 }
0x4a56   :  { %v2195_v57 = vmul.f32 %v3942_v54, %v2193_v43 }
0x4a58   :  { %2197 = vrot.lane.b32.xlu0 %v2195_v57, %s4086_s16 }
0x4aca   :  { %v2198_v42 = vpop.permute.xlu0 %2197 }
0x4acb   :  { %v5232_v41 = vadd.f32 %v2198_v42, %v2190_v31 }
0x4acd   :  { %3943 = vtanh.f32 %v5232_v41 }
0x4ada   :  { %v3944_v58 = vpop.eup %3943 }
0x4adb   :  { %2203 = vrot.lane.b32.xlu1 %v3944_v58, %s4081_s17 }
0x4b4d   :  { %v2204_v7 = vpop.permute.xlu1 %2203 }
0x4b4e   :  { %v5236_v10 = vmul.f32 %v3942_v54, %v2204_v7 }
0x4b50   :  { %2208 = vrot.lane.b32.xlu0 %v5236_v10, %s4086_s16 }
0x4bc2   :  { %v2209_v28 = vpop.permute.xlu0 %2208 }
0x4bc3   :  { %v2211_v6 = vsel %vm209_vm3, %v2209_v28, 0.0 }
0x4bc4   :  { %2212 = vadd.xlane.f32.xlu1 %v2211_v6  ;;  %v5292_v6 = vld [vmem:[#allocation5 + $0x8] sm:$0xff]  }
0x4c4d   :  { %v2213_v53 = vpop.xlane.xlu1 %2212 }
0x4c4e   :  { %v2214_v30 = vmul.f32 0.03125, %v2213_v53  ;;  %v5298_v53 = vld [vmem:[#allocation5] sm:$0xff]  }
0x4c50   :  { %v2215_v40 = vsub.f32 %v5236_v10, %v2214_v30 }
0x4c52   :  { %v2216_v12 = vmul.f32 %v2215_v40, %v2215_v40 }
0x4c54   :  { %2218 = vrot.lane.b32.xlu0 %v2216_v12, %s4086_s16 }
0x4cc6   :  { %v2219_v21 = vpop.permute.xlu0 %2218 }
0x4cc7   :  { %v2221_v22 = vsel %vm209_vm3, %v2219_v21, 0.0 }
0x4cc8   :  { %2222 = vadd.xlane.f32.xlu0 %v2221_v22 }
0x4d51   :  { %v2223_v44 = vpop.xlane.xlu0 %2222 }
0x4d52   :  { %v2224_v62 = vmul.f32 0.03125, %v2223_v44 }
0x4d54   :  { %v2225_v1 = vadd.f32 1e-05, %v2224_v62 }
0x4d56   :  { %3945 = vrsqrt.f32 %v2225_v1 }
0x4d63   :  { %v3946_v3 = vpop.eup %3945 }
0x4d64   :  { %v2227_v49 = vmul.f32 %v3946_v3, %v2215_v40 }
0x4d66   :  { %v2228_v4 = vmul.f32 %v2227_v49, %v4388_v36 }
0x4d68   :  { %v2229_v16 = vadd.f32 %v2228_v4, %v4390_v37 }
0x4d6a   :  { %v2230_v8 = vpack.c.bf16 %v2229_v16, %v2229_v16  ;;  %v2721_v26 = vrot.slane %v2229_v16, %v4508_v2 }
0x4d6c   :  { %v2722_v63 = vcombine.high %v2721_v26, %v2721_v26  ;;  %v2729_v51 = vrot.slane %v2721_v26, %v4508_v2  ;;  %2232 = vrot.lane.b32.xlu1 %v2230_v8, %s4086_s16 }
0x4d6e   :  { %v2736_v15 = vrot.slane %v2722_v63, %v4508_v2  ;;  %v2813_v59 = vrot.slane %v2729_v51, %v4261_v32 }
0x4d70   :  { %2346 = vrot.lane.b32.xlu1 %v5194_v52, %s4081_s17  ;;  %v2817_v20 = vrot.slane %v2736_v15, %v4261_v32  ;;  %v5256_v19 = vsel %vm2844_vm14, %v5093_v18, %v2813_v59  ;;  %v105_v18 = vld [vmem:[%s5428_s0 + $0xc] sm:$0x3] }
0x4d72   :  { %v5260_v50 = vsel %vm2844_vm14, %v5097_v13, %v2817_v20 }
0x4dde   :  { %v2233_v54 = vpop.permute.xlu1 %2232 }
0x4ddf   :  { %3702 = vmatmul.mubr.msk.bf16.vlgmr.msra.gmra.mxu0 %vm238_vm4, %v2233_v54 }
0x4de0   :  { %3726 = vmatpush3.bf16.msra.mxu0 %v5103_v17  ;;  %3733 = vmatprep.mubr.msk.bf16.mxu0 %vm4084_vm0, %v4083_v0  ;;  %v5279_v17 = vld [vmem:[%s5436_s8] ss:$0 sm:$0xff] }
0x4de1   :  { %3727 = vmatprep.subr.bf16.mxu0 %v4083_v0 }
0x4de2   :  { %v2347_v15 = vpop.permute.xlu1 %2346 }
0x4de4   :  { %3728 = vmatpush3.bf16.msra.mxu0 %v5112_v39 }
0x4de5   :  { %3729 = vmatprep.subr.bf16.mxu0 %v4083_v0 }
0x4de8   :  { %3730 = vmatpush3.bf16.msra.mxu0 %v5119_v61 }
0x4de9   :  { %3731 = vmatprep.subr.bf16.mxu0 %v4083_v0 }
0x4dec   :  { %3732 = vmatpush3.bf16.msra.mxu0 %v5126_v14 }
0x4ded   :  { %3737 = vmatprep.subr.bf16.mxu0 %v4083_v0 }
0x4e9f   :  { %v2271_v13 = vpop.f32.mrf.mxu0 }
0x4ea0   :  { %v2272_v39 = vadd.f32 %v5279_v17, %v2271_v13 }
0x4ea1   :  { %v3703_v52 = vpop.f32.mrf.mxu0 }
0x4ea2   :  { %v2277_v61 = vadd.f32 %v2272_v39, %v105_v18 }
0x4ea3   :  { %v2274_v43 = vpop.f32.mrf.mxu0 }
0x4ea4   :  { %v2278_v14 = vsel %vm116_vm6, %v2277_v61, -1e+30 }
0x4ea5   :  { %v3704_v57 = vpop.f32.mrf.mxu0  ;;  %v2279_v31 = vsel %vm556_vm7, %v2278_v14, -inf }
0x4ea6   :  { %2280 = vmax.xlane.f32.xlu0 %v2279_v31 }
0x4f2f   :  { %v2281_v42 = vpop.xlane.xlu0 %2280 }
0x4f30   :  { %vm2282_vm15 = vcmp.ge.f32.partialorder %v2278_v14, %v2281_v42 }
0x4f31   :  { %v2283_v58 = vsel %vm2282_vm15, %v4424_v56, 256.0 }
0x4f32   :  { %v2284_v7 = vsel %vm556_vm7, %v2283_v58, inf }
0x4f33   :  { %2285 = vmin.xlane.f32.xlu0 %v2284_v7 }
0x4fbc   :  { %v5287_v28 = vpop.xlane.xlu0 %2285 }
0x4fbd   :  { %vm2287_vm1 = vcmp.eq.f32.partialorder %v4424_v56, %v5287_v28 }
0x4fbe   :  { %vm3154_vm9 = vmpackc.low %vm2287_vm1, %vm2287_vm1 }
0x4fbf   :  { %3722 = vmatmul.mubr.msk.bf16.vlgmr.msra.gmra.mxu1 %vm3154_vm9, %v4085_v11 }
0x4fc0   :  { %3750 = vmatpush3.bf16.msra.mxu1 %v5292_v6  ;;  %3753 = vmatprep.mubr.msk.bf16.mxu1 %vm4084_vm0, %v4083_v0 }
0x4fc1   :  { %3751 = vmatprep.subr.bf16.mxu1 %v4083_v0 }
0x4fc4   :  { %3752 = vmatpush3.bf16.msra.mxu1 %v5298_v53 }
0x507f   :  { %v2325_v30 = vpop.f32.mrf.mxu1 }
0x5080   :  { %v2331_v40 = vsel %vm209_vm3, %v2325_v30, 0.0 }
0x5081   :  { %2332 = vadd.xlane.f32.xlu0 %v2331_v40  ;;  %v3723_v12 = vpop.f32.mrf.mxu1 }
0x5083   :  { %v2328_v21 = vpop.f32.mrf.mxu1 }
0x5085   :  { %v3724_v11 = vpop.f32.mrf.mxu1 }
0x510a   :  { %v2333_v22 = vpop.xlane.xlu0 %2332 }
0x510b   :  { %v2334_v44 = vmul.f32 0.03125, %v2333_v22 }
0x510d   :  { %v2335_v62 = vsub.f32 %v2325_v30, %v2334_v44 }
0x510f   :  { %v2336_v1 = vmul.f32 %v2335_v62, %v2335_v62 }
0x5111   :  { %v2337_v3 = vsel %vm209_vm3, %v2336_v1, 0.0 }
0x5112   :  { %2338 = vadd.xlane.f32.xlu0 %v2337_v3 }
0x519b   :  { %v2339_v49 = vpop.xlane.xlu0 %2338 }
0x519c   :  { %v2340_v4 = vmul.f32 0.03125, %v2339_v49 }
0x519e   :  { %v2341_v16 = vadd.f32 1e-05, %v2340_v4 }
0x51a0   :  { %3947 = vrsqrt.f32 %v2341_v16 }
0x51ad   :  { %v3948_v8 = vpop.eup %3947 }
0x51ae   :  { %v2343_v26 = vmul.f32 %v3948_v8, %v2335_v62 }
0x51b0   :  { %v2344_v63 = vmul.f32 %v2343_v26, %v4270_v35 }
0x51b2   :  { %v2345_v51 = vadd.f32 %v2344_v63, %v4274_v38 }
0x51b4   :  { %v2349_v59 = vsel %vm238_vm4, %v2345_v51, %v2347_v15 }
0x51b5   :  { %v2350_v20 = vpack.c.bf16 %v2349_v59, %v2349_v59 }
0x51b7   :  { %3734 = vmatmul.mubr.msk.bf16.vlgmr.msra.gmra.mxu0 %vm269_vm5, %v2350_v20 }
0x51b8   :  { %3738 = vmatpush3.bf16.msra.mxu0 %v5159_v33  ;;  %3745 = vmatprep.mubr.msk.bf16.mxu0 %vm4084_vm0, %v4083_v0 }
0x51b9   :  { %3739 = vmatprep.subr.bf16.mxu0 %v4083_v0 }
0x51bc   :  { %3740 = vmatpush3.bf16.msra.mxu0 %v5168_v48 }
0x51bd   :  { %3741 = vmatprep.subr.bf16.mxu0 %v4083_v0 }
0x51c0   :  { %3742 = vmatpush3.bf16.msra.mxu0 %v5175_v25 }
0x51c1   :  { %3743 = vmatprep.subr.bf16.mxu0 %v4083_v0 }
0x51c4   :  { %3744 = vmatpush3.bf16.msra.mxu0 %v5182_v47 }
0x51c5   :  { %3757 = vmatprep.subr.bf16.mxu0 %v4083_v0 }
0x5277   :  { %v2388_v35 = vpop.f32.mrf.mxu0 }
0x5278   :  { %v2389_v38 = vadd.f32 %v2388_v35, %v4289_v45 }
0x5279   :  { %v3735_v33 = vpop.f32.mrf.mxu0 }
0x527a   :  { %3949 = vtanh.f32 %v2389_v38  ;;  %v3157_v48 = vmul.f32 -1.442695, %v2389_v38 }
0x527b   :  { %v2391_v54 = vpop.f32.mrf.mxu0 }
0x527c   :  { %3951 = vpow2.f32 %v3157_v48 }
0x527d   :  { %v3736_v18 = vpop.f32.mrf.mxu0 }
0x5287   :  { %v3950_v13 = vpop.eup %3949 }
0x5288   :  { %2403 = vrot.lane.b32.xlu0 %v3950_v13, %s4081_s17 }
0x5289   :  { %v3952_v39 = vpop.eup %3951 }
0x528a   :  { %v2397_v25 = vadd.f32 1.0, %v3952_v39 }
0x528c   :  { %3953 = vrcp.f32 %v2397_v25 }
0x5299   :  { %v3954_v52 = vpop.eup %3953 }
0x529a   :  { %v2401_v43 = vmul.f32 %v3954_v52, %v5190_v55 }
0x52fa   :  { %v2404_v61 = vpop.permute.xlu0 %2403 }
0x52fb   :  { %v2406_v47 = vmul.f32 %v3954_v52, %v2404_v61 }
0x52fd   :  { %2408 = vrot.lane.b32.xlu1 %v2406_v47, %s4086_s16 }
0x536f   :  { %v2409_v45 = vpop.permute.xlu1 %2408 }
0x5370   :  { %v2411_v14 = vadd.f32 %v2409_v45, %v2401_v43 }
0x5372   :  { %3955 = vtanh.f32 %v2411_v14 }
0x537f   :  { %v3956_v57 = vpop.eup %3955 }
0x5380   :  { %2414 = vrot.lane.b32.xlu1 %v3956_v57, %s4081_s17 }
0x53f2   :  { %v2415_v31 = vpop.permute.xlu1 %2414 }
0x53f3   :  { %v2417_v42 = vmul.f32 %v3954_v52, %v2415_v31 }
0x53f5   :  { %2419 = vrot.lane.b32.xlu1 %v2417_v42, %s4086_s16 }
0x53f9   :  { %2422 = vrot.lane.b32.xlu1 %v5236_v10, %s4081_s17 }
0x5467   :  { %v2420_v58 = vpop.permute.xlu1 %2419 }
0x546b   :  { %v2423_v7 = vpop.permute.xlu1 %2422 }
0x546c   :  { %v2425_v30 = vsel %vm238_vm4, %v2420_v58, %v2423_v7  ;;  %v106_v58 = vld [vmem:[%s5428_s0 + $0xe] sm:$0x3]  ;;  %s4091_s0 = smov [#allocation7]  }
0x546d   :  { %v2426_v40 = vpack.c.bf16 %v2425_v30, %v2425_v30 }
0x546f   :  { %3746 = vmatmul.mubr.msk.bf16.vlgmr.msra.gmra.mxu0 %vm269_vm5, %v2426_v40  ;;  %vm3043_vm5 = vcmp.eq.s32.totalorder %v4205_v9, 11 }
0x5470   :  { %3758 = vmatpush3.bf16.msra.mxu0 %v5292_v6  ;;  %3761 = vmatprep.mubr.msk.bf16.mxu0 %vm4084_vm0, %v4083_v0  ;;  %vm2847_vm0 = vcmask 1046528  }
0x5471   :  { %3759 = vmatprep.subr.bf16.mxu0 %v4083_v0 }
0x5474   :  { %3760 = vmatpush3.bf16.msra.mxu0 %v5298_v53 }
0x552f   :  { %v2464_v55 = vpop.f32.mrf.mxu0 }
0x5530   :  { %v2465_v12 = vadd.f32 %v2464_v55, %v4355_v27 }
0x5531   :  { %v3747_v10 = vpop.f32.mrf.mxu0 }
0x5532   :  { %3957 = vtanh.f32 %v2465_v12  ;;  %v3159_v44 = vmul.f32 -1.442695, %v2465_v12 }
0x5533   :  { %v2467_v21 = vpop.f32.mrf.mxu0 }
0x5534   :  { %3959 = vpow2.f32 %v3159_v44 }
0x5535   :  { %v3748_v11 = vpop.f32.mrf.mxu0 }
0x553f   :  { %v3958_v22 = vpop.eup %3957 }
0x5540   :  { %2479 = vrot.lane.b32.xlu1 %v3958_v22, %s4081_s17 }
0x5541   :  { %v3960_v6 = vpop.eup %3959 }
0x5542   :  { %v2473_v62 = vadd.f32 1.0, %v3960_v6 }
0x5544   :  { %3961 = vrcp.f32 %v2473_v62 }
0x5551   :  { %v3962_v1 = vpop.eup %3961 }
0x5552   :  { %v2477_v53 = vmul.f32 %v3962_v1, %v5232_v41 }
0x55b2   :  { %v2480_v3 = vpop.permute.xlu1 %2479 }
0x55b3   :  { %v2482_v0 = vmul.f32 %v3962_v1, %v2480_v3 }
0x55b5   :  { %2484 = vrot.lane.b32.xlu0 %v2482_v0, %s4086_s16 }
0x5627   :  { %v2485_v27 = vpop.permute.xlu0 %2484 }
0x5628   :  { %v2487_v49 = vadd.f32 %v2485_v27, %v2477_v53 }
0x562a   :  { %3963 = vtanh.f32 %v2487_v49 }
0x5637   :  { %v3964_v4 = vpop.eup %3963 }
0x5638   :  { %2490 = vrot.lane.b32.xlu1 %v3964_v4, %s4081_s17 }
0x56aa   :  { %v2491_v16 = vpop.permute.xlu1 %2490 }
0x56ab   :  { %v2493_v8 = vmul.f32 %v3962_v1, %v2491_v16 }
0x56ad   :  { %2495 = vrot.lane.b32.xlu0 %v2493_v8, %s4086_s16 }
0x571f   :  { %v2496_v26 = vpop.permute.xlu0 %2495 }
0x5720   :  { %v2498_v63 = vsel %vm209_vm3, %v2496_v26, 0.0 }
0x5721   :  { %2499 = vadd.xlane.f32.xlu1 %v2498_v63 }
0x57aa   :  { %v2500_v51 = vpop.xlane.xlu1 %2499 }
0x57ab   :  { %v2501_v15 = vmul.f32 0.03125, %v2500_v51 }
0x57ad   :  { %v2502_v59 = vsub.f32 %v2493_v8, %v2501_v15  ;;  %v4090_v15 = vmov 0  }
0x57af   :  { %v2503_v20 = vmul.f32 %v2502_v59, %v2502_v59 }
0x57b1   :  { %2505 = vrot.lane.b32.xlu0 %v2503_v20, %s4086_s16 }
0x5823   :  { %v2506_v41 = vpop.permute.xlu0 %2505 }
0x5824   :  { %v2508_v35 = vsel %vm209_vm3, %v2506_v41, 0.0 }
0x5825   :  { %2509 = vadd.xlane.f32.xlu0 %v2508_v35  ;;  %v2865_v35 = vrot.slane %v4548_v29, %v4261_v32 }
0x58ae   :  { %v2510_v38 = vpop.xlane.xlu0 %2509 }
0x58af   :  { %v2511_v33 = vmul.f32 0.03125, %v2510_v38  ;;  %v2876_v38 = vrot.slane %v4705_v23, %v4261_v32 }
0x58b1   :  { %v2512_v54 = vadd.f32 1e-05, %v2511_v33  ;;  %v2854_v33 = vrot.slane %v4430_v60, %v4261_v32 }
0x58b3   :  { %3965 = vrsqrt.f32 %v2512_v54  ;;  %v2887_v54 = vrot.slane %v4865_v24, %v4261_v32 }
0x58c0   :  { %v3966_v18 = vpop.eup %3965 }
0x58c1   :  { %v2514_v13 = vmul.f32 %v3966_v18, %v2502_v59  ;;  %v2898_v18 = vrot.slane %v4984_v5, %v4261_v32 }
0x58c3   :  { %v2515_v48 = vmul.f32 %v2514_v13, %v4388_v36  ;;  %v2869_v13 = vrot.slane %v4548_v29, %v4266_v34 }
0x58c5   :  { %v2516_v39 = vadd.f32 %v2515_v48, %v4390_v37  ;;  %v2938_v48 = vsel %vm2830_vm11, %v2854_v33, %v2865_v35 }
0x58c7   :  { %v2517_v25 = vpack.c.bf16 %v2516_v39, %v2516_v39  ;;  %v2744_v52 = vrot.slane %v2516_v39, %v4508_v2  ;;  %v2909_v39 = vrot.slane %v5139_v46, %v4261_v32 }
0x58c9   :  { %v2745_v61 = vcombine.high %v2744_v52, %v2744_v52  ;;  %v2752_v47 = vrot.slane %v2744_v52, %v4508_v2  ;;  %2519 = vrot.lane.b32.xlu1 %v2517_v25, %s4086_s16  ;;  %v2880_v25 = vrot.slane %v4705_v23, %v4266_v34  ;;  %v2940_v52 = vsel %vm556_vm7, %v2938_v48, %v2876_v38 }
0x58ca   :  { %v2942_v29 = vsel %vm2835_vm8, %v2940_v52, %v2887_v54 }
0x58cb   :  { %v2759_v43 = vrot.slane %v2745_v61, %v4508_v2  ;;  %v2823_v45 = vrot.slane %v2752_v47, %v4261_v32  ;;  %v4089_v2 = vmov 10   ;;  %v2920_v61 = vrot.slane %v5287_v28, %v4261_v32 }
0x58cc   :  { %3785 = vset.pattern.permute.xlu1 %v4089_v2  ;;  %3786 = vset.pattern.permute.xlu0 %v4089_v2  ;;  %v2858_v47 = vrot.slane %v4430_v60, %v4266_v34 }
0x58cd   :  { %v2827_v14 = vrot.slane %v2759_v43, %v4261_v32  ;;  %v2848_v36 = vsel %vm2847_vm0, %v5256_v19, %v2823_v45  ;;  %v2891_v43 = vrot.slane %v4865_v24, %v4266_v34  ;;  %v2902_v45 = vrot.slane %v4984_v5, %v4266_v34 }
0x58ce   :  { %v2939_v23 = vsel %vm2830_vm11, %v2858_v47, %v2869_v13  ;;  %v2924_v24 = vrot.slane %v5287_v28, %v4266_v34 }
0x58cf   :  { %v2849_v37 = vsel %vm2847_vm0, %v5260_v50, %v2827_v14  ;;  %v2944_v14 = vsel %vm2838_vm13, %v2942_v29, %v2898_v18 }
0x58d0   :  { %v2952_v57 = vpack.c.bf16 %v2849_v37, %v2848_v36  ;;  %v2913_v37 = vrot.slane %v5139_v46, %v4266_v34  ;;  %v2946_v60 = vsel %vm2841_vm2, %v2944_v14, %v2909_v39 }
0x58d2   :  { %2954 = vrot.lane.b32.xlu0 %v2952_v57, %s4086_s16  ;;  %s3063_s16 = sshll.u32 %s4091_s0, 4  ;;  %s3064_s16 = int_to_ptr.vmem [resolvable:$true] %s3063_s16 }
0x58d3   :  { %s4053_s27 = scalar_lea.vmem %s3064_s16, 256  ;;  %p4058_p11 = scmp.lt.s32.totalorder %s3064_s16, %s3064_s16 }
0x58d4   :  { %p4054_p10 = scmp.ne.s32.totalorder %s3064_s16, %s4053_s27  ;;  %p4059_p12 = scmp.lt.s32.totalorder %s4053_s27, %s4053_s27 }
0x58d6   :  { %p4060_p13 = por %p4059_p12, %p4058_p11 }
0x58d8   :  { %p4061_p0 = pnand %p4060_p13, %p4054_p10 }
0x593b   :  { %v2520_v31 = vpop.permute.xlu1 %2519 }
0x593c   :  { %3754 = vmatmul.mubr.msk.bf16.vlgmr.msra.gmra.mxu1 %vm238_vm4, %v2520_v31  ;;  %v2941_v31 = vsel %vm556_vm7, %v2939_v23, %v2880_v25 }
0x593d   :  { %v2943_v5 = vsel %vm2835_vm8, %v2941_v31, %v2891_v43 }
0x5944   :  { %v2955_v42 = vpop.permute.xlu0 %2954 }
0x5945   :  { %3762 = vmatmul.mubr.msk.bf16.vlgmr.msra.gmra.mxu0 %vm238_vm4, %v2955_v42  ;;  %v2948_v42 = vsel %vm2844_vm14, %v2946_v60, %v2920_v61  ;;  %vm3030_vm4 = vcmp.eq.s32.totalorder %v4205_v9, 10 }
0x59fc   :  { %v2558_v19 = vpop.f32.mrf.mxu1 }
0x59fd   :  { %v2559_v7 = vadd.f32 %v5279_v17, %v2558_v19  ;;  %v2945_v19 = vsel %vm2838_vm13, %v2943_v5, %v2902_v45 }
0x59fe   :  { %v3755_v50 = vpop.f32.mrf.mxu1 }
0x59ff   :  { %v2564_v30 = vadd.f32 %v2559_v7, %v106_v58 }
0x5a00   :  { %v2561_v40 = vpop.f32.mrf.mxu1 }
0x5a01   :  { %v2565_v55 = vsel %vm116_vm6, %v2564_v30, -1e+30 }
0x5a02   :  { %v3756_v12 = vpop.f32.mrf.mxu1  ;;  %v2566_v10 = vsel %vm556_vm7, %v2565_v55, -inf }
0x5a03   :  { %2567 = vmax.xlane.f32.xlu1 %v2566_v10 }
0x5a05   :  { %v2993_v21 = vpop.f32.mrf.mxu0 }
0x5a06   :  { %v2994_v11 = vadd.f32 %v5279_v17, %v2993_v21 }
0x5a07   :  { %v3763_v22 = vpop.f32.mrf.mxu0 }
0x5a08   :  { %v3000_v44 = vsel %vm116_vm6, %v2994_v11, -1e+30 }
0x5a09   :  { %3002 = vmax.xlane.f32.xlu0 %v3000_v44  ;;  %v2996_v6 = vpop.f32.mrf.mxu0 }
0x5a0a   :  { %v2997_v62 = vadd.f32 %v5279_v17, %v2996_v6 }
0x5a0b   :  { %v3764_v1 = vpop.f32.mrf.mxu0 }
0x5a0c   :  { %v3001_v3 = vsel %vm116_vm6, %v2997_v62, -1e+30 }
0x5a0d   :  { %3004 = vmax.xlane.f32.xlu1 %v3001_v3 }
0x5a1e   :  { %3033 = vperm.xlu1 %3785, %v2994_v11  }
0x5a22   :  { %3787 = vset.pattern.permute.xlu1 %v4090_v15 }
0x5a8c   :  { %v2568_v0 = vpop.xlane.xlu1 %2567 }
0x5a8d   :  { %vm2569_vm3 = vcmp.ge.f32.partialorder %v2565_v55, %v2568_v0 }
0x5a8e   :  { %v2570_v53 = vsel %vm2569_vm3, %v4424_v56, 256.0 }
0x5a8f   :  { %v2571_v27 = vsel %vm556_vm7, %v2570_v53, inf }
0x5a90   :  { %2572 = vmin.xlane.f32.xlu0 %v2571_v27 }
0x5a92   :  { %v3003_v49 = vpop.xlane.xlu0 %3002 }
0x5a93   :  { %v3006_v4 = vsel %vm116_vm6, %v2994_v11, %v3003_v49 }
0x5a94   :  { %v3008_v16 = vsub.f32 %v3006_v4, %v3003_v49 }
0x5a96   :  { %v3010_v8 = vmul.f32 1.442695, %v3008_v16  ;;  %v3005_v17 = vpop.xlane.xlu1 %3004 }
0x5a97   :  { %v3007_v26 = vsel %vm116_vm6, %v2997_v62, %v3005_v17 }
0x5a98   :  { %3967 = vpow2.f32 %v3010_v8  ;;  %v3009_v63 = vsub.f32 %v3007_v26, %v3005_v17 }
0x5a9a   :  { %v3012_v51 = vmul.f32 1.442695, %v3009_v63  ;;  %v3034_v50 = vpop.permute.xlu1 %3033 }
0x5a9c   :  { %3969 = vpow2.f32 %v3012_v51 }
0x5aa5   :  { %v3968_v56 = vpop.eup %3967 }
0x5aa6   :  { %v3014_v59 = vsel %vm116_vm6, %v3968_v56, 0.0 }
0x5aa7   :  { %3016 = vadd.xlane.f32.xlu1 %v3014_v59 }
0x5aa9   :  { %v3970_v20 = vpop.eup %3969 }
0x5aaa   :  { %v3015_v41 = vsel %vm116_vm6, %v3970_v20, 0.0 }
0x5aab   :  { %3018 = vadd.xlane.f32.xlu0 %v3015_v41 }
0x5ac1   :  { %3038 = vperm.xlu0 %3786, %v2997_v62  }
0x5ac5   :  { %3788 = vset.pattern.permute.xlu0 %v4090_v15 }
0x5b19   :  { %v2573_v36 = vpop.xlane.xlu0 %2572 }
0x5b1a   :  { %v2931_v57 = vrot.slane %v2573_v36, %v4261_v32  ;;  %v2935_v2 = vrot.slane %v2573_v36, %v4266_v34  ;;  %v2947_v32 = vsel %vm2841_vm2, %v2945_v19, %v2913_v37 }
0x5b1b   :  { %v2949_v46 = vsel %vm2844_vm14, %v2947_v32, %v2924_v24 }
0x5b1c   :  { %v2950_v58 = vsel %vm2847_vm0, %v2948_v42, %v2931_v57  ;;  %v2951_v7 = vsel %vm2847_vm0, %v2949_v46, %v2935_v2 }
0x5b1d   :  { %3046 = vperm.xlu1 %3787, %v2950_v58  }
0x5b21   :  { %3051 = vperm.xlu1 %3787, %v2951_v7  }
0x5b30   :  { %v3017_v28 = vpop.xlane.xlu1 %3016 }
0x5b31   :  { %3971 = vrcp.f32 %v3017_v28 }
0x5b34   :  { %v3019_v30 = vpop.xlane.xlu0 %3018 }
0x5b35   :  { %3973 = vrcp.f32 %v3019_v30 }
0x5b3c   :  { %v3039_v0 = vpop.permute.xlu0 %3038 }
0x5b3e   :  { %v3972_v40 = vpop.eup %3971 }
0x5b3f   :  { %v3022_v55 = vmul.f32 %v3972_v40, %v3017_v28 }
0x5b41   :  { %v3024_v12 = vsub.f32 2.0, %v3022_v55 }
0x5b42   :  { %v3974_v34 = vpop.eup %3973 }
0x5b43   :  { %v3023_v10 = vmul.f32 %v3974_v34, %v3019_v30  ;;  %v3026_v21 = vmul.f32 %v3972_v40, %v3024_v12 }
0x5b45   :  { %v3025_v11 = vsub.f32 2.0, %v3023_v10  ;;  %v3028_v22 = vmul.f32 %v3026_v21, %v3014_v59 }
0x5b47   :  { %v3027_v44 = vmul.f32 %v3974_v34, %v3025_v11  ;;  %v3041_v62 = vsel %vm3030_vm4, %v3034_v50, %v3028_v22 }
0x5b49   :  { %v3029_v6 = vmul.f32 %v3027_v44, %v3015_v41 }
0x5b4b   :  { %v3042_v53 = vsel %vm3030_vm4, %v3039_v0, %v3029_v6 }
0x5b98   :  { %v3047_v1 = vpop.permute.xlu1 %3046 }
0x5b99   :  { %v3054_v3 = vsel %vm3043_vm5, %v3047_v1, %v3041_v62 }
0x5b9a   :  { %3056 = vst [vmem:[#allocation7] sm:$0xff] %v3054_v3 }
0x5b9c   :  { %v3052_v27 = vpop.permute.xlu1 %3051 }
0x5b9d   :  { %v3055_v49 = vsel %vm3043_vm5, %v3052_v27, %v3042_v53 }
0x5b9e   :  { %3057 = vst [vmem:[#allocation7 + $0x8] sm:$0xff] %v3055_v49 }
0x5b9f   :  { %4064 = shalt.err (!%p4061_p0)
}
0x5ba0   :  { %s4092_s6 = smov 128   ;;  %s4093_s28 = smov 8  }
0x5ba1   :  { %3069 = dma.vmem_to_hbm [thread:$0]  %s3064_s16, 256, %s5437_s9, [#allocation4], %s4092_s6, %s4092_s6, %s4093_s28  }
0x5ba2   :  { %4077 = dma.done.wait [#allocation4], 256  }
0x5ba3   :  { %4078 = vsyncadd [#allocation4], 4294967040 }
0x5ba4   :  { %3073 = vsyncpa [#allocation3], 1 }
0x5ba5   :  { %3074 = vsyncpa [#allocation6], 1 }
0x5ba6   :  { %3075 = vsyncpa [#allocation4], 1 }

</bundles_post_ra>
